<compile_context>
chip_gen: v7x
topology: tpu7x:2x2x1
jax: 0.10.0
libtpu: 0.0.40
codegen_flags: <defaults>
</compile_context>

<pallas_src>
import functools

import jax
import jax.numpy as jnp
import numpy as np
from jax.experimental import pallas as pl
from jax.experimental.pallas import tpu as pltpu

# lM layer sizes.
D_IN = 8
D_HID = 512
D_OUT = 64
NUM_MID = 8  # l2..l9

# Largest single-step batch / batch-tile. 512 rows x 512 cols x f32 = 1 MiB of live
# activations per chain; weights are grid-invariant, so VMEM stays far below the limit.
MAX_TILE_B = 512


def mlp_kernel(x_ref, w_in_ref, b_in_ref, w_mid_ref, b_mid_ref, w_out_ref, b_out_ref,
               o_ref, *, split):
    """One batch tile through the whole 10-layer MLP.

    Weights are bf16 (MXU input dtype); accumulation and all elementwise math stay f32
    (preferred_element_type=f32; bias/ReLU on the VPU in f32).

    When `split` is True the tile is processed as two independent half-tiles so the
    scheduler can overlap one half's MXU matmul with the other half's VPU epilogue.
    """

    def dense(h, w, b, relu):
        y = jnp.dot(h.astype(jnp.bfloat16), w, preferred_element_type=jnp.float32) + b
        return jnp.maximum(y, 0.0) if relu else y

    x = x_ref[...]
    if split:
        half = x.shape[0] // 2
        chains = [x[:half], x[half:]]          # two independent dependency chains
    else:
        chains = [x]

    # Layer 1: (rows, 8) @ (8, 512) + b, ReLU
    chains = [dense(h, w_in_ref[...], b_in_ref[...], relu=True) for h in chains]

    # Layers 2..9: (rows, 512) @ (512, 512) + b, ReLU  (fully unrolled -> one basic block,
    # the two chains give the scheduler MXU/VPU overlap material).
    for k in range(NUM_MID):
        w_k = w_mid_ref[k]
        b_k = b_mid_ref[k]
        chains = [dense(h, w_k, b_k, relu=True) for h in chains]

    # Layer 10 (no activation): (rows, 512) @ (512, 64) + b
    outs = [dense(h, w_out_ref[...], b_out_ref[...], relu=False).astype(o_ref.dtype)
            for h in chains]

    if split:
        half = outs[0].shape[0]
        o_ref[pl.ds(0, half), :] = outs[0]
        o_ref[pl.ds(half, half), :] = outs[1]
    else:
        o_ref[...] = outs[0]


def _param_spec(shape):
    """Grid-invariant parameter block: same block every step, single-buffered.

    The constant index_map means the block is never re-fetched across grid steps;
    Buffered(1) avoids wasting a second ~4.3 MiB VMEM copy on double-buffering.
    """
    index_map = lambda i: (0,) * len(shape)
    return pl.BlockSpec(shape, index_map, pipeline_mode=pl.Buffered(1))


def mlp_forward(x, w_in, b_in, w_mid, b_mid, w_out, b_out):
    """x: (B, 8) float32.  Weights bf16, pre-transposed to (in, out); biases f32.

    Call this once with as many rows as possible (the whole (nt+1, 8) array) -- at small
    B the runtime is ~100% the one-time weight read from HBM.
    """
    B, d_in = x.shape
    assert d_in == D_IN

    if B <= MAX_TILE_B:
        tile_b, b_pad = B, B
    else:
        tile_b = MAX_TILE_B
        b_pad = ((B + tile_b - 1) // tile_b) * tile_b
        if b_pad != B:
            x = jnp.pad(x, ((0, b_pad - B), (0, 0)))  # zero-pad remainder, sliced off below
    num_steps = b_pad // tile_b

    # Split large tiles into two half-chains (MXU/VPU overlap); keep halves 8-row aligned.
    split = (tile_b >= 256) and (tile_b % 16 == 0)

    # Batch-tiled activations / outputs.
    x_spec = pl.BlockSpec((tile_b, D_IN), lambda i: (i, 0))
    out_spec = pl.BlockSpec((tile_b, D_OUT), lambda i: (i, 0))

    # Parameters: full, grid-invariant, single-buffered blocks.
    param_specs = [
        _param_spec((D_IN, D_HID)),              # w_in
        _param_spec((1, D_HID)),                 # b_in
        _param_spec((NUM_MID, D_HID, D_HID)),    # w_mid packed (one big contiguous DMA)
        _param_spec((NUM_MID, 1, D_HID)),        # b_mid packed
        _param_spec((D_HID, D_OUT)),             # w_out
        _param_spec((1, D_OUT)),                 # b_out
    ]

    # Megacore sharding only when per-core compute (>= 2 tiles = 1024 rows ~= 4.4 GFLOP,
    # ~5 us of MXU time) amortizes the extra per-core ~4.3 MiB weight read (~1.3-5 us
    # depending on generation). Below that, sharding just doubles the dominant HBM traffic.
    semantics = ("parallel",) if num_steps >= 4 else ("arbitrary",)

    out = pl.pallas_call(
        functools.partial(mlp_kernel, split=split),
        out_shape=jax.ShapeDtypeStruct((b_pad, D_OUT), jnp.float32),
        grid_spec=pltpu.PrefetchScalarGridSpec(
            num_scalar_prefetch=0,
            grid=(num_steps,),
            in_specs=[x_spec] + param_specs,
            out_specs=out_spec,
        ),
        compiler_params=pltpu.CompilerParams(
            dimension_semantics=semantics,
            vmem_limit_bytes=32 << 20,  # real footprint ~6-10 MiB; fits every generation
        ),
    )(x, w_in, b_in, w_mid, b_mid, w_out, b_out)

    return out[:B] if b_pad != B else out


def init_params(key):
    """f32 master parameters matching lM's Linear layers.

    PyTorch Linear weight is (out, in); we store the transpose (in, out) so the kernel
    computes h @ W + b.  Init matches nn.Linear default U(-1/sqrt(in), 1/sqrt(in)).
    """
    def uniform(k, shape, fan_in):
        bound = 1.0 / np.sqrt(fan_in)
        return jax.random.uniform(k, shape, jnp.float32, -bound, bound)

    keys = jax.random.split(key, 2 * (2 + NUM_MID))
    ki = iter(keys)

    w_in = uniform(next(ki), (D_IN, D_HID), D_IN)
    b_in = uniform(next(ki), (1, D_HID), D_IN)
    w_mid = jnp.stack([uniform(next(ki), (D_HID, D_HID), D_HID) for _ in range(NUM_MID)])
    b_mid = jnp.stack([uniform(next(ki), (1, D_HID), D_HID) for _ in range(NUM_MID)])
    w_out = uniform(next(ki), (D_HID, D_OUT), D_HID)
    b_out = uniform(next(ki), (1, D_OUT), D_HID)
    return w_in, b_in, w_mid, b_mid, w_out, b_out


def prepare_params(params_f32):
    """One-time cast of streaming weights to bf16 (biases stay f32).

    Do this ONCE outside the per-call path so every mlp_forward call streams half the
    weight bytes from HBM (the kernel is weight-bandwidth bound at small batch).
    """
    w_in, b_in, w_mid, b_mid, w_out, b_out = params_f32
    return (w_in.astype(jnp.bfloat16), b_in,
            w_mid.astype(jnp.bfloat16), b_mid,
            w_out.astype(jnp.bfloat16), b_out)


def mlp_reference_f32(x, params_f32):
    """True f32 reference (HIGHEST precision) for parity with the PyTorch f32 module."""
    w_in, b_in, w_mid, b_mid, w_out, b_out = params_f32
    hi = jax.lax.Precision.HIGHEST
    h = jnp.maximum(jnp.dot(x, w_in, precision=hi) + b_in, 0.0)
    for k in range(NUM_MID):
        h = jnp.maximum(jnp.dot(h, w_mid[k], precision=hi) + b_mid[k], 0.0)
    return jnp.dot(h, w_out, precision=hi) + b_out


def mlp_reference_matched(x, kparams):
    """Same mixed precision as the kernel (bf16 MXU inputs, f32 accumulation), plain jnp."""
    w_in, b_in, w_mid, b_mid, w_out, b_out = kparams
    h = jnp.dot(x.astype(jnp.bfloat16), w_in, preferred_element_type=jnp.float32) + b_in
    h = jnp.maximum(h, 0.0)
    for k in range(NUM_MID):
        h = jnp.dot(h.astype(jnp.bfloat16), w_mid[k],
                    preferred_element_type=jnp.float32) + b_mid[k]
        h = jnp.maximum(h, 0.0)
    return jnp.dot(h.astype(jnp.bfloat16), w_out,
                   preferred_element_type=jnp.float32) + b_out


if __name__ == "__main__":
    key = jax.random.PRNGKey(0)
    key, k_small, k_big = jax.random.split(key, 3)

    params_f32 = init_params(key)
    kparams = prepare_params(params_f32)   # one-time bf16 cast of the streaming weights

    # --- Small-batch path (the homework feeds rows of an (nt+1, 8) array; B=16 here). ---
    B_small = 16
    x_small = jax.random.normal(k_small, (B_small, D_IN), jnp.float32)
    out_small = jax.block_until_ready(mlp_forward(x_small, *kparams))
    assert out_small.shape == (B_small, D_OUT)

    np.testing.assert_allclose(np.asarray(out_small),
                               np.asarray(mlp_reference_matched(x_small, kparams)),
                               rtol=1e-2, atol=1e-3)
    # Parity with the original f32 module (bf16 weight storage => loosened tolerance).
    np.testing.assert_allclose(np.asarray(out_small),
                               np.asarray(mlp_reference_f32(x_small, params_f32)),
                               rtol=5e-2, atol=2e-2)

    # --- Throughput path: whole batch in one call (512-row tiles, remainder padding,
    #     split half-chain interleave). This is how the (nt+1, 8) array should be fed. ---
    B_big = 1200
    x_big = jax.random.normal(k_big, (B_big, D_IN), jnp.float32)
    out_big = jax.block_until_ready(mlp_forward(x_big, *kparams))
    assert out_big.shape == (B_big, D_OUT)

    np.testing.assert_allclose(np.asarray(out_big),
                               np.asarray(mlp_reference_matched(x_big, kparams)),
                               rtol=1e-2, atol=1e-3)
    np.testing.assert_allclose(np.asarray(out_big),
                               np.asarray(mlp_reference_f32(x_big, params_f32)),
                               rtol=5e-2, atol=2e-2)

    print("KERNEL_OK")
</pallas_src>

<mosaic_0001>
module attributes {stable_mosaic.version = 11 : i64} {
  func.func @mlp_kernel(%arg0: i32, %arg1: memref<16x8xf32, #tpu.memory_space<vmem>>, %arg2: memref<8x512xbf16, #tpu.memory_space<vmem>>, %arg3: memref<1x512xf32, #tpu.memory_space<vmem>>, %arg4: memref<8x512x512xbf16, #tpu.memory_space<vmem>>, %arg5: memref<8x1x512xf32, #tpu.memory_space<vmem>>, %arg6: memref<512x64xbf16, #tpu.memory_space<vmem>>, %arg7: memref<1x64xf32, #tpu.memory_space<vmem>>, %arg8: memref<16x64xf32, #tpu.memory_space<vmem>>) attributes {dimension_semantics = [#tpu.dimension_semantics<arbitrary>], iteration_bounds = array<i64: 1>, scalar_prefetch = 0 : i64, scratch_operands = 0 : i64, tpu.core_type = #tpu.core_type<tc>, window_params = [{transform_indices = @transform_0, window_bounds = array<i64: 16, 8>}, {pipeline_mode = #tpu.pipeline_mode<synchronous>, transform_indices = @transform_1, window_bounds = array<i64: 8, 512>}, {pipeline_mode = #tpu.pipeline_mode<synchronous>, transform_indices = @transform_2, window_bounds = array<i64: 1, 512>}, {pipeline_mode = #tpu.pipeline_mode<synchronous>, transform_indices = @transform_3, window_bounds = array<i64: 8, 512, 512>}, {pipeline_mode = #tpu.pipeline_mode<synchronous>, transform_indices = @transform_4, window_bounds = array<i64: 8, 1, 512>}, {pipeline_mode = #tpu.pipeline_mode<synchronous>, transform_indices = @transform_5, window_bounds = array<i64: 512, 64>}, {pipeline_mode = #tpu.pipeline_mode<synchronous>, transform_indices = @transform_6, window_bounds = array<i64: 1, 64>}, {transform_indices = @transform_7, window_bounds = array<i64: 16, 64>}]} {
    %c0 = arith.constant 0 : index
    %c0_0 = arith.constant 0 : index
    %0 = vector.load %arg1[%c0, %c0_0] : memref<16x8xf32, #tpu.memory_space<vmem>>, vector<16x8xf32>
    %c0_1 = arith.constant 0 : index
    %c0_2 = arith.constant 0 : index
    %1 = vector.load %arg2[%c0_1, %c0_2] : memref<8x512xbf16, #tpu.memory_space<vmem>>, vector<8x512xbf16>
    %c0_3 = arith.constant 0 : index
    %c0_4 = arith.constant 0 : index
    %2 = vector.load %arg3[%c0_3, %c0_4] : memref<1x512xf32, #tpu.memory_space<vmem>>, vector<1x512xf32>
    %3 = arith.truncf %0 : vector<16x8xf32> to vector<16x8xbf16>
    %cst = arith.constant dense<0.000000e+00> : vector<16x512xf32>
    %4 = tpu.matmul %3, %1, %cst {dimension_numbers = #tpu.dot_dimension_numbers<[1], [0], [0], [1], [0, 0, 1, 1], [], []>} : vector<16x8xbf16>, vector<8x512xbf16>, vector<16x512xf32> -> vector<16x512xf32>
    %5 = vector.broadcast %2 : vector<1x512xf32> to vector<16x512xf32>
    %6 = arith.addf %4, %5 : vector<16x512xf32>
    %cst_5 = arith.constant 0.000000e+00 : f32
    %7 = vector.broadcast %cst_5 : f32 to vector<16x512xf32>
    %8 = arith.maximumf %6, %7 : vector<16x512xf32>
    %c0_6 = arith.constant 0 : index
    %c0_7 = arith.constant 0 : index
    %c0_8 = arith.constant 0 : index
    %9 = vector.load %arg4[%c0_6, %c0_7, %c0_8] : memref<8x512x512xbf16, #tpu.memory_space<vmem>>, vector<1x512x512xbf16>
    %10 = vector.shape_cast %9 : vector<1x512x512xbf16> to vector<512x512xbf16>
    %c0_9 = arith.constant 0 : index
    %c0_10 = arith.constant 0 : index
    %c0_11 = arith.constant 0 : index
    %11 = vector.load %arg5[%c0_9, %c0_10, %c0_11] : memref<8x1x512xf32, #tpu.memory_space<vmem>>, vector<1x1x512xf32>
    %12 = vector.shape_cast %11 : vector<1x1x512xf32> to vector<1x512xf32>
    %13 = arith.truncf %8 : vector<16x512xf32> to vector<16x512xbf16>
    %cst_12 = arith.constant dense<0.000000e+00> : vector<16x512xf32>
    %14 = tpu.matmul %13, %10, %cst_12 {dimension_numbers = #tpu.dot_dimension_numbers<[1], [0], [0], [1], [0, 0, 1, 1], [], []>} : vector<16x512xbf16>, vector<512x512xbf16>, vector<16x512xf32> -> vector<16x512xf32>
    %15 = vector.broadcast %12 : vector<1x512xf32> to vector<16x512xf32>
    %16 = arith.addf %14, %15 : vector<16x512xf32>
    %cst_13 = arith.constant 0.000000e+00 : f32
    %17 = vector.broadcast %cst_13 : f32 to vector<16x512xf32>
    %18 = arith.maximumf %16, %17 : vector<16x512xf32>
    %c1 = arith.constant 1 : index
    %c0_14 = arith.constant 0 : index
    %c0_15 = arith.constant 0 : index
    %19 = vector.load %arg4[%c1, %c0_14, %c0_15] : memref<8x512x512xbf16, #tpu.memory_space<vmem>>, vector<1x512x512xbf16>
    %20 = vector.shape_cast %19 : vector<1x512x512xbf16> to vector<512x512xbf16>
    %c1_16 = arith.constant 1 : index
    %c0_17 = arith.constant 0 : index
    %c0_18 = arith.constant 0 : index
    %21 = vector.load %arg5[%c1_16, %c0_17, %c0_18] : memref<8x1x512xf32, #tpu.memory_space<vmem>>, vector<1x1x512xf32>
    %22 = vector.shape_cast %21 : vector<1x1x512xf32> to vector<1x512xf32>
    %23 = arith.truncf %18 : vector<16x512xf32> to vector<16x512xbf16>
    %cst_19 = arith.constant dense<0.000000e+00> : vector<16x512xf32>
    %24 = tpu.matmul %23, %20, %cst_19 {dimension_numbers = #tpu.dot_dimension_numbers<[1], [0], [0], [1], [0, 0, 1, 1], [], []>} : vector<16x512xbf16>, vector<512x512xbf16>, vector<16x512xf32> -> vector<16x512xf32>
    %25 = vector.broadcast %22 : vector<1x512xf32> to vector<16x512xf32>
    %26 = arith.addf %24, %25 : vector<16x512xf32>
    %cst_20 = arith.constant 0.000000e+00 : f32
    %27 = vector.broadcast %cst_20 : f32 to vector<16x512xf32>
    %28 = arith.maximumf %26, %27 : vector<16x512xf32>
    %c2 = arith.constant 2 : index
    %c0_21 = arith.constant 0 : index
    %c0_22 = arith.constant 0 : index
    %29 = vector.load %arg4[%c2, %c0_21, %c0_22] : memref<8x512x512xbf16, #tpu.memory_space<vmem>>, vector<1x512x512xbf16>
    %30 = vector.shape_cast %29 : vector<1x512x512xbf16> to vector<512x512xbf16>
    %c2_23 = arith.constant 2 : index
    %c0_24 = arith.constant 0 : index
    %c0_25 = arith.constant 0 : index
    %31 = vector.load %arg5[%c2_23, %c0_24, %c0_25] : memref<8x1x512xf32, #tpu.memory_space<vmem>>, vector<1x1x512xf32>
    %32 = vector.shape_cast %31 : vector<1x1x512xf32> to vector<1x512xf32>
    %33 = arith.truncf %28 : vector<16x512xf32> to vector<16x512xbf16>
    %cst_26 = arith.constant dense<0.000000e+00> : vector<16x512xf32>
    %34 = tpu.matmul %33, %30, %cst_26 {dimension_numbers = #tpu.dot_dimension_numbers<[1], [0], [0], [1], [0, 0, 1, 1], [], []>} : vector<16x512xbf16>, vector<512x512xbf16>, vector<16x512xf32> -> vector<16x512xf32>
    %35 = vector.broadcast %32 : vector<1x512xf32> to vector<16x512xf32>
    %36 = arith.addf %34, %35 : vector<16x512xf32>
    %cst_27 = arith.constant 0.000000e+00 : f32
    %37 = vector.broadcast %cst_27 : f32 to vector<16x512xf32>
    %38 = arith.maximumf %36, %37 : vector<16x512xf32>
    %c3 = arith.constant 3 : index
    %c0_28 = arith.constant 0 : index
    %c0_29 = arith.constant 0 : index
    %39 = vector.load %arg4[%c3, %c0_28, %c0_29] : memref<8x512x512xbf16, #tpu.memory_space<vmem>>, vector<1x512x512xbf16>
    %40 = vector.shape_cast %39 : vector<1x512x512xbf16> to vector<512x512xbf16>
    %c3_30 = arith.constant 3 : index
    %c0_31 = arith.constant 0 : index
    %c0_32 = arith.constant 0 : index
    %41 = vector.load %arg5[%c3_30, %c0_31, %c0_32] : memref<8x1x512xf32, #tpu.memory_space<vmem>>, vector<1x1x512xf32>
    %42 = vector.shape_cast %41 : vector<1x1x512xf32> to vector<1x512xf32>
    %43 = arith.truncf %38 : vector<16x512xf32> to vector<16x512xbf16>
    %cst_33 = arith.constant dense<0.000000e+00> : vector<16x512xf32>
    %44 = tpu.matmul %43, %40, %cst_33 {dimension_numbers = #tpu.dot_dimension_numbers<[1], [0], [0], [1], [0, 0, 1, 1], [], []>} : vector<16x512xbf16>, vector<512x512xbf16>, vector<16x512xf32> -> vector<16x512xf32>
    %45 = vector.broadcast %42 : vector<1x512xf32> to vector<16x512xf32>
    %46 = arith.addf %44, %45 : vector<16x512xf32>
    %cst_34 = arith.constant 0.000000e+00 : f32
    %47 = vector.broadcast %cst_34 : f32 to vector<16x512xf32>
    %48 = arith.maximumf %46, %47 : vector<16x512xf32>
    %c4 = arith.constant 4 : index
    %c0_35 = arith.constant 0 : index
    %c0_36 = arith.constant 0 : index
    %49 = vector.load %arg4[%c4, %c0_35, %c0_36] : memref<8x512x512xbf16, #tpu.memory_space<vmem>>, vector<1x512x512xbf16>
    %50 = vector.shape_cast %49 : vector<1x512x512xbf16> to vector<512x512xbf16>
    %c4_37 = arith.constant 4 : index
    %c0_38 = arith.constant 0 : index
    %c0_39 = arith.constant 0 : index
    %51 = vector.load %arg5[%c4_37, %c0_38, %c0_39] : memref<8x1x512xf32, #tpu.memory_space<vmem>>, vector<1x1x512xf32>
    %52 = vector.shape_cast %51 : vector<1x1x512xf32> to vector<1x512xf32>
    %53 = arith.truncf %48 : vector<16x512xf32> to vector<16x512xbf16>
    %cst_40 = arith.constant dense<0.000000e+00> : vector<16x512xf32>
    %54 = tpu.matmul %53, %50, %cst_40 {dimension_numbers = #tpu.dot_dimension_numbers<[1], [0], [0], [1], [0, 0, 1, 1], [], []>} : vector<16x512xbf16>, vector<512x512xbf16>, vector<16x512xf32> -> vector<16x512xf32>
    %55 = vector.broadcast %52 : vector<1x512xf32> to vector<16x512xf32>
    %56 = arith.addf %54, %55 : vector<16x512xf32>
    %cst_41 = arith.constant 0.000000e+00 : f32
    %57 = vector.broadcast %cst_41 : f32 to vector<16x512xf32>
    %58 = arith.maximumf %56, %57 : vector<16x512xf32>
    %c5 = arith.constant 5 : index
    %c0_42 = arith.constant 0 : index
    %c0_43 = arith.constant 0 : index
    %59 = vector.load %arg4[%c5, %c0_42, %c0_43] : memref<8x512x512xbf16, #tpu.memory_space<vmem>>, vector<1x512x512xbf16>
    %60 = vector.shape_cast %59 : vector<1x512x512xbf16> to vector<512x512xbf16>
    %c5_44 = arith.constant 5 : index
    %c0_45 = arith.constant 0 : index
    %c0_46 = arith.constant 0 : index
    %61 = vector.load %arg5[%c5_44, %c0_45, %c0_46] : memref<8x1x512xf32, #tpu.memory_space<vmem>>, vector<1x1x512xf32>
    %62 = vector.shape_cast %61 : vector<1x1x512xf32> to vector<1x512xf32>
    %63 = arith.truncf %58 : vector<16x512xf32> to vector<16x512xbf16>
    %cst_47 = arith.constant dense<0.000000e+00> : vector<16x512xf32>
    %64 = tpu.matmul %63, %60, %cst_47 {dimension_numbers = #tpu.dot_dimension_numbers<[1], [0], [0], [1], [0, 0, 1, 1], [], []>} : vector<16x512xbf16>, vector<512x512xbf16>, vector<16x512xf32> -> vector<16x512xf32>
    %65 = vector.broadcast %62 : vector<1x512xf32> to vector<16x512xf32>
    %66 = arith.addf %64, %65 : vector<16x512xf32>
    %cst_48 = arith.constant 0.000000e+00 : f32
    %67 = vector.broadcast %cst_48 : f32 to vector<16x512xf32>
    %68 = arith.maximumf %66, %67 : vector<16x512xf32>
    %c6 = arith.constant 6 : index
    %c0_49 = arith.constant 0 : index
    %c0_50 = arith.constant 0 : index
    %69 = vector.load %arg4[%c6, %c0_49, %c0_50] : memref<8x512x512xbf16, #tpu.memory_space<vmem>>, vector<1x512x512xbf16>
    %70 = vector.shape_cast %69 : vector<1x512x512xbf16> to vector<512x512xbf16>
    %c6_51 = arith.constant 6 : index
    %c0_52 = arith.constant 0 : index
    %c0_53 = arith.constant 0 : index
    %71 = vector.load %arg5[%c6_51, %c0_52, %c0_53] : memref<8x1x512xf32, #tpu.memory_space<vmem>>, vector<1x1x512xf32>
    %72 = vector.shape_cast %71 : vector<1x1x512xf32> to vector<1x512xf32>
    %73 = arith.truncf %68 : vector<16x512xf32> to vector<16x512xbf16>
    %cst_54 = arith.constant dense<0.000000e+00> : vector<16x512xf32>
    %74 = tpu.matmul %73, %70, %cst_54 {dimension_numbers = #tpu.dot_dimension_numbers<[1], [0], [0], [1], [0, 0, 1, 1], [], []>} : vector<16x512xbf16>, vector<512x512xbf16>, vector<16x512xf32> -> vector<16x512xf32>
    %75 = vector.broadcast %72 : vector<1x512xf32> to vector<16x512xf32>
    %76 = arith.addf %74, %75 : vector<16x512xf32>
    %cst_55 = arith.constant 0.000000e+00 : f32
    %77 = vector.broadcast %cst_55 : f32 to vector<16x512xf32>
    %78 = arith.maximumf %76, %77 : vector<16x512xf32>
    %c7 = arith.constant 7 : index
    %c0_56 = arith.constant 0 : index
    %c0_57 = arith.constant 0 : index
    %79 = vector.load %arg4[%c7, %c0_56, %c0_57] : memref<8x512x512xbf16, #tpu.memory_space<vmem>>, vector<1x512x512xbf16>
    %80 = vector.shape_cast %79 : vector<1x512x512xbf16> to vector<512x512xbf16>
    %c7_58 = arith.constant 7 : index
    %c0_59 = arith.constant 0 : index
    %c0_60 = arith.constant 0 : index
    %81 = vector.load %arg5[%c7_58, %c0_59, %c0_60] : memref<8x1x512xf32, #tpu.memory_space<vmem>>, vector<1x1x512xf32>
    %82 = vector.shape_cast %81 : vector<1x1x512xf32> to vector<1x512xf32>
    %83 = arith.truncf %78 : vector<16x512xf32> to vector<16x512xbf16>
    %cst_61 = arith.constant dense<0.000000e+00> : vector<16x512xf32>
    %84 = tpu.matmul %83, %80, %cst_61 {dimension_numbers = #tpu.dot_dimension_numbers<[1], [0], [0], [1], [0, 0, 1, 1], [], []>} : vector<16x512xbf16>, vector<512x512xbf16>, vector<16x512xf32> -> vector<16x512xf32>
    %85 = vector.broadcast %82 : vector<1x512xf32> to vector<16x512xf32>
    %86 = arith.addf %84, %85 : vector<16x512xf32>
    %cst_62 = arith.constant 0.000000e+00 : f32
    %87 = vector.broadcast %cst_62 : f32 to vector<16x512xf32>
    %88 = arith.maximumf %86, %87 : vector<16x512xf32>
    %c0_63 = arith.constant 0 : index
    %c0_64 = arith.constant 0 : index
    %89 = vector.load %arg6[%c0_63, %c0_64] : memref<512x64xbf16, #tpu.memory_space<vmem>>, vector<512x64xbf16>
    %c0_65 = arith.constant 0 : index
    %c0_66 = arith.constant 0 : index
    %90 = vector.load %arg7[%c0_65, %c0_66] : memref<1x64xf32, #tpu.memory_space<vmem>>, vector<1x64xf32>
    %91 = arith.truncf %88 : vector<16x512xf32> to vector<16x512xbf16>
    %cst_67 = arith.constant dense<0.000000e+00> : vector<16x64xf32>
    %92 = tpu.matmul %91, %89, %cst_67 {dimension_numbers = #tpu.dot_dimension_numbers<[1], [0], [0], [1], [0, 0, 1, 1], [], []>} : vector<16x512xbf16>, vector<512x64xbf16>, vector<16x64xf32> -> vector<16x64xf32>
    %93 = vector.broadcast %90 : vector<1x64xf32> to vector<16x64xf32>
    %94 = arith.addf %92, %93 : vector<16x64xf32>
    %c0_68 = arith.constant 0 : index
    %c0_69 = arith.constant 0 : index
    %95 = vector.load %arg8[%c0_68, %c0_69] : memref<16x64xf32, #tpu.memory_space<vmem>>, vector<16x64xf32>
    tpu.vector_store %arg8[%c0_68, %c0_69], %94 {strides = array<i32>} : memref<16x64xf32, #tpu.memory_space<vmem>>, vector<16x64xf32>,
    return
  }
  func.func @transform_0(%arg0: i32) -> (i32, i32) {
    %c0_i32 = arith.constant 0 : i32
    %c0_i32_0 = arith.constant 0 : i32
    return %arg0, %c0_i32 : i32, i32
  }
  func.func @transform_1(%arg0: i32) -> (i32, i32) {
    %c0_i32 = arith.constant 0 : i32
    %c0_i32_0 = arith.constant 0 : i32
    %c0_i32_1 = arith.constant 0 : i32
    return %c0_i32, %c0_i32_0 : i32, i32
  }
  func.func @transform_2(%arg0: i32) -> (i32, i32) {
    %c0_i32 = arith.constant 0 : i32
    %c0_i32_0 = arith.constant 0 : i32
    %c0_i32_1 = arith.constant 0 : i32
    return %c0_i32, %c0_i32_0 : i32, i32
  }
  func.func @transform_3(%arg0: i32) -> (i32, i32, i32) {
    %c0_i32 = arith.constant 0 : i32
    %c0_i32_0 = arith.constant 0 : i32
    %c0_i32_1 = arith.constant 0 : i32
    %c0_i32_2 = arith.constant 0 : i32
    return %c0_i32, %c0_i32_0, %c0_i32_1 : i32, i32, i32
  }
  func.func @transform_4(%arg0: i32) -> (i32, i32, i32) {
    %c0_i32 = arith.constant 0 : i32
    %c0_i32_0 = arith.constant 0 : i32
    %c0_i32_1 = arith.constant 0 : i32
    %c0_i32_2 = arith.constant 0 : i32
    return %c0_i32, %c0_i32_0, %c0_i32_1 : i32, i32, i32
  }
  func.func @transform_5(%arg0: i32) -> (i32, i32) {
    %c0_i32 = arith.constant 0 : i32
    %c0_i32_0 = arith.constant 0 : i32
    %c0_i32_1 = arith.constant 0 : i32
    return %c0_i32, %c0_i32_0 : i32, i32
  }
  func.func @transform_6(%arg0: i32) -> (i32, i32) {
    %c0_i32 = arith.constant 0 : i32
    %c0_i32_0 = arith.constant 0 : i32
    %c0_i32_1 = arith.constant 0 : i32
    return %c0_i32, %c0_i32_0 : i32, i32
  }
  func.func @transform_7(%arg0: i32) -> (i32, i32) {
    %c0_i32 = arith.constant 0 : i32
    %c0_i32_0 = arith.constant 0 : i32
    return %arg0, %c0_i32 : i32, i32
  }
}

</mosaic_0001>

<bundles_post_ra>
// kernel: tpu_custom_call.1
= control target key start
LH: loop header
LB: loop body
LE: loop exit
PB: predicated region body
PF: predicated region fallthrough
CT: control target
= control target key end

     0   :  { %12 = vsyncpa [#allocation3], 0  ;;  %s11698_s0 = inlined_call_operand.vmem [shape: f32[16,8], index: 0, kind: input, shape index: {}]   ;;  %s11699_s1 = inlined_call_operand.hbm [shape: bf16[8,512], index: 1, kind: input, shape index: {}]   ;;  %s11700_s2 = inlined_call_operand.hbm [shape: f32[1,512], index: 2, kind: input, shape index: {}]   ;;  %s11701_s3 = inlined_call_operand.hbm [shape: bf16[8,512,512], index: 3, kind: input, shape index: {}]   ;;  %s11702_s4 = inlined_call_operand.hbm [shape: f32[8,1,512], index: 4, kind: input, shape index: {}]   ;;  %s11703_s5 = inlined_call_operand.vmem [shape: bf16[512,64], index: 5, kind: input, shape index: {}]   ;;  %s11704_s6 = inlined_call_operand.hbm [shape: f32[1,64], index: 6, kind: input, shape index: {}]   ;;  %s11705_s7 = inlined_call_operand.hbm [shape: f32[16,64], index: 7, kind: output, shape index: {}]  }
   0x1   :  { %13 = vsyncpa [#allocation6], 0 }
   0x2   :  { %14 = vsyncpa [#allocation9], 0 }
   0x3   :  { %15 = vsyncpa [#allocation4], 0  ;;  %s11377_s24 = smov [#allocation5]   ;;  %s11378_s26 = smov [#allocation8]  }
   0x4   :  { %s34_s25 = sshll.u32 %s11377_s24, 4  ;;  %s55_s27 = sshll.u32 %s11378_s26, 4  ;;  %s35_s25 = int_to_ptr.vmem [resolvable:$true] %s34_s25  ;;  %s11430_s27 = int_to_ptr.vmem [resolvable:$true] %s55_s27 }
   0x5   :  { %s11237_s30 = scalar_lea.hbm %s11700_s2, 64 }
   0x6   :  { %p11238_p0 = scmp.ne.s32.totalorder %s11700_s2, %s11237_s30  ;;  %p11241_p1 = scmp.lt.u32.totalorder %s11237_s30, %s11700_s2 }
   0x8   :  { %p11243_p2 = pnand %p11241_p1, %p11238_p0 }
   0xa   :  { %11246 = shalt.err (!%p11243_p2)
}
   0xb   :  { %s11247_s12 = scalar_lea.vmem %s35_s25, 64  ;;  %p11252_p4 = scmp.lt.s32.totalorder %s35_s25, %s35_s25 }
   0xc   :  { %p11248_p3 = scmp.ne.s32.totalorder %s35_s25, %s11247_s12  ;;  %p11253_p5 = scmp.lt.s32.totalorder %s11247_s12, %s11247_s12 }
   0xe   :  { %p11254_p6 = por %p11253_p5, %p11252_p4 }
  0x10   :  { %p11255_p7 = pnand %p11254_p6, %p11248_p3 }
  0x12   :  { %11258 = shalt.err (!%p11255_p7)
}
  0x13   :  { %37 = dma.hbm_to_vmem [thread:$0]  %s11700_s2, 64, %s35_s25, [#allocation6]  }
  0x14   :  { %s11259_s17 = scalar_lea.hbm %s11702_s4, 512 }
  0x15   :  { %p11260_p8 = scmp.ne.s32.totalorder %s11702_s4, %s11259_s17  ;;  %p11263_p9 = scmp.lt.u32.totalorder %s11259_s17, %s11702_s4 }
  0x17   :  { %p11265_p10 = pnand %p11263_p9, %p11260_p8 }
  0x19   :  { %11268 = shalt.err (!%p11265_p10)
}
  0x1a   :  { %s11269_s22 = scalar_lea.vmem %s11430_s27, 512  ;;  %p11274_p12 = scmp.lt.s32.totalorder %s11430_s27, %s11430_s27 }
  0x1b   :  { %p11270_p11 = scmp.ne.s32.totalorder %s11430_s27, %s11269_s22  ;;  %p11275_p13 = scmp.lt.s32.totalorder %s11269_s22, %s11269_s22 }
  0x1d   :  { %p11276_p0 = por %p11275_p13, %p11274_p12 }
  0x1f   :  { %p11277_p1 = pnand %p11276_p0, %p11270_p11 }
  0x21   :  { %11280 = shalt.err (!%p11277_p1)
}
  0x22   :  { %s11379_s2 = smov 64   ;;  %s11380_s23 = smov 4  }
  0x23   :  { %61 = dma.hbm_to_vmem [thread:$0]  %s11702_s4, 512, %s11430_s27, [#allocation9], %s11379_s2, %s11379_s2, %s11380_s23  }
  0x24   :  { %s11381_s26 = smov [#allocation2]   ;;  %s11382_s29 = smov [#allocation7]  }
  0x25   :  { %s24_s28 = sshll.u32 %s11381_s26, 4  ;;  %s43_s30 = sshll.u32 %s11382_s29, 4  ;;  %s25_s28 = int_to_ptr.vmem [resolvable:$true] %s24_s28  ;;  %s11461_s30 = int_to_ptr.vmem [resolvable:$true] %s43_s30 }
  0x26   :  { %s11281_s10 = scalar_lea.hbm %s11699_s1, 256 }
  0x27   :  { %p11282_p2 = scmp.ne.s32.totalorder %s11699_s1, %s11281_s10  ;;  %p11285_p3 = scmp.lt.u32.totalorder %s11281_s10, %s11699_s1 }
  0x29   :  { %p11287_p4 = pnand %p11285_p3, %p11282_p2 }
  0x2b   :  { %11290 = shalt.err (!%p11287_p4)
}
  0x2c   :  { %s11291_s4 = scalar_lea.vmem %s25_s28, 256  ;;  %p11296_p6 = scmp.lt.s32.totalorder %s25_s28, %s25_s28 }
  0x2d   :  { %p11292_p5 = scmp.ne.s32.totalorder %s25_s28, %s11291_s4  ;;  %p11297_p7 = scmp.lt.s32.totalorder %s11291_s4, %s11291_s4 }
  0x2f   :  { %p11298_p8 = por %p11297_p7, %p11296_p6 }
  0x31   :  { %p11299_p9 = pnand %p11298_p8, %p11292_p5 }
  0x33   :  { %11302 = shalt.err (!%p11299_p9)
}
  0x34   :  { %27 = dma.hbm_to_vmem [thread:$0]  %s11699_s1, 256, %s25_s28, [#allocation3]  }
  0x35   :  { %s11303_s18 = scalar_lea.hbm %s11701_s3, 131072 }
  0x36   :  { %p11304_p10 = scmp.ne.s32.totalorder %s11701_s3, %s11303_s18  ;;  %p11307_p11 = scmp.lt.u32.totalorder %s11303_s18, %s11701_s3 }
  0x38   :  { %p11309_p12 = pnand %p11307_p11, %p11304_p10 }
  0x3a   :  { %11312 = shalt.err (!%p11309_p12)
}
  0x3b   :  { %s11313_s2 = scalar_lea.vmem %s11461_s30, 131072  ;;  %p11318_p0 = scmp.lt.s32.totalorder %s11461_s30, %s11461_s30 }
  0x3c   :  { %p11314_p13 = scmp.ne.s32.totalorder %s11461_s30, %s11313_s2  ;;  %p11319_p1 = scmp.lt.s32.totalorder %s11313_s2, %s11313_s2 }
  0x3e   :  { %p11320_p2 = por %p11319_p1, %p11318_p0 }
  0x40   :  { %p11321_p3 = pnand %p11320_p2, %p11314_p13 }
  0x42   :  { %11324 = shalt.err (!%p11321_p3)
}
  0x43   :  { %s11383_s1 = smov 256   ;;  %s11384_s23 = smov 16  }
  0x44   :  { %49 = dma.hbm_to_vmem [thread:$0]  %s11701_s3, 131072, %s11461_s30, [#allocation6], %s11383_s1, %s11383_s1, %s11384_s23  }
  0x45   :  { %s11385_s26 = smov [#allocation10]   ;;  %s11325_s9 = scalar_lea.hbm %s11704_s6, 16 }
  0x46   :  { %s70_s28 = sshll.u32 %s11385_s26, 4  ;;  %p11326_p4 = scmp.ne.s32.totalorder %s11704_s6, %s11325_s9  ;;  %s71_s28 = int_to_ptr.vmem [resolvable:$true] %s70_s28 }
  0x47   :  { %p11329_p5 = scmp.lt.u32.totalorder %s11325_s9, %s11704_s6 }
  0x49   :  { %p11331_p6 = pnand %p11329_p5, %p11326_p4 }
  0x4b   :  { %11334 = shalt.err (!%p11331_p6)
}
  0x4c   :  { %s11335_s14 = scalar_lea.vmem %s71_s28, 16  ;;  %s11339_s3 = scalar_lea.vmem %s71_s28, 32 }
  0x4d   :  { %p11336_p7 = scmp.ne.s32.totalorder %s71_s28, %s11335_s14  ;;  %p11340_p8 = scmp.lt.s32.totalorder %s71_s28, %s71_s28 }
  0x4e   :  { %p11341_p9 = scmp.lt.s32.totalorder %s11339_s3, %s11335_s14 }
  0x50   :  { %p11342_p10 = por %p11341_p9, %p11340_p8 }
  0x52   :  { %p11343_p11 = pnand %p11342_p10, %p11336_p7 }
  0x54   :  { %11346 = shalt.err (!%p11343_p11)
}
  0x55   :  { %73 = dma.hbm_to_vmem [thread:$0]  %s11704_s6, 16, %s71_s28, [#allocation9]  }
  0x56   :  { %11369 = dma.done.wait [#allocation3], 256  }
  0x57   :  { %11370 = vsyncadd [#allocation3], 4294967040 }
  0x58   :  { %11371 = dma.done.wait [#allocation6], 131136  }
  0x59   :  { %11372 = vsyncadd [#allocation6], 4294836160 }
  0x5a   :  { %11373 = dma.done.wait [#allocation9], 528  }
  0x5b   :  { %11374 = vsyncadd [#allocation9], 4294966768  ;;  %v11386_v0 = vmov 0   ;;  %v92_v1 = vld [vmem:[#allocation2] sm:$0xff]  ;;  %vm131_vm0 = vcmask 1043456   ;;  %v90_v2 = vld [vmem:[%s11698_s0] sm:$0xff] }
  0x5c   :  { %176 = vmatprep.mubr.bf16.mxu0 %v11386_v0  ;;  %219 = vmatprep.mubr.bf16.mxu1 %v11386_v0  ;;  %v91_v3 = vld [vmem:[%s11698_s0 + $0x8] sm:$0xff]  ;;  %v8416_v4 = vcombine.high %v92_v1, %v92_v1  ;;  %v8415_v5 = vcombine.low %v92_v1, %v92_v1  ;;  %v93_v6 = vld [vmem:[#allocation2 + $0x8] sm:$0xff]  ;;  %v9669_v12 = vld [vmem:[#allocation7] ss:$16 sps:$4 sm:$0xff]   ;;  %vm127_vm1 = vcmask 64512   ;;  %vm8393_vm2 = vcmask 523264  }
  0x5d   :  { %v8418_v7 = vcombine.high %v93_v6, %v93_v6  ;;  %v8417_v8 = vcombine.low %v93_v6, %v93_v6  ;;  %v9671_v9 = vld [vmem:[#allocation7 + $0x4] ss:$16 sps:$4 sm:$0xff]   ;;  %v95_v11 = vpack.c.bf16 %v91_v3, %v90_v2  ;;  %v9674_v13 = vld [vmem:[#allocation7 + $0xc] ss:$16 sps:$4 sm:$0xff]   ;;  %v9672_v15 = vld [vmem:[#allocation7 + $0x8] ss:$16 sps:$4 sm:$0xff]  }
  0x5e   :  { %8419 = vmatprep.subr.msk.bf16.mxu0 %vm131_vm0, %v8416_v4  ;;  %v133_v10 = vsel %vm131_vm0, %v8415_v5, 0  ;;  %v9677_v16 = vld [vmem:[#allocation7 + $0x24] ss:$16 sps:$4 sm:$0xff]   ;;  %v9680_v17 = vld [vmem:[#allocation7 + $0x2c] ss:$16 sps:$4 sm:$0xff]  }
  0x5f   :  { %145 = vmatpush1.bf16.msra.mxu0 %v133_v10  ;;  %8421 = vmatprep.subr.msk.bf16.mxu1 %vm131_vm0, %v8418_v7  ;;  %v139_v14 = vsel %vm131_vm0, %v8417_v8, 0  ;;  %v9675_v18 = vld [vmem:[#allocation7 + $0x20] ss:$16 sps:$4 sm:$0xff]   ;;  %v9678_v19 = vld [vmem:[#allocation7 + $0x28] ss:$16 sps:$4 sm:$0xff]  }
  0x60   :  { %188 = vmatpush1.bf16.msra.mxu1 %v139_v14  ;;  %1032 = vmatprep.subr.bf16.mxu0 %v9671_v9  ;;  %v9683_v20 = vld [vmem:[#allocation7 + $0x44] ss:$16 sps:$4 sm:$0xff]   ;;  %v9686_v21 = vld [vmem:[#allocation7 + $0x4c] ss:$16 sps:$4 sm:$0xff]   ;;  %v9681_v22 = vld [vmem:[#allocation7 + $0x40] ss:$16 sps:$4 sm:$0xff]   ;;  %v97_v14 = vlaneseq }
  0x61   :  { %1118 = vmatprep.subr.bf16.mxu1 %v9674_v13  ;;  %v9684_v23 = vld [vmem:[#allocation7 + $0x48] ss:$16 sps:$4 sm:$0xff]   ;;  %v9689_v24 = vld [vmem:[#allocation7 + $0x64] ss:$16 sps:$4 sm:$0xff]   ;;  %v9692_v25 = vld [vmem:[#allocation7 + $0x6c] ss:$16 sps:$4 sm:$0xff]  }
  0x62   :  { %8420 = vmatmul.mubr.msk.bf16.vlgmr.msra.gmra.mrb[0].mxu0 %vm127_vm1, %v95_v11  ;;  %v9687_v26 = vld [vmem:[#allocation7 + $0x60] ss:$16 sps:$4 sm:$0xff]   ;;  %v9690_v27 = vld [vmem:[#allocation7 + $0x68] ss:$16 sps:$4 sm:$0xff]   ;;  %v9695_v28 = vld [vmem:[#allocation7 + $0x84] ss:$16 sps:$4 sm:$0xff]  }
  0x63   :  { %8422 = vmatmul.mubr.msk.bf16.vlgmr.msra.gmra.mrb[0].mxu1 %vm127_vm1, %v95_v11  ;;  %1033 = vmatpush1.bf16.msra.mxu0 %v9669_v12  ;;  %v9698_v29 = vld [vmem:[#allocation7 + $0x8c] ss:$16 sps:$4 sm:$0xff]   ;;  %v9693_v30 = vld [vmem:[#allocation7 + $0x80] ss:$16 sps:$4 sm:$0xff]   ;;  %v9696_v31 = vld [vmem:[#allocation7 + $0x88] ss:$16 sps:$4 sm:$0xff]  }
  0x64   :  { %1119 = vmatpush1.bf16.msra.mxu1 %v9672_v15  ;;  %1034 = vmatprep.subr.bf16.mxu0 %v9677_v16  ;;  %v9701_v32 = vld [vmem:[#allocation7 + $0xa4] ss:$16 sps:$4 sm:$0xff]   ;;  %v9704_v33 = vld [vmem:[#allocation7 + $0xac] ss:$16 sps:$4 sm:$0xff]   ;;  %v9699_v34 = vld [vmem:[#allocation7 + $0xa0] ss:$16 sps:$4 sm:$0xff]  }
  0x65   :  { %1120 = vmatprep.subr.bf16.mxu1 %v9680_v17  ;;  %v9702_v35 = vld [vmem:[#allocation7 + $0xa8] ss:$16 sps:$4 sm:$0xff]   ;;  %v9707_v36 = vld [vmem:[#allocation7 + $0xc4] ss:$16 sps:$4 sm:$0xff]   ;;  %v9710_v37 = vld [vmem:[#allocation7 + $0xcc] ss:$16 sps:$4 sm:$0xff]  }
  0x66   :  { %v9705_v38 = vld [vmem:[#allocation7 + $0xc0] ss:$16 sps:$4 sm:$0xff]   ;;  %v9708_v39 = vld [vmem:[#allocation7 + $0xc8] ss:$16 sps:$4 sm:$0xff]   ;;  %v9713_v40 = vld [vmem:[#allocation7 + $0xe4] ss:$16 sps:$4 sm:$0xff]  }
  0x67   :  { %1035 = vmatpush1.bf16.msra.mxu0 %v9675_v18  ;;  %v9716_v41 = vld [vmem:[#allocation7 + $0xec] ss:$16 sps:$4 sm:$0xff]   ;;  %v9711_v42 = vld [vmem:[#allocation7 + $0xe0] ss:$16 sps:$4 sm:$0xff]   ;;  %v9714_v43 = vld [vmem:[#allocation7 + $0xe8] ss:$16 sps:$4 sm:$0xff]  }
  0x68   :  { %1121 = vmatpush1.bf16.msra.mxu1 %v9678_v19  ;;  %1036 = vmatprep.subr.bf16.mxu0 %v9683_v20  ;;  %v9719_v44 = vld [vmem:[#allocation7 + $0x104] ss:$16 sps:$4 sm:$0xff]   ;;  %v9722_v45 = vld [vmem:[#allocation7 + $0x10c] ss:$16 sps:$4 sm:$0xff]   ;;  %v9717_v46 = vld [vmem:[#allocation7 + $0x100] ss:$16 sps:$4 sm:$0xff]  }
  0x69   :  { %1122 = vmatprep.subr.bf16.mxu1 %v9686_v21  ;;  %v9720_v47 = vld [vmem:[#allocation7 + $0x108] ss:$16 sps:$4 sm:$0xff]   ;;  %v9725_v48 = vld [vmem:[#allocation7 + $0x124] ss:$16 sps:$4 sm:$0xff]   ;;  %v9723_v49 = vld [vmem:[#allocation7 + $0x120] ss:$16 sps:$4 sm:$0xff]  }
  0x6a   :  { %v9728_v50 = vld [vmem:[#allocation7 + $0x12c] ss:$16 sps:$4 sm:$0xff]   ;;  %v9726_v51 = vld [vmem:[#allocation7 + $0x128] ss:$16 sps:$4 sm:$0xff]   ;;  %v9731_v52 = vld [vmem:[#allocation7 + $0x144] ss:$16 sps:$4 sm:$0xff]  }
  0x6b   :  { %1037 = vmatpush1.bf16.msra.mxu0 %v9681_v22  ;;  %v9734_v53 = vld [vmem:[#allocation7 + $0x14c] ss:$16 sps:$4 sm:$0xff]   ;;  %v9729_v54 = vld [vmem:[#allocation7 + $0x140] ss:$16 sps:$4 sm:$0xff]   ;;  %v9732_v55 = vld [vmem:[#allocation7 + $0x148] ss:$16 sps:$4 sm:$0xff]  }
  0x6c   :  { %1123 = vmatpush1.bf16.msra.mxu1 %v9684_v23  ;;  %1038 = vmatprep.subr.bf16.mxu0 %v9689_v24  ;;  %v9737_v56 = vld [vmem:[#allocation7 + $0x164] ss:$16 sps:$4 sm:$0xff]   ;;  %v9740_v57 = vld [vmem:[#allocation7 + $0x16c] ss:$16 sps:$4 sm:$0xff]   ;;  %v9735_v58 = vld [vmem:[#allocation7 + $0x160] ss:$16 sps:$4 sm:$0xff]  }
  0x6d   :  { %1124 = vmatprep.subr.bf16.mxu1 %v9692_v25  ;;  %v9738_v59 = vld [vmem:[#allocation7 + $0x168] ss:$16 sps:$4 sm:$0xff]   ;;  %v9743_v60 = vld [vmem:[#allocation7 + $0x184] ss:$16 sps:$4 sm:$0xff]   ;;  %v9746_v61 = vld [vmem:[#allocation7 + $0x18c] ss:$16 sps:$4 sm:$0xff]  }
  0x6e   :  { %v9741_v62 = vld [vmem:[#allocation7 + $0x180] ss:$16 sps:$4 sm:$0xff]   ;;  %v9744_v63 = vld [vmem:[#allocation7 + $0x188] ss:$16 sps:$4 sm:$0xff]   ;;  %v9749_v0 = vld [vmem:[#allocation7 + $0x1a4] ss:$16 sps:$4 sm:$0xff]  }
  0x6f   :  { %1039 = vmatpush1.bf16.msra.mxu0 %v9687_v26  ;;  %v9752_v1 = vld [vmem:[#allocation7 + $0x1ac] ss:$16 sps:$4 sm:$0xff]   ;;  %v9747_v2 = vld [vmem:[#allocation7 + $0x1a0] ss:$16 sps:$4 sm:$0xff]   ;;  %v9750_v3 = vld [vmem:[#allocation7 + $0x1a8] ss:$16 sps:$4 sm:$0xff]  }
  0x70   :  { %1125 = vmatpush1.bf16.msra.mxu1 %v9690_v27  ;;  %1040 = vmatprep.subr.bf16.mxu0 %v9695_v28  ;;  %v9755_v4 = vld [vmem:[#allocation7 + $0x1c4] ss:$16 sps:$4 sm:$0xff]   ;;  %v9758_v5 = vld [vmem:[#allocation7 + $0x1cc] ss:$16 sps:$4 sm:$0xff]   ;;  %v9753_v6 = vld [vmem:[#allocation7 + $0x1c0] ss:$16 sps:$4 sm:$0xff]  }
  0x71   :  { %1126 = vmatprep.subr.bf16.mxu1 %v9698_v29  ;;  %v9756_v7 = vld [vmem:[#allocation7 + $0x1c8] ss:$16 sps:$4 sm:$0xff]   ;;  %v9761_v8 = vld [vmem:[#allocation7 + $0x1e4] ss:$16 sps:$4 sm:$0xff]   ;;  %v9764_v9 = vld [vmem:[#allocation7 + $0x1ec] ss:$16 sps:$4 sm:$0xff]  }
  0x72   :  { %v9759_v10 = vld [vmem:[#allocation7 + $0x1e0] ss:$16 sps:$4 sm:$0xff]   ;;  %v9762_v11 = vld [vmem:[#allocation7 + $0x1e8] ss:$16 sps:$4 sm:$0xff]   ;;  %v9767_v12 = vld [vmem:[#allocation7 + $0x204] ss:$16 sps:$4 sm:$0xff]  }
  0x73   :  { %1041 = vmatpush1.bf16.msra.mxu0 %v9693_v30  ;;  %v9770_v13 = vld [vmem:[#allocation7 + $0x20c] ss:$16 sps:$4 sm:$0xff]   ;;  %v98_v15 = vshrl.u32 %v97_v14, 7  ;;  %v9804_v14 = vld [vmem:[#allocation7 + $0x2c8] ss:$16 sps:$4 sm:$0xff]  }
  0x74   :  { %1127 = vmatpush1.bf16.msra.mxu1 %v9696_v31  ;;  %1042 = vmatprep.subr.bf16.mxu0 %v9701_v32  ;;  %v94_v16 = vld [vmem:[#allocation5] sm:$0xf] }
  0x75   :  { %1128 = vmatprep.subr.bf16.mxu1 %v9704_v33  ;;  %v11514_v17 = vsub.s32 0, %v98_v15  ;;  %v11516_v18 = vsub.s32 1, %v98_v15  ;;  %v11518_v19 = vsub.s32 2, %v98_v15  ;;  %v11520_v20 = vsub.s32 3, %v98_v15  ;;  %v9809_v15 = vld [vmem:[#allocation7 + $0x2e4] ss:$16 sps:$4 sm:$0xff]  }
  0x77   :  { %1043 = vmatpush1.bf16.msra.mxu0 %v9699_v34  ;;  %v100_v21 = vrot.slane %v94_v16, %v11514_v17  ;;  %v104_v22 = vrot.slane %v94_v16, %v11516_v18  ;;  %v108_v23 = vrot.slane %v94_v16, %v11518_v19  ;;  %v112_v24 = vrot.slane %v94_v16, %v11520_v20  ;;  %v9812_v16 = vld [vmem:[#allocation7 + $0x2ec] ss:$16 sps:$4 sm:$0xff]  }
  0x78   :  { %1129 = vmatpush1.bf16.msra.mxu1 %v9702_v35  ;;  %1044 = vmatprep.subr.bf16.mxu0 %v9707_v36 }
  0x79   :  { %1130 = vmatprep.subr.bf16.mxu1 %v9710_v37 }
  0x7b   :  { %1045 = vmatpush1.bf16.msra.mxu0 %v9705_v38 }
  0x7c   :  { %1131 = vmatpush1.bf16.msra.mxu1 %v9708_v39  ;;  %1046 = vmatprep.subr.bf16.mxu0 %v9713_v40 }
  0x7d   :  { %1132 = vmatprep.subr.bf16.mxu1 %v9716_v41 }
  0x7f   :  { %1047 = vmatpush1.bf16.msra.mxu0 %v9711_v42 }
  0x80   :  { %1133 = vmatpush1.bf16.msra.mxu1 %v9714_v43  ;;  %1048 = vmatprep.subr.bf16.mxu0 %v9719_v44 }
  0x81   :  { %1134 = vmatprep.subr.bf16.mxu1 %v9722_v45 }
  0x83   :  { %1049 = vmatpush1.bf16.msra.mxu0 %v9717_v46 }
  0x84   :  { %1135 = vmatpush1.bf16.msra.mxu1 %v9720_v47  ;;  %1050 = vmatprep.subr.bf16.mxu0 %v9725_v48  ;;  %v9765_v47 = vld [vmem:[#allocation7 + $0x200] ss:$16 sps:$4 sm:$0xff]   ;;  %v9768_v48 = vld [vmem:[#allocation7 + $0x208] ss:$16 sps:$4 sm:$0xff]  }
  0x85   :  { %1136 = vmatprep.subr.bf16.mxu1 %v9728_v50 }
  0x87   :  { %1051 = vmatpush1.bf16.msra.mxu0 %v9723_v49 }
  0x88   :  { %1137 = vmatpush1.bf16.msra.mxu1 %v9726_v51  ;;  %1052 = vmatprep.subr.bf16.mxu0 %v9731_v52  ;;  %v9773_v51 = vld [vmem:[#allocation7 + $0x224] ss:$16 sps:$4 sm:$0xff]   ;;  %v9776_v52 = vld [vmem:[#allocation7 + $0x22c] ss:$16 sps:$4 sm:$0xff]  }
  0x89   :  { %1138 = vmatprep.subr.bf16.mxu1 %v9734_v53 }
  0x8b   :  { %1053 = vmatpush1.bf16.msra.mxu0 %v9729_v54 }
  0x8c   :  { %1139 = vmatpush1.bf16.msra.mxu1 %v9732_v55  ;;  %1054 = vmatprep.subr.bf16.mxu0 %v9737_v56 }
  0x8d   :  { %1140 = vmatprep.subr.bf16.mxu1 %v9740_v57  ;;  %v9771_v57 = vld [vmem:[#allocation7 + $0x220] ss:$16 sps:$4 sm:$0xff]  }
  0x8f   :  { %1055 = vmatpush1.bf16.msra.mxu0 %v9735_v58  ;;  %v9774_v58 = vld [vmem:[#allocation7 + $0x228] ss:$16 sps:$4 sm:$0xff]  }
  0x90   :  { %1141 = vmatpush1.bf16.msra.mxu1 %v9738_v59  ;;  %1056 = vmatprep.subr.bf16.mxu0 %v9743_v60  ;;  %v9779_v59 = vld [vmem:[#allocation7 + $0x244] ss:$16 sps:$4 sm:$0xff]   ;;  %v9782_v60 = vld [vmem:[#allocation7 + $0x24c] ss:$16 sps:$4 sm:$0xff]  }
  0x91   :  { %1142 = vmatprep.subr.bf16.mxu1 %v9746_v61  ;;  %v9777_v61 = vld [vmem:[#allocation7 + $0x240] ss:$16 sps:$4 sm:$0xff]  }
  0x93   :  { %1057 = vmatpush1.bf16.msra.mxu0 %v9741_v62  ;;  %v9780_v62 = vld [vmem:[#allocation7 + $0x248] ss:$16 sps:$4 sm:$0xff]  }
  0x94   :  { %1143 = vmatpush1.bf16.msra.mxu1 %v9744_v63  ;;  %1058 = vmatprep.subr.bf16.mxu0 %v9749_v0  ;;  %v9785_v63 = vld [vmem:[#allocation7 + $0x264] ss:$16 sps:$4 sm:$0xff]   ;;  %v9788_v0 = vld [vmem:[#allocation7 + $0x26c] ss:$16 sps:$4 sm:$0xff]  }
  0x95   :  { %1144 = vmatprep.subr.bf16.mxu1 %v9752_v1  ;;  %v9783_v1 = vld [vmem:[#allocation7 + $0x260] ss:$16 sps:$4 sm:$0xff]  }
  0x97   :  { %1059 = vmatpush1.bf16.msra.mxu0 %v9747_v2  ;;  %v9786_v2 = vld [vmem:[#allocation7 + $0x268] ss:$16 sps:$4 sm:$0xff]  }
  0x98   :  { %1145 = vmatpush1.bf16.msra.mxu1 %v9750_v3  ;;  %1060 = vmatprep.subr.bf16.mxu0 %v9755_v4  ;;  %v9791_v3 = vld [vmem:[#allocation7 + $0x284] ss:$16 sps:$4 sm:$0xff]   ;;  %v9794_v4 = vld [vmem:[#allocation7 + $0x28c] ss:$16 sps:$4 sm:$0xff]  }
  0x99   :  { %1146 = vmatprep.subr.bf16.mxu1 %v9758_v5  ;;  %v9789_v5 = vld [vmem:[#allocation7 + $0x280] ss:$16 sps:$4 sm:$0xff]  }
  0x9b   :  { %1061 = vmatpush1.bf16.msra.mxu0 %v9753_v6  ;;  %v9792_v6 = vld [vmem:[#allocation7 + $0x288] ss:$16 sps:$4 sm:$0xff]  }
  0x9c   :  { %1147 = vmatpush1.bf16.msra.mxu1 %v9756_v7  ;;  %1062 = vmatprep.subr.bf16.mxu0 %v9761_v8  ;;  %v9797_v7 = vld [vmem:[#allocation7 + $0x2a4] ss:$16 sps:$4 sm:$0xff]   ;;  %v9800_v8 = vld [vmem:[#allocation7 + $0x2ac] ss:$16 sps:$4 sm:$0xff]  }
  0x9d   :  { %1148 = vmatprep.subr.bf16.mxu1 %v9764_v9  ;;  %v9795_v9 = vld [vmem:[#allocation7 + $0x2a0] ss:$16 sps:$4 sm:$0xff]  }
  0x9f   :  { %1063 = vmatpush1.bf16.msra.mxu0 %v9759_v10  ;;  %v9798_v10 = vld [vmem:[#allocation7 + $0x2a8] ss:$16 sps:$4 sm:$0xff]  }
  0xa0   :  { %1149 = vmatpush1.bf16.msra.mxu1 %v9762_v11  ;;  %1075 = vmatprep.subr.bf16.mxu0 %v9767_v12  ;;  %v9803_v11 = vld [vmem:[#allocation7 + $0x2c4] ss:$16 sps:$4 sm:$0xff]   ;;  %v9806_v12 = vld [vmem:[#allocation7 + $0x2cc] ss:$16 sps:$4 sm:$0xff]  }
  0xa1   :  { %1161 = vmatprep.subr.bf16.mxu1 %v9770_v13  ;;  %v9801_v13 = vld [vmem:[#allocation7 + $0x2c0] ss:$16 sps:$4 sm:$0xff]  }
 0x135   :  { %v178_v25 = vpop.f32.mrb[0].mxu0 }
 0x136   :  { %v179_v26 = vadd.f32 %v178_v25, %v100_v21  ;;  %v180_v27 = vpop.f32.mrb[1].mxu0  ;;  %v221_v28 = vpop.f32.mrb[0].mxu1  ;;  %v9813_v25 = vld [vmem:[#allocation7 + $0x300] ss:$16 sps:$4 sm:$0xff]  }
 0x137   :  { %v181_v29 = vadd.f32 %v180_v27, %v104_v22  ;;  %v182_v30 = vpop.f32.mrb[2].mxu0  ;;  %v222_v31 = vadd.f32 %v221_v28, %v108_v23  ;;  %v223_v32 = vpop.f32.mrb[1].mxu1  ;;  %v9821_v27 = vld [vmem:[#allocation7 + $0x324] ss:$16 sps:$4 sm:$0xff]   ;;  %v9824_v28 = vld [vmem:[#allocation7 + $0x32c] ss:$16 sps:$4 sm:$0xff]  }
 0x138   :  { %v183_v33 = vadd.f32 %v182_v30, %v100_v21  ;;  %v184_v34 = vpop.f32.mrb[3].mxu0  ;;  %v224_v35 = vadd.f32 %v223_v32, %v112_v24  ;;  %v225_v36 = vpop.f32.mrb[2].mxu1  ;;  %v230_v41 = vmax.f32 %v179_v26, 0.0  ;;  %v9807_v21 = vld [vmem:[#allocation7 + $0x2e0] ss:$16 sps:$4 sm:$0xff]  }
 0x139   :  { %v185_v37 = vadd.f32 %v184_v34, %v104_v22  ;;  %v232_v38 = vmax.f32 %v222_v31, 0.0  ;;  %v226_v39 = vadd.f32 %v225_v36, %v108_v23  ;;  %v227_v40 = vpop.f32.mrb[3].mxu1  ;;  %v231_v45 = vmax.f32 %v181_v29, 0.0  ;;  %v9810_v22 = vld [vmem:[#allocation7 + $0x2e8] ss:$16 sps:$4 sm:$0xff]  }
 0x13a   :  { %v234_v42 = vmax.f32 %v183_v33, 0.0  ;;  %v233_v43 = vmax.f32 %v224_v35, 0.0  ;;  %v228_v44 = vadd.f32 %v227_v40, %v112_v24  ;;  %v9815_v23 = vld [vmem:[#allocation7 + $0x304] ss:$16 sps:$4 sm:$0xff]   ;;  %v9818_v24 = vld [vmem:[#allocation7 + $0x30c] ss:$16 sps:$4 sm:$0xff]  }
 0x13b   :  { %v235_v46 = vmax.f32 %v185_v37, 0.0  ;;  %v236_v49 = vmax.f32 %v226_v39, 0.0  ;;  %v9816_v26 = vld [vmem:[#allocation7 + $0x308] ss:$16 sps:$4 sm:$0xff]   ;;  %v9819_v29 = vld [vmem:[#allocation7 + $0x320] ss:$16 sps:$4 sm:$0xff]  }
 0x13c   :  { %v367_v50 = vpack.c.bf16 %v234_v42, %v230_v41  ;;  %v237_v53 = vmax.f32 %v228_v44, 0.0  ;;  %v9822_v30 = vld [vmem:[#allocation7 + $0x328] ss:$16 sps:$4 sm:$0xff]   ;;  %v9827_v31 = vld [vmem:[#allocation7 + $0x344] ss:$16 sps:$4 sm:$0xff]  }
 0x13d   :  { %v368_v54 = vpack.c.bf16 %v235_v46, %v231_v45  ;;  %v11526_v55 = vpack.c.bf16 %v236_v49, %v232_v38  ;;  %v9830_v32 = vld [vmem:[#allocation7 + $0x34c] ss:$16 sps:$4 sm:$0xff]   ;;  %v9825_v33 = vld [vmem:[#allocation7 + $0x340] ss:$16 sps:$4 sm:$0xff]   ;;  %v9828_v34 = vld [vmem:[#allocation7 + $0x348] ss:$16 sps:$4 sm:$0xff]  }
 0x13e   :  { %v370_v56 = vpack.c.bf16 %v237_v53, %v233_v43  ;;  %v9833_v35 = vld [vmem:[#allocation7 + $0x364] ss:$16 sps:$4 sm:$0xff]   ;;  %v9836_v36 = vld [vmem:[#allocation7 + $0x36c] ss:$16 sps:$4 sm:$0xff]   ;;  %v9831_v37 = vld [vmem:[#allocation7 + $0x360] ss:$16 sps:$4 sm:$0xff]  }
 0x13f   :  { %1064 = vmatprep.mubr.bf16.mxu0 %v368_v54  ;;  %1150 = vmatprep.mubr.bf16.mxu1 %v368_v54  ;;  %v9834_v38 = vld [vmem:[#allocation7 + $0x368] ss:$16 sps:$4 sm:$0xff]   ;;  %v9839_v39 = vld [vmem:[#allocation7 + $0x384] ss:$16 sps:$4 sm:$0xff]   ;;  %v9842_v40 = vld [vmem:[#allocation7 + $0x38c] ss:$16 sps:$4 sm:$0xff]  }
 0x140   :  { %1065 = vmatmul.mubr.bf16.vlgmr.msra.gmra.mrb[4].mxu0 %v367_v50  ;;  %1151 = vmatmul.mubr.bf16.vlgmr.msra.gmra.mrb[4].mxu1 %v367_v50  ;;  %v9837_v41 = vld [vmem:[#allocation7 + $0x380] ss:$16 sps:$4 sm:$0xff]   ;;  %v9840_v42 = vld [vmem:[#allocation7 + $0x388] ss:$16 sps:$4 sm:$0xff]   ;;  %v9845_v43 = vld [vmem:[#allocation7 + $0x3a4] ss:$16 sps:$4 sm:$0xff]  }
 0x141   :  { %1076 = vmatpush1.bf16.msra.mxu0 %v9765_v47  ;;  %1162 = vmatpush1.bf16.msra.mxu1 %v9768_v48  ;;  %v9848_v44 = vld [vmem:[#allocation7 + $0x3ac] ss:$16 sps:$4 sm:$0xff]   ;;  %v9843_v45 = vld [vmem:[#allocation7 + $0x3a0] ss:$16 sps:$4 sm:$0xff]   ;;  %v9846_v46 = vld [vmem:[#allocation7 + $0x3a8] ss:$16 sps:$4 sm:$0xff]  }
 0x142   :  { %1077 = vmatprep.subr.bf16.mxu0 %v9773_v51  ;;  %1163 = vmatprep.subr.bf16.mxu1 %v9776_v52  ;;  %v9851_v47 = vld [vmem:[#allocation7 + $0x3c4] ss:$16 sps:$4 sm:$0xff]   ;;  %v9854_v48 = vld [vmem:[#allocation7 + $0x3cc] ss:$16 sps:$4 sm:$0xff]   ;;  %v9849_v49 = vld [vmem:[#allocation7 + $0x3c0] ss:$16 sps:$4 sm:$0xff]  }
 0x143   :  { %1107 = vmatprep.mubr.bf16.mxu0 %v370_v56  ;;  %1193 = vmatprep.mubr.bf16.mxu1 %v370_v56  ;;  %v9852_v50 = vld [vmem:[#allocation7 + $0x3c8] ss:$16 sps:$4 sm:$0xff]   ;;  %v9857_v51 = vld [vmem:[#allocation7 + $0x3e4] ss:$16 sps:$4 sm:$0xff]   ;;  %v9860_v52 = vld [vmem:[#allocation7 + $0x3ec] ss:$16 sps:$4 sm:$0xff]  }
 0x144   :  { %v9855_v53 = vld [vmem:[#allocation7 + $0x3e0] ss:$16 sps:$4 sm:$0xff]   ;;  %v9858_v54 = vld [vmem:[#allocation7 + $0x3e8] ss:$16 sps:$4 sm:$0xff]   ;;  %v9863_v56 = vld [vmem:[#allocation7 + $0x404] ss:$16 sps:$4 sm:$0xff]  }
 0x145   :  { %1078 = vmatpush1.bf16.msra.mxu0 %v9771_v57  ;;  %1164 = vmatpush1.bf16.msra.mxu1 %v9774_v58  ;;  %v9866_v57 = vld [vmem:[#allocation7 + $0x40c] ss:$16 sps:$4 sm:$0xff]   ;;  %v9861_v58 = vld [vmem:[#allocation7 + $0x400] ss:$16 sps:$4 sm:$0xff]  }
 0x146   :  { %1079 = vmatprep.subr.bf16.mxu0 %v9779_v59  ;;  %1165 = vmatprep.subr.bf16.mxu1 %v9782_v60  ;;  %v9864_v59 = vld [vmem:[#allocation7 + $0x408] ss:$16 sps:$4 sm:$0xff]   ;;  %v9869_v60 = vld [vmem:[#allocation7 + $0x424] ss:$16 sps:$4 sm:$0xff]  }
 0x149   :  { %1080 = vmatpush1.bf16.msra.mxu0 %v9777_v61  ;;  %1166 = vmatpush1.bf16.msra.mxu1 %v9780_v62  ;;  %v9872_v61 = vld [vmem:[#allocation7 + $0x42c] ss:$16 sps:$4 sm:$0xff]   ;;  %v9867_v62 = vld [vmem:[#allocation7 + $0x420] ss:$16 sps:$4 sm:$0xff]  }
 0x14a   :  { %1081 = vmatprep.subr.bf16.mxu0 %v9785_v63  ;;  %1167 = vmatprep.subr.bf16.mxu1 %v9788_v0  ;;  %v9870_v63 = vld [vmem:[#allocation7 + $0x428] ss:$16 sps:$4 sm:$0xff]   ;;  %v9875_v0 = vld [vmem:[#allocation7 + $0x444] ss:$16 sps:$4 sm:$0xff]  }
 0x14d   :  { %1082 = vmatpush1.bf16.msra.mxu0 %v9783_v1  ;;  %1168 = vmatpush1.bf16.msra.mxu1 %v9786_v2  ;;  %v9878_v1 = vld [vmem:[#allocation7 + $0x44c] ss:$16 sps:$4 sm:$0xff]   ;;  %v9873_v2 = vld [vmem:[#allocation7 + $0x440] ss:$16 sps:$4 sm:$0xff]  }
 0x14e   :  { %1083 = vmatprep.subr.bf16.mxu0 %v9791_v3  ;;  %1169 = vmatprep.subr.bf16.mxu1 %v9794_v4  ;;  %v9876_v3 = vld [vmem:[#allocation7 + $0x448] ss:$16 sps:$4 sm:$0xff]   ;;  %v9881_v4 = vld [vmem:[#allocation7 + $0x464] ss:$16 sps:$4 sm:$0xff]  }
 0x151   :  { %1084 = vmatpush1.bf16.msra.mxu0 %v9789_v5  ;;  %1170 = vmatpush1.bf16.msra.mxu1 %v9792_v6  ;;  %v9884_v5 = vld [vmem:[#allocation7 + $0x46c] ss:$16 sps:$4 sm:$0xff]   ;;  %v9879_v6 = vld [vmem:[#allocation7 + $0x460] ss:$16 sps:$4 sm:$0xff]  }
 0x152   :  { %1085 = vmatprep.subr.bf16.mxu0 %v9797_v7  ;;  %1171 = vmatprep.subr.bf16.mxu1 %v9800_v8  ;;  %v9882_v7 = vld [vmem:[#allocation7 + $0x468] ss:$16 sps:$4 sm:$0xff]   ;;  %v9887_v8 = vld [vmem:[#allocation7 + $0x484] ss:$16 sps:$4 sm:$0xff]  }
 0x155   :  { %1086 = vmatpush1.bf16.msra.mxu0 %v9795_v9  ;;  %1172 = vmatpush1.bf16.msra.mxu1 %v9798_v10  ;;  %v9890_v9 = vld [vmem:[#allocation7 + $0x48c] ss:$16 sps:$4 sm:$0xff]   ;;  %v9888_v10 = vld [vmem:[#allocation7 + $0x488] ss:$16 sps:$4 sm:$0xff]  }
 0x156   :  { %1087 = vmatprep.subr.bf16.mxu0 %v9803_v11  ;;  %1173 = vmatprep.subr.bf16.mxu1 %v9806_v12  ;;  %v9893_v11 = vld [vmem:[#allocation7 + $0x4a4] ss:$16 sps:$4 sm:$0xff]   ;;  %v9896_v12 = vld [vmem:[#allocation7 + $0x4ac] ss:$16 sps:$4 sm:$0xff]  }
 0x159   :  { %1088 = vmatpush1.bf16.msra.mxu0 %v9801_v13  ;;  %1174 = vmatpush1.bf16.msra.mxu1 %v9804_v14  ;;  %v9891_v13 = vld [vmem:[#allocation7 + $0x4a0] ss:$16 sps:$4 sm:$0xff]   ;;  %v9894_v14 = vld [vmem:[#allocation7 + $0x4a8] ss:$16 sps:$4 sm:$0xff]  }
 0x15a   :  { %1089 = vmatprep.subr.bf16.mxu0 %v9809_v15  ;;  %1175 = vmatprep.subr.bf16.mxu1 %v9812_v16  ;;  %v9899_v15 = vld [vmem:[#allocation7 + $0x4c4] ss:$16 sps:$4 sm:$0xff]   ;;  %v9902_v16 = vld [vmem:[#allocation7 + $0x4cc] ss:$16 sps:$4 sm:$0xff]  }
 0x15d   :  { %1090 = vmatpush1.bf16.msra.mxu0 %v9807_v21  ;;  %1176 = vmatpush1.bf16.msra.mxu1 %v9810_v22  ;;  %v9897_v21 = vld [vmem:[#allocation7 + $0x4c0] ss:$16 sps:$4 sm:$0xff]   ;;  %v9900_v22 = vld [vmem:[#allocation7 + $0x4c8] ss:$16 sps:$4 sm:$0xff]  }
 0x15e   :  { %1091 = vmatprep.subr.bf16.mxu0 %v9815_v23  ;;  %1177 = vmatprep.subr.bf16.mxu1 %v9818_v24  ;;  %v9905_v23 = vld [vmem:[#allocation7 + $0x4e4] ss:$16 sps:$4 sm:$0xff]   ;;  %v9908_v24 = vld [vmem:[#allocation7 + $0x4ec] ss:$16 sps:$4 sm:$0xff]  }
 0x161   :  { %1092 = vmatpush1.bf16.msra.mxu0 %v9813_v25  ;;  %1178 = vmatpush1.bf16.msra.mxu1 %v9816_v26  ;;  %v9903_v25 = vld [vmem:[#allocation7 + $0x4e0] ss:$16 sps:$4 sm:$0xff]   ;;  %v9906_v26 = vld [vmem:[#allocation7 + $0x4e8] ss:$16 sps:$4 sm:$0xff]  }
 0x162   :  { %1093 = vmatprep.subr.bf16.mxu0 %v9821_v27  ;;  %1179 = vmatprep.subr.bf16.mxu1 %v9824_v28  ;;  %v9911_v27 = vld [vmem:[#allocation7 + $0x504] ss:$16 sps:$4 sm:$0xff]   ;;  %v9914_v28 = vld [vmem:[#allocation7 + $0x50c] ss:$16 sps:$4 sm:$0xff]  }
 0x165   :  { %1094 = vmatpush1.bf16.msra.mxu0 %v9819_v29  ;;  %1180 = vmatpush1.bf16.msra.mxu1 %v9822_v30  ;;  %v9909_v29 = vld [vmem:[#allocation7 + $0x500] ss:$16 sps:$4 sm:$0xff]   ;;  %v9912_v30 = vld [vmem:[#allocation7 + $0x508] ss:$16 sps:$4 sm:$0xff]  }
 0x166   :  { %1095 = vmatprep.subr.bf16.mxu0 %v9827_v31  ;;  %1181 = vmatprep.subr.bf16.mxu1 %v9830_v32  ;;  %v9917_v31 = vld [vmem:[#allocation7 + $0x524] ss:$16 sps:$4 sm:$0xff]   ;;  %v9920_v32 = vld [vmem:[#allocation7 + $0x52c] ss:$16 sps:$4 sm:$0xff]  }
 0x169   :  { %1096 = vmatpush1.bf16.msra.mxu0 %v9825_v33  ;;  %1182 = vmatpush1.bf16.msra.mxu1 %v9828_v34  ;;  %v9915_v33 = vld [vmem:[#allocation7 + $0x520] ss:$16 sps:$4 sm:$0xff]   ;;  %v9918_v34 = vld [vmem:[#allocation7 + $0x528] ss:$16 sps:$4 sm:$0xff]  }
 0x16a   :  { %1097 = vmatprep.subr.bf16.mxu0 %v9833_v35  ;;  %1183 = vmatprep.subr.bf16.mxu1 %v9836_v36  ;;  %v9923_v35 = vld [vmem:[#allocation7 + $0x544] ss:$16 sps:$4 sm:$0xff]   ;;  %v9926_v36 = vld [vmem:[#allocation7 + $0x54c] ss:$16 sps:$4 sm:$0xff]  }
 0x16d   :  { %1098 = vmatpush1.bf16.msra.mxu0 %v9831_v37  ;;  %1184 = vmatpush1.bf16.msra.mxu1 %v9834_v38  ;;  %v9921_v37 = vld [vmem:[#allocation7 + $0x540] ss:$16 sps:$4 sm:$0xff]   ;;  %v9924_v38 = vld [vmem:[#allocation7 + $0x548] ss:$16 sps:$4 sm:$0xff]  }
 0x16e   :  { %1099 = vmatprep.subr.bf16.mxu0 %v9839_v39  ;;  %1185 = vmatprep.subr.bf16.mxu1 %v9842_v40  ;;  %v9929_v39 = vld [vmem:[#allocation7 + $0x564] ss:$16 sps:$4 sm:$0xff]   ;;  %v9932_v40 = vld [vmem:[#allocation7 + $0x56c] ss:$16 sps:$4 sm:$0xff]  }
 0x171   :  { %1100 = vmatpush1.bf16.msra.mxu0 %v9837_v41  ;;  %1186 = vmatpush1.bf16.msra.mxu1 %v9840_v42  ;;  %v9927_v41 = vld [vmem:[#allocation7 + $0x560] ss:$16 sps:$4 sm:$0xff]   ;;  %v9930_v42 = vld [vmem:[#allocation7 + $0x568] ss:$16 sps:$4 sm:$0xff]  }
 0x172   :  { %1101 = vmatprep.subr.bf16.mxu0 %v9845_v43  ;;  %1187 = vmatprep.subr.bf16.mxu1 %v9848_v44  ;;  %v9935_v43 = vld [vmem:[#allocation7 + $0x584] ss:$16 sps:$4 sm:$0xff]   ;;  %v9938_v44 = vld [vmem:[#allocation7 + $0x58c] ss:$16 sps:$4 sm:$0xff]  }
 0x175   :  { %1102 = vmatpush1.bf16.msra.mxu0 %v9843_v45  ;;  %1188 = vmatpush1.bf16.msra.mxu1 %v9846_v46  ;;  %v9933_v45 = vld [vmem:[#allocation7 + $0x580] ss:$16 sps:$4 sm:$0xff]   ;;  %v9936_v46 = vld [vmem:[#allocation7 + $0x588] ss:$16 sps:$4 sm:$0xff]  }
 0x176   :  { %1103 = vmatprep.subr.bf16.mxu0 %v9851_v47  ;;  %1189 = vmatprep.subr.bf16.mxu1 %v9854_v48  ;;  %v9941_v47 = vld [vmem:[#allocation7 + $0x5a4] ss:$16 sps:$4 sm:$0xff]   ;;  %v9944_v48 = vld [vmem:[#allocation7 + $0x5ac] ss:$16 sps:$4 sm:$0xff]  }
 0x179   :  { %1104 = vmatpush1.bf16.msra.mxu0 %v9849_v49  ;;  %1190 = vmatpush1.bf16.msra.mxu1 %v9852_v50  ;;  %v9939_v49 = vld [vmem:[#allocation7 + $0x5a0] ss:$16 sps:$4 sm:$0xff]   ;;  %v9942_v50 = vld [vmem:[#allocation7 + $0x5a8] ss:$16 sps:$4 sm:$0xff]  }
 0x17a   :  { %1105 = vmatprep.subr.bf16.mxu0 %v9857_v51  ;;  %1191 = vmatprep.subr.bf16.mxu1 %v9860_v52  ;;  %v9947_v51 = vld [vmem:[#allocation7 + $0x5c4] ss:$16 sps:$4 sm:$0xff]   ;;  %v9950_v52 = vld [vmem:[#allocation7 + $0x5cc] ss:$16 sps:$4 sm:$0xff]  }
 0x17d   :  { %1106 = vmatpush1.bf16.msra.mxu0 %v9855_v53  ;;  %1192 = vmatpush1.bf16.msra.mxu1 %v9858_v54  ;;  %v9945_v53 = vld [vmem:[#allocation7 + $0x5c0] ss:$16 sps:$4 sm:$0xff]   ;;  %v9948_v54 = vld [vmem:[#allocation7 + $0x5c8] ss:$16 sps:$4 sm:$0xff]  }
 0x17e   :  { %2008 = vmatprep.subr.bf16.mxu0 %v9863_v56  ;;  %2094 = vmatprep.subr.bf16.mxu1 %v9866_v57  ;;  %v9953_v56 = vld [vmem:[#allocation7 + $0x5e4] ss:$16 sps:$4 sm:$0xff]   ;;  %v9956_v57 = vld [vmem:[#allocation7 + $0x5ec] ss:$16 sps:$4 sm:$0xff]  }
 0x180   :  { %1108 = vmatmul.mubr.bf16.vlgmr.msra.gmra.mrb[4].mxu0 %v11526_v55  ;;  %1194 = vmatmul.mubr.bf16.vlgmr.msra.gmra.mrb[4].mxu1 %v11526_v55  ;;  %v9885_v55 = vld [vmem:[#allocation7 + $0x480] ss:$16 sps:$4 sm:$0xff]  }
 0x181   :  { %2009 = vmatpush1.bf16.msra.mxu0 %v9861_v58  ;;  %2095 = vmatpush1.bf16.msra.mxu1 %v9864_v59  ;;  %v9951_v58 = vld [vmem:[#allocation7 + $0x5e0] ss:$16 sps:$4 sm:$0xff]   ;;  %v9954_v59 = vld [vmem:[#allocation7 + $0x5e8] ss:$16 sps:$4 sm:$0xff]  }
 0x182   :  { %2010 = vmatprep.subr.bf16.mxu0 %v9869_v60  ;;  %2096 = vmatprep.subr.bf16.mxu1 %v9872_v61  ;;  %v9959_v60 = vld [vmem:[#allocation7 + $0x604] ss:$16 sps:$4 sm:$0xff]   ;;  %v9962_v61 = vld [vmem:[#allocation7 + $0x60c] ss:$16 sps:$4 sm:$0xff]  }
 0x185   :  { %2011 = vmatpush1.bf16.msra.mxu0 %v9867_v62  ;;  %2097 = vmatpush1.bf16.msra.mxu1 %v9870_v63  ;;  %v366_v62 = vld [vmem:[#allocation8] sm:$0xf] }
 0x186   :  { %2012 = vmatprep.subr.bf16.mxu0 %v9875_v0  ;;  %2098 = vmatprep.subr.bf16.mxu1 %v9878_v1  ;;  %v375_v63 = vrot.slane %v366_v62, %v11514_v17  ;;  %v383_v0 = vrot.slane %v366_v62, %v11518_v19  ;;  %v379_v1 = vrot.slane %v366_v62, %v11516_v18 }
 0x189   :  { %2013 = vmatpush1.bf16.msra.mxu0 %v9873_v2  ;;  %2099 = vmatpush1.bf16.msra.mxu1 %v9876_v3  ;;  %v387_v2 = vrot.slane %v366_v62, %v11520_v20  ;;  %v10004_v62 = vld [vmem:[#allocation7 + $0x6ec] ss:$16 sps:$4 sm:$0xff]  }
 0x18a   :  { %2014 = vmatprep.subr.bf16.mxu0 %v9881_v4  ;;  %2100 = vmatprep.subr.bf16.mxu1 %v9884_v5 }
 0x18d   :  { %2015 = vmatpush1.bf16.msra.mxu0 %v9879_v6  ;;  %2101 = vmatpush1.bf16.msra.mxu1 %v9882_v7 }
 0x18e   :  { %2016 = vmatprep.subr.bf16.mxu0 %v9887_v8  ;;  %2102 = vmatprep.subr.bf16.mxu1 %v9890_v9 }
 0x191   :  { %2017 = vmatpush1.bf16.msra.mxu0 %v9885_v55  ;;  %2103 = vmatpush1.bf16.msra.mxu1 %v9888_v10 }
 0x192   :  { %2018 = vmatprep.subr.bf16.mxu0 %v9893_v11  ;;  %2104 = vmatprep.subr.bf16.mxu1 %v9896_v12 }
 0x195   :  { %2019 = vmatpush1.bf16.msra.mxu0 %v9891_v13  ;;  %2105 = vmatpush1.bf16.msra.mxu1 %v9894_v14 }
 0x196   :  { %2020 = vmatprep.subr.bf16.mxu0 %v9899_v15  ;;  %2106 = vmatprep.subr.bf16.mxu1 %v9902_v16 }
 0x199   :  { %2021 = vmatpush1.bf16.msra.mxu0 %v9897_v21  ;;  %2107 = vmatpush1.bf16.msra.mxu1 %v9900_v22 }
 0x19a   :  { %2022 = vmatprep.subr.bf16.mxu0 %v9905_v23  ;;  %2108 = vmatprep.subr.bf16.mxu1 %v9908_v24 }
 0x19d   :  { %2023 = vmatpush1.bf16.msra.mxu0 %v9903_v25  ;;  %2109 = vmatpush1.bf16.msra.mxu1 %v9906_v26 }
 0x19e   :  { %2024 = vmatprep.subr.bf16.mxu0 %v9911_v27  ;;  %2110 = vmatprep.subr.bf16.mxu1 %v9914_v28 }
 0x1a1   :  { %2025 = vmatpush1.bf16.msra.mxu0 %v9909_v29  ;;  %2111 = vmatpush1.bf16.msra.mxu1 %v9912_v30 }
 0x1a2   :  { %2026 = vmatprep.subr.bf16.mxu0 %v9917_v31  ;;  %2112 = vmatprep.subr.bf16.mxu1 %v9920_v32 }
 0x1a5   :  { %2027 = vmatpush1.bf16.msra.mxu0 %v9915_v33  ;;  %2113 = vmatpush1.bf16.msra.mxu1 %v9918_v34  ;;  %v9957_v34 = vld [vmem:[#allocation7 + $0x600] ss:$16 sps:$4 sm:$0xff]  }
 0x1a6   :  { %2028 = vmatprep.subr.bf16.mxu0 %v9923_v35  ;;  %2114 = vmatprep.subr.bf16.mxu1 %v9926_v36  ;;  %v9960_v35 = vld [vmem:[#allocation7 + $0x608] ss:$16 sps:$4 sm:$0xff]   ;;  %v9965_v36 = vld [vmem:[#allocation7 + $0x624] ss:$16 sps:$4 sm:$0xff]  }
 0x1a9   :  { %2029 = vmatpush1.bf16.msra.mxu0 %v9921_v37  ;;  %2115 = vmatpush1.bf16.msra.mxu1 %v9924_v38  ;;  %v9968_v37 = vld [vmem:[#allocation7 + $0x62c] ss:$16 sps:$4 sm:$0xff]   ;;  %v9963_v38 = vld [vmem:[#allocation7 + $0x620] ss:$16 sps:$4 sm:$0xff]  }
 0x1aa   :  { %2030 = vmatprep.subr.bf16.mxu0 %v9929_v39  ;;  %2116 = vmatprep.subr.bf16.mxu1 %v9932_v40  ;;  %v9966_v39 = vld [vmem:[#allocation7 + $0x628] ss:$16 sps:$4 sm:$0xff]   ;;  %v9971_v40 = vld [vmem:[#allocation7 + $0x644] ss:$16 sps:$4 sm:$0xff]  }
 0x1ad   :  { %2031 = vmatpush1.bf16.msra.mxu0 %v9927_v41  ;;  %2117 = vmatpush1.bf16.msra.mxu1 %v9930_v42  ;;  %v9974_v41 = vld [vmem:[#allocation7 + $0x64c] ss:$16 sps:$4 sm:$0xff]   ;;  %v9969_v42 = vld [vmem:[#allocation7 + $0x640] ss:$16 sps:$4 sm:$0xff]  }
 0x1ae   :  { %2032 = vmatprep.subr.bf16.mxu0 %v9935_v43  ;;  %2118 = vmatprep.subr.bf16.mxu1 %v9938_v44  ;;  %v9972_v43 = vld [vmem:[#allocation7 + $0x648] ss:$16 sps:$4 sm:$0xff]   ;;  %v9977_v44 = vld [vmem:[#allocation7 + $0x664] ss:$16 sps:$4 sm:$0xff]  }
 0x1b1   :  { %2033 = vmatpush1.bf16.msra.mxu0 %v9933_v45  ;;  %2119 = vmatpush1.bf16.msra.mxu1 %v9936_v46  ;;  %v9980_v45 = vld [vmem:[#allocation7 + $0x66c] ss:$16 sps:$4 sm:$0xff]   ;;  %v9975_v46 = vld [vmem:[#allocation7 + $0x660] ss:$16 sps:$4 sm:$0xff]  }
 0x1b2   :  { %2034 = vmatprep.subr.bf16.mxu0 %v9941_v47  ;;  %2120 = vmatprep.subr.bf16.mxu1 %v9944_v48  ;;  %v9978_v47 = vld [vmem:[#allocation7 + $0x668] ss:$16 sps:$4 sm:$0xff]   ;;  %v9983_v48 = vld [vmem:[#allocation7 + $0x684] ss:$16 sps:$4 sm:$0xff]  }
 0x1b5   :  { %2035 = vmatpush1.bf16.msra.mxu0 %v9939_v49  ;;  %2121 = vmatpush1.bf16.msra.mxu1 %v9942_v50  ;;  %v9986_v49 = vld [vmem:[#allocation7 + $0x68c] ss:$16 sps:$4 sm:$0xff]   ;;  %v9981_v50 = vld [vmem:[#allocation7 + $0x680] ss:$16 sps:$4 sm:$0xff]  }
 0x1b6   :  { %2036 = vmatprep.subr.bf16.mxu0 %v9947_v51  ;;  %2122 = vmatprep.subr.bf16.mxu1 %v9950_v52  ;;  %v9984_v51 = vld [vmem:[#allocation7 + $0x688] ss:$16 sps:$4 sm:$0xff]   ;;  %v9989_v52 = vld [vmem:[#allocation7 + $0x6a4] ss:$16 sps:$4 sm:$0xff]  }
 0x1b9   :  { %2037 = vmatpush1.bf16.msra.mxu0 %v9945_v53  ;;  %2123 = vmatpush1.bf16.msra.mxu1 %v9948_v54  ;;  %v9992_v53 = vld [vmem:[#allocation7 + $0x6ac] ss:$16 sps:$4 sm:$0xff]   ;;  %v9987_v54 = vld [vmem:[#allocation7 + $0x6a0] ss:$16 sps:$4 sm:$0xff]  }
 0x1ba   :  { %2038 = vmatprep.subr.bf16.mxu0 %v9953_v56  ;;  %2124 = vmatprep.subr.bf16.mxu1 %v9956_v57  ;;  %v9990_v56 = vld [vmem:[#allocation7 + $0x6a8] ss:$16 sps:$4 sm:$0xff]   ;;  %v9995_v57 = vld [vmem:[#allocation7 + $0x6c4] ss:$16 sps:$4 sm:$0xff]  }
 0x1bd   :  { %2039 = vmatpush1.bf16.msra.mxu0 %v9951_v58  ;;  %2125 = vmatpush1.bf16.msra.mxu1 %v9954_v59  ;;  %v9998_v58 = vld [vmem:[#allocation7 + $0x6cc] ss:$16 sps:$4 sm:$0xff]   ;;  %v9993_v59 = vld [vmem:[#allocation7 + $0x6c0] ss:$16 sps:$4 sm:$0xff]  }
 0x1be   :  { %2051 = vmatprep.subr.bf16.mxu0 %v9959_v60  ;;  %2137 = vmatprep.subr.bf16.mxu1 %v9962_v61  ;;  %v9996_v60 = vld [vmem:[#allocation7 + $0x6c8] ss:$16 sps:$4 sm:$0xff]   ;;  %v10001_v61 = vld [vmem:[#allocation7 + $0x6e4] ss:$16 sps:$4 sm:$0xff]  }
 0x253   :  { %v1109_v3 = vpop.f32.mrb[4].mxu0  ;;  %v1195_v4 = vpop.f32.mrb[4].mxu1 }
 0x254   :  { %v9524_v5 = vadd.f32 %v1109_v3, %v375_v63  ;;  %v9528_v6 = vadd.f32 %v1195_v4, %v383_v0  ;;  %v1111_v7 = vpop.f32.mrb[5].mxu0  ;;  %v1197_v8 = vpop.f32.mrb[5].mxu1  ;;  %v10005_v3 = vld [vmem:[#allocation7 + $0x700] ss:$16 sps:$4 sm:$0xff]   ;;  %v10008_v4 = vld [vmem:[#allocation7 + $0x708] ss:$16 sps:$4 sm:$0xff]  }
 0x255   :  { %v9525_v9 = vadd.f32 %v1111_v7, %v379_v1  ;;  %v9529_v55 = vadd.f32 %v1197_v8, %v387_v2  ;;  %v1113_v10 = vpop.f32.mrb[6].mxu0  ;;  %v1199_v11 = vpop.f32.mrb[6].mxu1  ;;  %v10011_v7 = vld [vmem:[#allocation7 + $0x720] ss:$16 sps:$4 sm:$0xff]   ;;  %v10014_v8 = vld [vmem:[#allocation7 + $0x728] ss:$16 sps:$4 sm:$0xff]  }
 0x256   :  { %v9526_v12 = vadd.f32 %v1113_v10, %v375_v63  ;;  %v9530_v13 = vadd.f32 %v1199_v11, %v383_v0  ;;  %v1115_v14 = vpop.f32.mrb[7].mxu0  ;;  %v1201_v15 = vpop.f32.mrb[7].mxu1  ;;  %v1204_v22 = vmax.f32 %v9524_v5, 0.0  ;;  %v1206_v23 = vmax.f32 %v9528_v6, 0.0  ;;  %v9999_v63 = vld [vmem:[#allocation7 + $0x6e0] ss:$16 sps:$4 sm:$0xff]  }
 0x257   :  { %v9527_v16 = vadd.f32 %v1115_v14, %v379_v1  ;;  %v9531_v21 = vadd.f32 %v1201_v15, %v387_v2  ;;  %v1205_v26 = vmax.f32 %v9525_v9, 0.0  ;;  %v1207_v27 = vmax.f32 %v9529_v55, 0.0  ;;  %v10002_v0 = vld [vmem:[#allocation7 + $0x6e8] ss:$16 sps:$4 sm:$0xff]   ;;  %v10007_v1 = vld [vmem:[#allocation7 + $0x704] ss:$16 sps:$4 sm:$0xff]  }
 0x258   :  { %v1208_v24 = vmax.f32 %v9526_v12, 0.0  ;;  %v1210_v25 = vmax.f32 %v9530_v13, 0.0  ;;  %v10010_v2 = vld [vmem:[#allocation7 + $0x70c] ss:$16 sps:$4 sm:$0xff]   ;;  %v10013_v5 = vld [vmem:[#allocation7 + $0x724] ss:$16 sps:$4 sm:$0xff]  }
 0x259   :  { %v1209_v28 = vmax.f32 %v9527_v16, 0.0  ;;  %v1211_v29 = vmax.f32 %v9531_v21, 0.0  ;;  %v10016_v6 = vld [vmem:[#allocation7 + $0x72c] ss:$16 sps:$4 sm:$0xff]   ;;  %v10019_v9 = vld [vmem:[#allocation7 + $0x744] ss:$16 sps:$4 sm:$0xff]  }
 0x25a   :  { %v1343_v30 = vpack.c.bf16 %v1208_v24, %v1204_v22  ;;  %v11534_v31 = vpack.c.bf16 %v1210_v25, %v1206_v23  ;;  %v10022_v55 = vld [vmem:[#allocation7 + $0x74c] ss:$16 sps:$4 sm:$0xff]   ;;  %v10017_v10 = vld [vmem:[#allocation7 + $0x740] ss:$16 sps:$4 sm:$0xff]   ;;  %v10020_v11 = vld [vmem:[#allocation7 + $0x748] ss:$16 sps:$4 sm:$0xff]  }
 0x25b   :  { %v1344_v32 = vpack.c.bf16 %v1209_v28, %v1205_v26  ;;  %v1346_v33 = vpack.c.bf16 %v1211_v29, %v1207_v27  ;;  %v10025_v12 = vld [vmem:[#allocation7 + $0x764] ss:$16 sps:$4 sm:$0xff]   ;;  %v10028_v13 = vld [vmem:[#allocation7 + $0x76c] ss:$16 sps:$4 sm:$0xff]   ;;  %v10023_v14 = vld [vmem:[#allocation7 + $0x760] ss:$16 sps:$4 sm:$0xff]  }
 0x25c   :  { %v10026_v15 = vld [vmem:[#allocation7 + $0x768] ss:$16 sps:$4 sm:$0xff]   ;;  %v10031_v16 = vld [vmem:[#allocation7 + $0x784] ss:$16 sps:$4 sm:$0xff]   ;;  %v10034_v21 = vld [vmem:[#allocation7 + $0x78c] ss:$16 sps:$4 sm:$0xff]  }
 0x25d   :  { %2040 = vmatprep.mubr.bf16.mxu0 %v1344_v32  ;;  %2126 = vmatprep.mubr.bf16.mxu1 %v1344_v32  ;;  %v10029_v22 = vld [vmem:[#allocation7 + $0x780] ss:$16 sps:$4 sm:$0xff]   ;;  %v10032_v23 = vld [vmem:[#allocation7 + $0x788] ss:$16 sps:$4 sm:$0xff]   ;;  %v10037_v24 = vld [vmem:[#allocation7 + $0x7a4] ss:$16 sps:$4 sm:$0xff]  }
 0x25e   :  { %2041 = vmatmul.mubr.bf16.vlgmr.msra.gmra.mrb[8].mxu0 %v1343_v30  ;;  %2127 = vmatmul.mubr.bf16.vlgmr.msra.gmra.mrb[8].mxu1 %v1343_v30  ;;  %v10040_v25 = vld [vmem:[#allocation7 + $0x7ac] ss:$16 sps:$4 sm:$0xff]   ;;  %v10035_v26 = vld [vmem:[#allocation7 + $0x7a0] ss:$16 sps:$4 sm:$0xff]   ;;  %v10038_v27 = vld [vmem:[#allocation7 + $0x7a8] ss:$16 sps:$4 sm:$0xff]  }
 0x25f   :  { %2052 = vmatpush1.bf16.msra.mxu0 %v9957_v34  ;;  %2138 = vmatpush1.bf16.msra.mxu1 %v9960_v35  ;;  %v10043_v28 = vld [vmem:[#allocation7 + $0x7c4] ss:$16 sps:$4 sm:$0xff]   ;;  %v10046_v29 = vld [vmem:[#allocation7 + $0x7cc] ss:$16 sps:$4 sm:$0xff]   ;;  %v10041_v30 = vld [vmem:[#allocation7 + $0x7c0] ss:$16 sps:$4 sm:$0xff]  }
 0x260   :  { %2083 = vmatprep.mubr.bf16.mxu0 %v1346_v33  ;;  %2169 = vmatprep.mubr.bf16.mxu1 %v1346_v33  ;;  %v10044_v32 = vld [vmem:[#allocation7 + $0x7c8] ss:$16 sps:$4 sm:$0xff]   ;;  %v10049_v33 = vld [vmem:[#allocation7 + $0x7e4] ss:$16 sps:$4 sm:$0xff]   ;;  %v10052_v34 = vld [vmem:[#allocation7 + $0x7ec] ss:$16 sps:$4 sm:$0xff]  }
 0x261   :  { %2053 = vmatprep.subr.bf16.mxu0 %v9965_v36  ;;  %2139 = vmatprep.subr.bf16.mxu1 %v9968_v37  ;;  %v10047_v35 = vld [vmem:[#allocation7 + $0x7e0] ss:$16 sps:$4 sm:$0xff]   ;;  %v10050_v36 = vld [vmem:[#allocation7 + $0x7e8] ss:$16 sps:$4 sm:$0xff]   ;;  %v10055_v37 = vld [vmem:[#allocation7 + $0x804] ss:$16 sps:$4 sm:$0xff]  }
 0x263   :  { %2054 = vmatpush1.bf16.msra.mxu0 %v9963_v38  ;;  %2140 = vmatpush1.bf16.msra.mxu1 %v9966_v39  ;;  %v10058_v38 = vld [vmem:[#allocation7 + $0x80c] ss:$16 sps:$4 sm:$0xff]   ;;  %v10053_v39 = vld [vmem:[#allocation7 + $0x800] ss:$16 sps:$4 sm:$0xff]  }
 0x264   :  { %2055 = vmatprep.subr.bf16.mxu0 %v9971_v40  ;;  %2141 = vmatprep.subr.bf16.mxu1 %v9974_v41  ;;  %v10056_v40 = vld [vmem:[#allocation7 + $0x808] ss:$16 sps:$4 sm:$0xff]   ;;  %v10061_v41 = vld [vmem:[#allocation7 + $0x824] ss:$16 sps:$4 sm:$0xff]  }
 0x267   :  { %2056 = vmatpush1.bf16.msra.mxu0 %v9969_v42  ;;  %2142 = vmatpush1.bf16.msra.mxu1 %v9972_v43  ;;  %v10064_v42 = vld [vmem:[#allocation7 + $0x82c] ss:$16 sps:$4 sm:$0xff]   ;;  %v10059_v43 = vld [vmem:[#allocation7 + $0x820] ss:$16 sps:$4 sm:$0xff]  }
 0x268   :  { %2057 = vmatprep.subr.bf16.mxu0 %v9977_v44  ;;  %2143 = vmatprep.subr.bf16.mxu1 %v9980_v45  ;;  %v10062_v44 = vld [vmem:[#allocation7 + $0x828] ss:$16 sps:$4 sm:$0xff]   ;;  %v10067_v45 = vld [vmem:[#allocation7 + $0x844] ss:$16 sps:$4 sm:$0xff]  }
 0x26b   :  { %2058 = vmatpush1.bf16.msra.mxu0 %v9975_v46  ;;  %2144 = vmatpush1.bf16.msra.mxu1 %v9978_v47  ;;  %v10070_v46 = vld [vmem:[#allocation7 + $0x84c] ss:$16 sps:$4 sm:$0xff]   ;;  %v10065_v47 = vld [vmem:[#allocation7 + $0x840] ss:$16 sps:$4 sm:$0xff]  }
 0x26c   :  { %2059 = vmatprep.subr.bf16.mxu0 %v9983_v48  ;;  %2145 = vmatprep.subr.bf16.mxu1 %v9986_v49  ;;  %v10068_v48 = vld [vmem:[#allocation7 + $0x848] ss:$16 sps:$4 sm:$0xff]   ;;  %v10073_v49 = vld [vmem:[#allocation7 + $0x864] ss:$16 sps:$4 sm:$0xff]  }
 0x26f   :  { %2060 = vmatpush1.bf16.msra.mxu0 %v9981_v50  ;;  %2146 = vmatpush1.bf16.msra.mxu1 %v9984_v51  ;;  %v10076_v50 = vld [vmem:[#allocation7 + $0x86c] ss:$16 sps:$4 sm:$0xff]   ;;  %v10071_v51 = vld [vmem:[#allocation7 + $0x860] ss:$16 sps:$4 sm:$0xff]  }
 0x270   :  { %2061 = vmatprep.subr.bf16.mxu0 %v9989_v52  ;;  %2147 = vmatprep.subr.bf16.mxu1 %v9992_v53  ;;  %v10079_v52 = vld [vmem:[#allocation7 + $0x884] ss:$16 sps:$4 sm:$0xff]   ;;  %v10082_v53 = vld [vmem:[#allocation7 + $0x88c] ss:$16 sps:$4 sm:$0xff]  }
 0x273   :  { %2062 = vmatpush1.bf16.msra.mxu0 %v9987_v54  ;;  %2148 = vmatpush1.bf16.msra.mxu1 %v9990_v56  ;;  %v10077_v54 = vld [vmem:[#allocation7 + $0x880] ss:$16 sps:$4 sm:$0xff]   ;;  %v10080_v56 = vld [vmem:[#allocation7 + $0x888] ss:$16 sps:$4 sm:$0xff]  }
 0x274   :  { %2063 = vmatprep.subr.bf16.mxu0 %v9995_v57  ;;  %2149 = vmatprep.subr.bf16.mxu1 %v9998_v58  ;;  %v10085_v57 = vld [vmem:[#allocation7 + $0x8a4] ss:$16 sps:$4 sm:$0xff]   ;;  %v10088_v58 = vld [vmem:[#allocation7 + $0x8ac] ss:$16 sps:$4 sm:$0xff]  }
 0x277   :  { %2064 = vmatpush1.bf16.msra.mxu0 %v9993_v59  ;;  %2150 = vmatpush1.bf16.msra.mxu1 %v9996_v60  ;;  %v10083_v59 = vld [vmem:[#allocation7 + $0x8a0] ss:$16 sps:$4 sm:$0xff]   ;;  %v10086_v60 = vld [vmem:[#allocation7 + $0x8a8] ss:$16 sps:$4 sm:$0xff]  }
 0x278   :  { %2065 = vmatprep.subr.bf16.mxu0 %v10001_v61  ;;  %2151 = vmatprep.subr.bf16.mxu1 %v10004_v62  ;;  %v10091_v61 = vld [vmem:[#allocation7 + $0x8c4] ss:$16 sps:$4 sm:$0xff]   ;;  %v10094_v62 = vld [vmem:[#allocation7 + $0x8cc] ss:$16 sps:$4 sm:$0xff]  }
 0x27b   :  { %2066 = vmatpush1.bf16.msra.mxu0 %v9999_v63  ;;  %2152 = vmatpush1.bf16.msra.mxu1 %v10002_v0  ;;  %v10089_v63 = vld [vmem:[#allocation7 + $0x8c0] ss:$16 sps:$4 sm:$0xff]   ;;  %v10092_v0 = vld [vmem:[#allocation7 + $0x8c8] ss:$16 sps:$4 sm:$0xff]  }
 0x27c   :  { %2067 = vmatprep.subr.bf16.mxu0 %v10007_v1  ;;  %2153 = vmatprep.subr.bf16.mxu1 %v10010_v2  ;;  %v10097_v1 = vld [vmem:[#allocation7 + $0x8e4] ss:$16 sps:$4 sm:$0xff]   ;;  %v10100_v2 = vld [vmem:[#allocation7 + $0x8ec] ss:$16 sps:$4 sm:$0xff]  }
 0x27f   :  { %2068 = vmatpush1.bf16.msra.mxu0 %v10005_v3  ;;  %2154 = vmatpush1.bf16.msra.mxu1 %v10008_v4  ;;  %v10095_v3 = vld [vmem:[#allocation7 + $0x8e0] ss:$16 sps:$4 sm:$0xff]   ;;  %v10098_v4 = vld [vmem:[#allocation7 + $0x8e8] ss:$16 sps:$4 sm:$0xff]  }
 0x280   :  { %2069 = vmatprep.subr.bf16.mxu0 %v10013_v5  ;;  %2155 = vmatprep.subr.bf16.mxu1 %v10016_v6  ;;  %v10103_v5 = vld [vmem:[#allocation7 + $0x904] ss:$16 sps:$4 sm:$0xff]   ;;  %v10106_v6 = vld [vmem:[#allocation7 + $0x90c] ss:$16 sps:$4 sm:$0xff]  }
 0x283   :  { %2070 = vmatpush1.bf16.msra.mxu0 %v10011_v7  ;;  %2156 = vmatpush1.bf16.msra.mxu1 %v10014_v8  ;;  %v10101_v7 = vld [vmem:[#allocation7 + $0x900] ss:$16 sps:$4 sm:$0xff]   ;;  %v10104_v8 = vld [vmem:[#allocation7 + $0x908] ss:$16 sps:$4 sm:$0xff]  }
 0x284   :  { %2071 = vmatprep.subr.bf16.mxu0 %v10019_v9  ;;  %2157 = vmatprep.subr.bf16.mxu1 %v10022_v55  ;;  %v10109_v9 = vld [vmem:[#allocation7 + $0x924] ss:$16 sps:$4 sm:$0xff]   ;;  %v10112_v55 = vld [vmem:[#allocation7 + $0x92c] ss:$16 sps:$4 sm:$0xff]  }
 0x287   :  { %2072 = vmatpush1.bf16.msra.mxu0 %v10017_v10  ;;  %2158 = vmatpush1.bf16.msra.mxu1 %v10020_v11  ;;  %v10107_v10 = vld [vmem:[#allocation7 + $0x920] ss:$16 sps:$4 sm:$0xff]   ;;  %v10110_v11 = vld [vmem:[#allocation7 + $0x928] ss:$16 sps:$4 sm:$0xff]  }
 0x288   :  { %2073 = vmatprep.subr.bf16.mxu0 %v10025_v12  ;;  %2159 = vmatprep.subr.bf16.mxu1 %v10028_v13  ;;  %v10115_v12 = vld [vmem:[#allocation7 + $0x944] ss:$16 sps:$4 sm:$0xff]   ;;  %v10118_v13 = vld [vmem:[#allocation7 + $0x94c] ss:$16 sps:$4 sm:$0xff]  }
 0x28b   :  { %2074 = vmatpush1.bf16.msra.mxu0 %v10023_v14  ;;  %2160 = vmatpush1.bf16.msra.mxu1 %v10026_v15  ;;  %v10113_v14 = vld [vmem:[#allocation7 + $0x940] ss:$16 sps:$4 sm:$0xff]   ;;  %v10116_v15 = vld [vmem:[#allocation7 + $0x948] ss:$16 sps:$4 sm:$0xff]  }
 0x28c   :  { %2075 = vmatprep.subr.bf16.mxu0 %v10031_v16  ;;  %2161 = vmatprep.subr.bf16.mxu1 %v10034_v21  ;;  %v10121_v16 = vld [vmem:[#allocation7 + $0x964] ss:$16 sps:$4 sm:$0xff]   ;;  %v10124_v21 = vld [vmem:[#allocation7 + $0x96c] ss:$16 sps:$4 sm:$0xff]  }
 0x28f   :  { %2076 = vmatpush1.bf16.msra.mxu0 %v10029_v22  ;;  %2162 = vmatpush1.bf16.msra.mxu1 %v10032_v23  ;;  %v10119_v22 = vld [vmem:[#allocation7 + $0x960] ss:$16 sps:$4 sm:$0xff]   ;;  %v10122_v23 = vld [vmem:[#allocation7 + $0x968] ss:$16 sps:$4 sm:$0xff]  }
 0x290   :  { %2077 = vmatprep.subr.bf16.mxu0 %v10037_v24  ;;  %2163 = vmatprep.subr.bf16.mxu1 %v10040_v25  ;;  %v10127_v24 = vld [vmem:[#allocation7 + $0x984] ss:$16 sps:$4 sm:$0xff]   ;;  %v10130_v25 = vld [vmem:[#allocation7 + $0x98c] ss:$16 sps:$4 sm:$0xff]  }
 0x293   :  { %2078 = vmatpush1.bf16.msra.mxu0 %v10035_v26  ;;  %2164 = vmatpush1.bf16.msra.mxu1 %v10038_v27  ;;  %v10125_v26 = vld [vmem:[#allocation7 + $0x980] ss:$16 sps:$4 sm:$0xff]   ;;  %v10128_v27 = vld [vmem:[#allocation7 + $0x988] ss:$16 sps:$4 sm:$0xff]  }
 0x294   :  { %2079 = vmatprep.subr.bf16.mxu0 %v10043_v28  ;;  %2165 = vmatprep.subr.bf16.mxu1 %v10046_v29  ;;  %v10133_v28 = vld [vmem:[#allocation7 + $0x9a4] ss:$16 sps:$4 sm:$0xff]   ;;  %v10136_v29 = vld [vmem:[#allocation7 + $0x9ac] ss:$16 sps:$4 sm:$0xff]  }
 0x297   :  { %2080 = vmatpush1.bf16.msra.mxu0 %v10041_v30  ;;  %2166 = vmatpush1.bf16.msra.mxu1 %v10044_v32  ;;  %v10131_v30 = vld [vmem:[#allocation7 + $0x9a0] ss:$16 sps:$4 sm:$0xff]   ;;  %v10134_v32 = vld [vmem:[#allocation7 + $0x9a8] ss:$16 sps:$4 sm:$0xff]  }
 0x298   :  { %2081 = vmatprep.subr.bf16.mxu0 %v10049_v33  ;;  %2167 = vmatprep.subr.bf16.mxu1 %v10052_v34  ;;  %v10139_v33 = vld [vmem:[#allocation7 + $0x9c4] ss:$16 sps:$4 sm:$0xff]   ;;  %v10142_v34 = vld [vmem:[#allocation7 + $0x9cc] ss:$16 sps:$4 sm:$0xff]  }
 0x29b   :  { %2082 = vmatpush1.bf16.msra.mxu0 %v10047_v35  ;;  %2168 = vmatpush1.bf16.msra.mxu1 %v10050_v36  ;;  %v10137_v35 = vld [vmem:[#allocation7 + $0x9c0] ss:$16 sps:$4 sm:$0xff]   ;;  %v10140_v36 = vld [vmem:[#allocation7 + $0x9c8] ss:$16 sps:$4 sm:$0xff]  }
 0x29c   :  { %2984 = vmatprep.subr.bf16.mxu0 %v10055_v37  ;;  %3070 = vmatprep.subr.bf16.mxu1 %v10058_v38  ;;  %v10145_v37 = vld [vmem:[#allocation7 + $0x9e4] ss:$16 sps:$4 sm:$0xff]   ;;  %v10148_v38 = vld [vmem:[#allocation7 + $0x9ec] ss:$16 sps:$4 sm:$0xff]  }
 0x29e   :  { %2084 = vmatmul.mubr.bf16.vlgmr.msra.gmra.mrb[8].mxu0 %v11534_v31  ;;  %2170 = vmatmul.mubr.bf16.vlgmr.msra.gmra.mrb[8].mxu1 %v11534_v31  ;;  %v10074_v31 = vld [vmem:[#allocation7 + $0x868] ss:$16 sps:$4 sm:$0xff]  }
 0x29f   :  { %2985 = vmatpush1.bf16.msra.mxu0 %v10053_v39  ;;  %3071 = vmatpush1.bf16.msra.mxu1 %v10056_v40  ;;  %v10143_v39 = vld [vmem:[#allocation7 + $0x9e0] ss:$16 sps:$4 sm:$0xff]   ;;  %v10146_v40 = vld [vmem:[#allocation7 + $0x9e8] ss:$16 sps:$4 sm:$0xff]  }
 0x2a0   :  { %2986 = vmatprep.subr.bf16.mxu0 %v10061_v41  ;;  %3072 = vmatprep.subr.bf16.mxu1 %v10064_v42  ;;  %v10151_v41 = vld [vmem:[#allocation7 + $0xa04] ss:$16 sps:$4 sm:$0xff]   ;;  %v10154_v42 = vld [vmem:[#allocation7 + $0xa0c] ss:$16 sps:$4 sm:$0xff]  }
 0x2a3   :  { %2987 = vmatpush1.bf16.msra.mxu0 %v10059_v43  ;;  %3073 = vmatpush1.bf16.msra.mxu1 %v10062_v44  ;;  %v1342_v43 = vld [vmem:[#allocation8 + $0x4] sm:$0xf] }
 0x2a4   :  { %2988 = vmatprep.subr.bf16.mxu0 %v10067_v45  ;;  %3074 = vmatprep.subr.bf16.mxu1 %v10070_v46  ;;  %v1351_v44 = vrot.slane %v1342_v43, %v11514_v17  ;;  %v1359_v45 = vrot.slane %v1342_v43, %v11518_v19  ;;  %v1355_v46 = vrot.slane %v1342_v43, %v11516_v18 }
 0x2a7   :  { %2989 = vmatpush1.bf16.msra.mxu0 %v10065_v47  ;;  %3075 = vmatpush1.bf16.msra.mxu1 %v10068_v48  ;;  %v1363_v47 = vrot.slane %v1342_v43, %v11520_v20  ;;  %v10196_v43 = vld [vmem:[#allocation7 + $0xaec] ss:$16 sps:$4 sm:$0xff]  }
 0x2a8   :  { %2990 = vmatprep.subr.bf16.mxu0 %v10073_v49  ;;  %3076 = vmatprep.subr.bf16.mxu1 %v10076_v50 }
 0x2ab   :  { %2991 = vmatpush1.bf16.msra.mxu0 %v10071_v51  ;;  %3077 = vmatpush1.bf16.msra.mxu1 %v10074_v31 }
 0x2ac   :  { %2992 = vmatprep.subr.bf16.mxu0 %v10079_v52  ;;  %3078 = vmatprep.subr.bf16.mxu1 %v10082_v53 }
 0x2af   :  { %2993 = vmatpush1.bf16.msra.mxu0 %v10077_v54  ;;  %3079 = vmatpush1.bf16.msra.mxu1 %v10080_v56 }
 0x2b0   :  { %2994 = vmatprep.subr.bf16.mxu0 %v10085_v57  ;;  %3080 = vmatprep.subr.bf16.mxu1 %v10088_v58 }
 0x2b3   :  { %2995 = vmatpush1.bf16.msra.mxu0 %v10083_v59  ;;  %3081 = vmatpush1.bf16.msra.mxu1 %v10086_v60 }
 0x2b4   :  { %2996 = vmatprep.subr.bf16.mxu0 %v10091_v61  ;;  %3082 = vmatprep.subr.bf16.mxu1 %v10094_v62 }
 0x2b7   :  { %2997 = vmatpush1.bf16.msra.mxu0 %v10089_v63  ;;  %3083 = vmatpush1.bf16.msra.mxu1 %v10092_v0 }
 0x2b8   :  { %2998 = vmatprep.subr.bf16.mxu0 %v10097_v1  ;;  %3084 = vmatprep.subr.bf16.mxu1 %v10100_v2 }
 0x2bb   :  { %2999 = vmatpush1.bf16.msra.mxu0 %v10095_v3  ;;  %3085 = vmatpush1.bf16.msra.mxu1 %v10098_v4 }
 0x2bc   :  { %3000 = vmatprep.subr.bf16.mxu0 %v10103_v5  ;;  %3086 = vmatprep.subr.bf16.mxu1 %v10106_v6 }
 0x2bf   :  { %3001 = vmatpush1.bf16.msra.mxu0 %v10101_v7  ;;  %3087 = vmatpush1.bf16.msra.mxu1 %v10104_v8 }
 0x2c0   :  { %3002 = vmatprep.subr.bf16.mxu0 %v10109_v9  ;;  %3088 = vmatprep.subr.bf16.mxu1 %v10112_v55 }
 0x2c3   :  { %3003 = vmatpush1.bf16.msra.mxu0 %v10107_v10  ;;  %3089 = vmatpush1.bf16.msra.mxu1 %v10110_v11  ;;  %v10149_v11 = vld [vmem:[#allocation7 + $0xa00] ss:$16 sps:$4 sm:$0xff]  }
 0x2c4   :  { %3004 = vmatprep.subr.bf16.mxu0 %v10115_v12  ;;  %3090 = vmatprep.subr.bf16.mxu1 %v10118_v13  ;;  %v10152_v12 = vld [vmem:[#allocation7 + $0xa08] ss:$16 sps:$4 sm:$0xff]   ;;  %v10157_v13 = vld [vmem:[#allocation7 + $0xa24] ss:$16 sps:$4 sm:$0xff]  }
 0x2c7   :  { %3005 = vmatpush1.bf16.msra.mxu0 %v10113_v14  ;;  %3091 = vmatpush1.bf16.msra.mxu1 %v10116_v15  ;;  %v10160_v14 = vld [vmem:[#allocation7 + $0xa2c] ss:$16 sps:$4 sm:$0xff]   ;;  %v10155_v15 = vld [vmem:[#allocation7 + $0xa20] ss:$16 sps:$4 sm:$0xff]  }
 0x2c8   :  { %3006 = vmatprep.subr.bf16.mxu0 %v10121_v16  ;;  %3092 = vmatprep.subr.bf16.mxu1 %v10124_v21  ;;  %v10158_v16 = vld [vmem:[#allocation7 + $0xa28] ss:$16 sps:$4 sm:$0xff]   ;;  %v10163_v21 = vld [vmem:[#allocation7 + $0xa44] ss:$16 sps:$4 sm:$0xff]  }
 0x2cb   :  { %3007 = vmatpush1.bf16.msra.mxu0 %v10119_v22  ;;  %3093 = vmatpush1.bf16.msra.mxu1 %v10122_v23  ;;  %v10166_v22 = vld [vmem:[#allocation7 + $0xa4c] ss:$16 sps:$4 sm:$0xff]   ;;  %v10161_v23 = vld [vmem:[#allocation7 + $0xa40] ss:$16 sps:$4 sm:$0xff]  }
 0x2cc   :  { %3008 = vmatprep.subr.bf16.mxu0 %v10127_v24  ;;  %3094 = vmatprep.subr.bf16.mxu1 %v10130_v25  ;;  %v10164_v24 = vld [vmem:[#allocation7 + $0xa48] ss:$16 sps:$4 sm:$0xff]   ;;  %v10169_v25 = vld [vmem:[#allocation7 + $0xa64] ss:$16 sps:$4 sm:$0xff]  }
 0x2cf   :  { %3009 = vmatpush1.bf16.msra.mxu0 %v10125_v26  ;;  %3095 = vmatpush1.bf16.msra.mxu1 %v10128_v27  ;;  %v10172_v26 = vld [vmem:[#allocation7 + $0xa6c] ss:$16 sps:$4 sm:$0xff]   ;;  %v10167_v27 = vld [vmem:[#allocation7 + $0xa60] ss:$16 sps:$4 sm:$0xff]  }
 0x2d0   :  { %3010 = vmatprep.subr.bf16.mxu0 %v10133_v28  ;;  %3096 = vmatprep.subr.bf16.mxu1 %v10136_v29  ;;  %v10170_v28 = vld [vmem:[#allocation7 + $0xa68] ss:$16 sps:$4 sm:$0xff]   ;;  %v10175_v29 = vld [vmem:[#allocation7 + $0xa84] ss:$16 sps:$4 sm:$0xff]  }
 0x2d3   :  { %3011 = vmatpush1.bf16.msra.mxu0 %v10131_v30  ;;  %3097 = vmatpush1.bf16.msra.mxu1 %v10134_v32  ;;  %v10178_v30 = vld [vmem:[#allocation7 + $0xa8c] ss:$16 sps:$4 sm:$0xff]   ;;  %v10173_v32 = vld [vmem:[#allocation7 + $0xa80] ss:$16 sps:$4 sm:$0xff]  }
 0x2d4   :  { %3012 = vmatprep.subr.bf16.mxu0 %v10139_v33  ;;  %3098 = vmatprep.subr.bf16.mxu1 %v10142_v34  ;;  %v10176_v33 = vld [vmem:[#allocation7 + $0xa88] ss:$16 sps:$4 sm:$0xff]   ;;  %v10181_v34 = vld [vmem:[#allocation7 + $0xaa4] ss:$16 sps:$4 sm:$0xff]  }
 0x2d7   :  { %3013 = vmatpush1.bf16.msra.mxu0 %v10137_v35  ;;  %3099 = vmatpush1.bf16.msra.mxu1 %v10140_v36  ;;  %v10184_v35 = vld [vmem:[#allocation7 + $0xaac] ss:$16 sps:$4 sm:$0xff]   ;;  %v10179_v36 = vld [vmem:[#allocation7 + $0xaa0] ss:$16 sps:$4 sm:$0xff]  }
 0x2d8   :  { %3014 = vmatprep.subr.bf16.mxu0 %v10145_v37  ;;  %3100 = vmatprep.subr.bf16.mxu1 %v10148_v38  ;;  %v10182_v37 = vld [vmem:[#allocation7 + $0xaa8] ss:$16 sps:$4 sm:$0xff]   ;;  %v10187_v38 = vld [vmem:[#allocation7 + $0xac4] ss:$16 sps:$4 sm:$0xff]  }
 0x2db   :  { %3015 = vmatpush1.bf16.msra.mxu0 %v10143_v39  ;;  %3101 = vmatpush1.bf16.msra.mxu1 %v10146_v40  ;;  %v10190_v39 = vld [vmem:[#allocation7 + $0xacc] ss:$16 sps:$4 sm:$0xff]   ;;  %v10185_v40 = vld [vmem:[#allocation7 + $0xac0] ss:$16 sps:$4 sm:$0xff]  }
 0x2dc   :  { %3027 = vmatprep.subr.bf16.mxu0 %v10151_v41  ;;  %3113 = vmatprep.subr.bf16.mxu1 %v10154_v42  ;;  %v10188_v41 = vld [vmem:[#allocation7 + $0xac8] ss:$16 sps:$4 sm:$0xff]   ;;  %v10193_v42 = vld [vmem:[#allocation7 + $0xae4] ss:$16 sps:$4 sm:$0xff]  }
 0x371   :  { %v2085_v48 = vpop.f32.mrb[8].mxu0  ;;  %v2171_v49 = vpop.f32.mrb[8].mxu1 }
 0x372   :  { %v9532_v50 = vadd.f32 %v2085_v48, %v1351_v44  ;;  %v9536_v51 = vadd.f32 %v2171_v49, %v1359_v45  ;;  %v2087_v31 = vpop.f32.mrb[9].mxu0  ;;  %v2173_v52 = vpop.f32.mrb[9].mxu1  ;;  %v10197_v48 = vld [vmem:[#allocation7 + $0xb00] ss:$16 sps:$4 sm:$0xff]   ;;  %v10200_v49 = vld [vmem:[#allocation7 + $0xb08] ss:$16 sps:$4 sm:$0xff]  }
 0x373   :  { %v9533_v53 = vadd.f32 %v2087_v31, %v1355_v46  ;;  %v9537_v54 = vadd.f32 %v2173_v52, %v1363_v47  ;;  %v2089_v56 = vpop.f32.mrb[10].mxu0  ;;  %v2175_v57 = vpop.f32.mrb[10].mxu1  ;;  %v10203_v31 = vld [vmem:[#allocation7 + $0xb20] ss:$16 sps:$4 sm:$0xff]   ;;  %v10206_v52 = vld [vmem:[#allocation7 + $0xb28] ss:$16 sps:$4 sm:$0xff]  }
 0x374   :  { %v9534_v58 = vadd.f32 %v2089_v56, %v1351_v44  ;;  %v9538_v59 = vadd.f32 %v2175_v57, %v1359_v45  ;;  %v2091_v60 = vpop.f32.mrb[11].mxu0  ;;  %v2177_v61 = vpop.f32.mrb[11].mxu1  ;;  %v2180_v0 = vmax.f32 %v9532_v50, 0.0  ;;  %v2182_v1 = vmax.f32 %v9536_v51, 0.0  ;;  %v10191_v44 = vld [vmem:[#allocation7 + $0xae0] ss:$16 sps:$4 sm:$0xff]  }
 0x375   :  { %v9535_v62 = vadd.f32 %v2091_v60, %v1355_v46  ;;  %v9539_v63 = vadd.f32 %v2177_v61, %v1363_v47  ;;  %v2181_v4 = vmax.f32 %v9533_v53, 0.0  ;;  %v2183_v5 = vmax.f32 %v9537_v54, 0.0  ;;  %v10194_v45 = vld [vmem:[#allocation7 + $0xae8] ss:$16 sps:$4 sm:$0xff]   ;;  %v10199_v46 = vld [vmem:[#allocation7 + $0xb04] ss:$16 sps:$4 sm:$0xff]  }
 0x376   :  { %v2184_v2 = vmax.f32 %v9534_v58, 0.0  ;;  %v2186_v3 = vmax.f32 %v9538_v59, 0.0  ;;  %v10202_v47 = vld [vmem:[#allocation7 + $0xb0c] ss:$16 sps:$4 sm:$0xff]   ;;  %v10205_v50 = vld [vmem:[#allocation7 + $0xb24] ss:$16 sps:$4 sm:$0xff]  }
 0x377   :  { %v2185_v6 = vmax.f32 %v9535_v62, 0.0  ;;  %v2187_v7 = vmax.f32 %v9539_v63, 0.0  ;;  %v10208_v51 = vld [vmem:[#allocation7 + $0xb2c] ss:$16 sps:$4 sm:$0xff]   ;;  %v10211_v53 = vld [vmem:[#allocation7 + $0xb44] ss:$16 sps:$4 sm:$0xff]  }
 0x378   :  { %v2319_v8 = vpack.c.bf16 %v2184_v2, %v2180_v0  ;;  %v11542_v9 = vpack.c.bf16 %v2186_v3, %v2182_v1  ;;  %v10214_v54 = vld [vmem:[#allocation7 + $0xb4c] ss:$16 sps:$4 sm:$0xff]   ;;  %v10209_v56 = vld [vmem:[#allocation7 + $0xb40] ss:$16 sps:$4 sm:$0xff]   ;;  %v10212_v57 = vld [vmem:[#allocation7 + $0xb48] ss:$16 sps:$4 sm:$0xff]  }
 0x379   :  { %v2320_v55 = vpack.c.bf16 %v2185_v6, %v2181_v4  ;;  %v2322_v10 = vpack.c.bf16 %v2187_v7, %v2183_v5  ;;  %v10217_v58 = vld [vmem:[#allocation7 + $0xb64] ss:$16 sps:$4 sm:$0xff]   ;;  %v10220_v59 = vld [vmem:[#allocation7 + $0xb6c] ss:$16 sps:$4 sm:$0xff]   ;;  %v10215_v60 = vld [vmem:[#allocation7 + $0xb60] ss:$16 sps:$4 sm:$0xff]  }
 0x37a   :  { %v10218_v61 = vld [vmem:[#allocation7 + $0xb68] ss:$16 sps:$4 sm:$0xff]   ;;  %v10223_v62 = vld [vmem:[#allocation7 + $0xb84] ss:$16 sps:$4 sm:$0xff]   ;;  %v10226_v63 = vld [vmem:[#allocation7 + $0xb8c] ss:$16 sps:$4 sm:$0xff]  }
 0x37b   :  { %3016 = vmatprep.mubr.bf16.mxu0 %v2320_v55  ;;  %3102 = vmatprep.mubr.bf16.mxu1 %v2320_v55  ;;  %v10221_v0 = vld [vmem:[#allocation7 + $0xb80] ss:$16 sps:$4 sm:$0xff]   ;;  %v10224_v1 = vld [vmem:[#allocation7 + $0xb88] ss:$16 sps:$4 sm:$0xff]   ;;  %v10229_v2 = vld [vmem:[#allocation7 + $0xba4] ss:$16 sps:$4 sm:$0xff]  }
 0x37c   :  { %3017 = vmatmul.mubr.bf16.vlgmr.msra.gmra.mrb[12].mxu0 %v2319_v8  ;;  %3103 = vmatmul.mubr.bf16.vlgmr.msra.gmra.mrb[12].mxu1 %v2319_v8  ;;  %v10232_v3 = vld [vmem:[#allocation7 + $0xbac] ss:$16 sps:$4 sm:$0xff]   ;;  %v10227_v4 = vld [vmem:[#allocation7 + $0xba0] ss:$16 sps:$4 sm:$0xff]   ;;  %v10230_v5 = vld [vmem:[#allocation7 + $0xba8] ss:$16 sps:$4 sm:$0xff]  }
 0x37d   :  { %3028 = vmatpush1.bf16.msra.mxu0 %v10149_v11  ;;  %3114 = vmatpush1.bf16.msra.mxu1 %v10152_v12  ;;  %v10235_v6 = vld [vmem:[#allocation7 + $0xbc4] ss:$16 sps:$4 sm:$0xff]   ;;  %v10238_v7 = vld [vmem:[#allocation7 + $0xbcc] ss:$16 sps:$4 sm:$0xff]   ;;  %v10233_v8 = vld [vmem:[#allocation7 + $0xbc0] ss:$16 sps:$4 sm:$0xff]  }
 0x37e   :  { %3059 = vmatprep.mubr.bf16.mxu0 %v2322_v10  ;;  %3145 = vmatprep.mubr.bf16.mxu1 %v2322_v10  ;;  %v10236_v55 = vld [vmem:[#allocation7 + $0xbc8] ss:$16 sps:$4 sm:$0xff]   ;;  %v10241_v10 = vld [vmem:[#allocation7 + $0xbe4] ss:$16 sps:$4 sm:$0xff]   ;;  %v10244_v11 = vld [vmem:[#allocation7 + $0xbec] ss:$16 sps:$4 sm:$0xff]  }
 0x37f   :  { %3029 = vmatprep.subr.bf16.mxu0 %v10157_v13  ;;  %3115 = vmatprep.subr.bf16.mxu1 %v10160_v14  ;;  %v10239_v12 = vld [vmem:[#allocation7 + $0xbe0] ss:$16 sps:$4 sm:$0xff]   ;;  %v10242_v13 = vld [vmem:[#allocation7 + $0xbe8] ss:$16 sps:$4 sm:$0xff]   ;;  %v10247_v14 = vld [vmem:[#allocation7 + $0xc04] ss:$16 sps:$4 sm:$0xff]  }
 0x381   :  { %3030 = vmatpush1.bf16.msra.mxu0 %v10155_v15  ;;  %3116 = vmatpush1.bf16.msra.mxu1 %v10158_v16  ;;  %v10250_v15 = vld [vmem:[#allocation7 + $0xc0c] ss:$16 sps:$4 sm:$0xff]   ;;  %v10245_v16 = vld [vmem:[#allocation7 + $0xc00] ss:$16 sps:$4 sm:$0xff]  }
 0x382   :  { %3031 = vmatprep.subr.bf16.mxu0 %v10163_v21  ;;  %3117 = vmatprep.subr.bf16.mxu1 %v10166_v22  ;;  %v10248_v21 = vld [vmem:[#allocation7 + $0xc08] ss:$16 sps:$4 sm:$0xff]   ;;  %v10253_v22 = vld [vmem:[#allocation7 + $0xc24] ss:$16 sps:$4 sm:$0xff]  }
 0x385   :  { %3032 = vmatpush1.bf16.msra.mxu0 %v10161_v23  ;;  %3118 = vmatpush1.bf16.msra.mxu1 %v10164_v24  ;;  %v10256_v23 = vld [vmem:[#allocation7 + $0xc2c] ss:$16 sps:$4 sm:$0xff]   ;;  %v10251_v24 = vld [vmem:[#allocation7 + $0xc20] ss:$16 sps:$4 sm:$0xff]  }
 0x386   :  { %3033 = vmatprep.subr.bf16.mxu0 %v10169_v25  ;;  %3119 = vmatprep.subr.bf16.mxu1 %v10172_v26  ;;  %v10254_v25 = vld [vmem:[#allocation7 + $0xc28] ss:$16 sps:$4 sm:$0xff]   ;;  %v10259_v26 = vld [vmem:[#allocation7 + $0xc44] ss:$16 sps:$4 sm:$0xff]  }
 0x389   :  { %3034 = vmatpush1.bf16.msra.mxu0 %v10167_v27  ;;  %3120 = vmatpush1.bf16.msra.mxu1 %v10170_v28  ;;  %v10262_v27 = vld [vmem:[#allocation7 + $0xc4c] ss:$16 sps:$4 sm:$0xff]   ;;  %v10257_v28 = vld [vmem:[#allocation7 + $0xc40] ss:$16 sps:$4 sm:$0xff]  }
 0x38a   :  { %3035 = vmatprep.subr.bf16.mxu0 %v10175_v29  ;;  %3121 = vmatprep.subr.bf16.mxu1 %v10178_v30  ;;  %v10260_v29 = vld [vmem:[#allocation7 + $0xc48] ss:$16 sps:$4 sm:$0xff]   ;;  %v10265_v30 = vld [vmem:[#allocation7 + $0xc64] ss:$16 sps:$4 sm:$0xff]  }
 0x38d   :  { %3036 = vmatpush1.bf16.msra.mxu0 %v10173_v32  ;;  %3122 = vmatpush1.bf16.msra.mxu1 %v10176_v33  ;;  %v10268_v32 = vld [vmem:[#allocation7 + $0xc6c] ss:$16 sps:$4 sm:$0xff]   ;;  %v10263_v33 = vld [vmem:[#allocation7 + $0xc60] ss:$16 sps:$4 sm:$0xff]  }
 0x38e   :  { %3037 = vmatprep.subr.bf16.mxu0 %v10181_v34  ;;  %3123 = vmatprep.subr.bf16.mxu1 %v10184_v35  ;;  %v10271_v34 = vld [vmem:[#allocation7 + $0xc84] ss:$16 sps:$4 sm:$0xff]   ;;  %v10274_v35 = vld [vmem:[#allocation7 + $0xc8c] ss:$16 sps:$4 sm:$0xff]  }
 0x391   :  { %3038 = vmatpush1.bf16.msra.mxu0 %v10179_v36  ;;  %3124 = vmatpush1.bf16.msra.mxu1 %v10182_v37  ;;  %v10269_v36 = vld [vmem:[#allocation7 + $0xc80] ss:$16 sps:$4 sm:$0xff]   ;;  %v10272_v37 = vld [vmem:[#allocation7 + $0xc88] ss:$16 sps:$4 sm:$0xff]  }
 0x392   :  { %3039 = vmatprep.subr.bf16.mxu0 %v10187_v38  ;;  %3125 = vmatprep.subr.bf16.mxu1 %v10190_v39  ;;  %v10277_v38 = vld [vmem:[#allocation7 + $0xca4] ss:$16 sps:$4 sm:$0xff]   ;;  %v10280_v39 = vld [vmem:[#allocation7 + $0xcac] ss:$16 sps:$4 sm:$0xff]  }
 0x395   :  { %3040 = vmatpush1.bf16.msra.mxu0 %v10185_v40  ;;  %3126 = vmatpush1.bf16.msra.mxu1 %v10188_v41  ;;  %v10275_v40 = vld [vmem:[#allocation7 + $0xca0] ss:$16 sps:$4 sm:$0xff]   ;;  %v10278_v41 = vld [vmem:[#allocation7 + $0xca8] ss:$16 sps:$4 sm:$0xff]  }
 0x396   :  { %3041 = vmatprep.subr.bf16.mxu0 %v10193_v42  ;;  %3127 = vmatprep.subr.bf16.mxu1 %v10196_v43  ;;  %v10283_v42 = vld [vmem:[#allocation7 + $0xcc4] ss:$16 sps:$4 sm:$0xff]   ;;  %v10286_v43 = vld [vmem:[#allocation7 + $0xccc] ss:$16 sps:$4 sm:$0xff]  }
 0x399   :  { %3042 = vmatpush1.bf16.msra.mxu0 %v10191_v44  ;;  %3128 = vmatpush1.bf16.msra.mxu1 %v10194_v45  ;;  %v10281_v44 = vld [vmem:[#allocation7 + $0xcc0] ss:$16 sps:$4 sm:$0xff]   ;;  %v10284_v45 = vld [vmem:[#allocation7 + $0xcc8] ss:$16 sps:$4 sm:$0xff]  }
 0x39a   :  { %3043 = vmatprep.subr.bf16.mxu0 %v10199_v46  ;;  %3129 = vmatprep.subr.bf16.mxu1 %v10202_v47  ;;  %v10289_v46 = vld [vmem:[#allocation7 + $0xce4] ss:$16 sps:$4 sm:$0xff]   ;;  %v10292_v47 = vld [vmem:[#allocation7 + $0xcec] ss:$16 sps:$4 sm:$0xff]  }
 0x39d   :  { %3044 = vmatpush1.bf16.msra.mxu0 %v10197_v48  ;;  %3130 = vmatpush1.bf16.msra.mxu1 %v10200_v49  ;;  %v10287_v48 = vld [vmem:[#allocation7 + $0xce0] ss:$16 sps:$4 sm:$0xff]   ;;  %v10290_v49 = vld [vmem:[#allocation7 + $0xce8] ss:$16 sps:$4 sm:$0xff]  }
 0x39e   :  { %3045 = vmatprep.subr.bf16.mxu0 %v10205_v50  ;;  %3131 = vmatprep.subr.bf16.mxu1 %v10208_v51  ;;  %v10295_v50 = vld [vmem:[#allocation7 + $0xd04] ss:$16 sps:$4 sm:$0xff]   ;;  %v10298_v51 = vld [vmem:[#allocation7 + $0xd0c] ss:$16 sps:$4 sm:$0xff]  }
 0x3a1   :  { %3046 = vmatpush1.bf16.msra.mxu0 %v10203_v31  ;;  %3132 = vmatpush1.bf16.msra.mxu1 %v10206_v52  ;;  %v10293_v31 = vld [vmem:[#allocation7 + $0xd00] ss:$16 sps:$4 sm:$0xff]   ;;  %v10296_v52 = vld [vmem:[#allocation7 + $0xd08] ss:$16 sps:$4 sm:$0xff]  }
 0x3a2   :  { %3047 = vmatprep.subr.bf16.mxu0 %v10211_v53  ;;  %3133 = vmatprep.subr.bf16.mxu1 %v10214_v54  ;;  %v10301_v53 = vld [vmem:[#allocation7 + $0xd24] ss:$16 sps:$4 sm:$0xff]   ;;  %v10304_v54 = vld [vmem:[#allocation7 + $0xd2c] ss:$16 sps:$4 sm:$0xff]  }
 0x3a5   :  { %3048 = vmatpush1.bf16.msra.mxu0 %v10209_v56  ;;  %3134 = vmatpush1.bf16.msra.mxu1 %v10212_v57  ;;  %v10299_v56 = vld [vmem:[#allocation7 + $0xd20] ss:$16 sps:$4 sm:$0xff]   ;;  %v10302_v57 = vld [vmem:[#allocation7 + $0xd28] ss:$16 sps:$4 sm:$0xff]  }
 0x3a6   :  { %3049 = vmatprep.subr.bf16.mxu0 %v10217_v58  ;;  %3135 = vmatprep.subr.bf16.mxu1 %v10220_v59  ;;  %v10307_v58 = vld [vmem:[#allocation7 + $0xd44] ss:$16 sps:$4 sm:$0xff]   ;;  %v10310_v59 = vld [vmem:[#allocation7 + $0xd4c] ss:$16 sps:$4 sm:$0xff]  }
 0x3a9   :  { %3050 = vmatpush1.bf16.msra.mxu0 %v10215_v60  ;;  %3136 = vmatpush1.bf16.msra.mxu1 %v10218_v61  ;;  %v10305_v60 = vld [vmem:[#allocation7 + $0xd40] ss:$16 sps:$4 sm:$0xff]   ;;  %v10308_v61 = vld [vmem:[#allocation7 + $0xd48] ss:$16 sps:$4 sm:$0xff]  }
 0x3aa   :  { %3051 = vmatprep.subr.bf16.mxu0 %v10223_v62  ;;  %3137 = vmatprep.subr.bf16.mxu1 %v10226_v63  ;;  %v10313_v62 = vld [vmem:[#allocation7 + $0xd64] ss:$16 sps:$4 sm:$0xff]   ;;  %v10316_v63 = vld [vmem:[#allocation7 + $0xd6c] ss:$16 sps:$4 sm:$0xff]  }
 0x3ad   :  { %3052 = vmatpush1.bf16.msra.mxu0 %v10221_v0  ;;  %3138 = vmatpush1.bf16.msra.mxu1 %v10224_v1  ;;  %v10311_v0 = vld [vmem:[#allocation7 + $0xd60] ss:$16 sps:$4 sm:$0xff]   ;;  %v10314_v1 = vld [vmem:[#allocation7 + $0xd68] ss:$16 sps:$4 sm:$0xff]  }
 0x3ae   :  { %3053 = vmatprep.subr.bf16.mxu0 %v10229_v2  ;;  %3139 = vmatprep.subr.bf16.mxu1 %v10232_v3  ;;  %v10319_v2 = vld [vmem:[#allocation7 + $0xd84] ss:$16 sps:$4 sm:$0xff]   ;;  %v10322_v3 = vld [vmem:[#allocation7 + $0xd8c] ss:$16 sps:$4 sm:$0xff]  }
 0x3b1   :  { %3054 = vmatpush1.bf16.msra.mxu0 %v10227_v4  ;;  %3140 = vmatpush1.bf16.msra.mxu1 %v10230_v5  ;;  %v10317_v4 = vld [vmem:[#allocation7 + $0xd80] ss:$16 sps:$4 sm:$0xff]   ;;  %v10320_v5 = vld [vmem:[#allocation7 + $0xd88] ss:$16 sps:$4 sm:$0xff]  }
 0x3b2   :  { %3055 = vmatprep.subr.bf16.mxu0 %v10235_v6  ;;  %3141 = vmatprep.subr.bf16.mxu1 %v10238_v7  ;;  %v10325_v6 = vld [vmem:[#allocation7 + $0xda4] ss:$16 sps:$4 sm:$0xff]   ;;  %v10328_v7 = vld [vmem:[#allocation7 + $0xdac] ss:$16 sps:$4 sm:$0xff]  }
 0x3b5   :  { %3056 = vmatpush1.bf16.msra.mxu0 %v10233_v8  ;;  %3142 = vmatpush1.bf16.msra.mxu1 %v10236_v55  ;;  %v10323_v8 = vld [vmem:[#allocation7 + $0xda0] ss:$16 sps:$4 sm:$0xff]   ;;  %v10326_v55 = vld [vmem:[#allocation7 + $0xda8] ss:$16 sps:$4 sm:$0xff]  }
 0x3b6   :  { %3057 = vmatprep.subr.bf16.mxu0 %v10241_v10  ;;  %3143 = vmatprep.subr.bf16.mxu1 %v10244_v11  ;;  %v10331_v10 = vld [vmem:[#allocation7 + $0xdc4] ss:$16 sps:$4 sm:$0xff]   ;;  %v10334_v11 = vld [vmem:[#allocation7 + $0xdcc] ss:$16 sps:$4 sm:$0xff]  }
 0x3b9   :  { %3058 = vmatpush1.bf16.msra.mxu0 %v10239_v12  ;;  %3144 = vmatpush1.bf16.msra.mxu1 %v10242_v13  ;;  %v10329_v12 = vld [vmem:[#allocation7 + $0xdc0] ss:$16 sps:$4 sm:$0xff]   ;;  %v10332_v13 = vld [vmem:[#allocation7 + $0xdc8] ss:$16 sps:$4 sm:$0xff]  }
 0x3ba   :  { %3960 = vmatprep.subr.bf16.mxu0 %v10247_v14  ;;  %4046 = vmatprep.subr.bf16.mxu1 %v10250_v15  ;;  %v10337_v14 = vld [vmem:[#allocation7 + $0xde4] ss:$16 sps:$4 sm:$0xff]   ;;  %v10340_v15 = vld [vmem:[#allocation7 + $0xdec] ss:$16 sps:$4 sm:$0xff]  }
 0x3bc   :  { %3060 = vmatmul.mubr.bf16.vlgmr.msra.gmra.mrb[12].mxu0 %v11542_v9  ;;  %3146 = vmatmul.mubr.bf16.vlgmr.msra.gmra.mrb[12].mxu1 %v11542_v9  ;;  %v10266_v9 = vld [vmem:[#allocation7 + $0xc68] ss:$16 sps:$4 sm:$0xff]  }
 0x3bd   :  { %3961 = vmatpush1.bf16.msra.mxu0 %v10245_v16  ;;  %4047 = vmatpush1.bf16.msra.mxu1 %v10248_v21  ;;  %v10335_v16 = vld [vmem:[#allocation7 + $0xde0] ss:$16 sps:$4 sm:$0xff]   ;;  %v10338_v21 = vld [vmem:[#allocation7 + $0xde8] ss:$16 sps:$4 sm:$0xff]  }
 0x3be   :  { %3962 = vmatprep.subr.bf16.mxu0 %v10253_v22  ;;  %4048 = vmatprep.subr.bf16.mxu1 %v10256_v23  ;;  %v10343_v22 = vld [vmem:[#allocation7 + $0xe04] ss:$16 sps:$4 sm:$0xff]   ;;  %v10346_v23 = vld [vmem:[#allocation7 + $0xe0c] ss:$16 sps:$4 sm:$0xff]  }
 0x3c1   :  { %3963 = vmatpush1.bf16.msra.mxu0 %v10251_v24  ;;  %4049 = vmatpush1.bf16.msra.mxu1 %v10254_v25  ;;  %v2318_v24 = vld [vmem:[#allocation8 + $0x8] sm:$0xf] }
 0x3c2   :  { %3964 = vmatprep.subr.bf16.mxu0 %v10259_v26  ;;  %4050 = vmatprep.subr.bf16.mxu1 %v10262_v27  ;;  %v2327_v25 = vrot.slane %v2318_v24, %v11514_v17  ;;  %v2335_v26 = vrot.slane %v2318_v24, %v11518_v19  ;;  %v2331_v27 = vrot.slane %v2318_v24, %v11516_v18 }
 0x3c5   :  { %3965 = vmatpush1.bf16.msra.mxu0 %v10257_v28  ;;  %4051 = vmatpush1.bf16.msra.mxu1 %v10260_v29  ;;  %v2339_v28 = vrot.slane %v2318_v24, %v11520_v20  ;;  %v10388_v24 = vld [vmem:[#allocation7 + $0xeec] ss:$16 sps:$4 sm:$0xff]  }
 0x3c6   :  { %3966 = vmatprep.subr.bf16.mxu0 %v10265_v30  ;;  %4052 = vmatprep.subr.bf16.mxu1 %v10268_v32 }
 0x3c9   :  { %3967 = vmatpush1.bf16.msra.mxu0 %v10263_v33  ;;  %4053 = vmatpush1.bf16.msra.mxu1 %v10266_v9 }
 0x3ca   :  { %3968 = vmatprep.subr.bf16.mxu0 %v10271_v34  ;;  %4054 = vmatprep.subr.bf16.mxu1 %v10274_v35 }
 0x3cd   :  { %3969 = vmatpush1.bf16.msra.mxu0 %v10269_v36  ;;  %4055 = vmatpush1.bf16.msra.mxu1 %v10272_v37 }
 0x3ce   :  { %3970 = vmatprep.subr.bf16.mxu0 %v10277_v38  ;;  %4056 = vmatprep.subr.bf16.mxu1 %v10280_v39 }
 0x3d1   :  { %3971 = vmatpush1.bf16.msra.mxu0 %v10275_v40  ;;  %4057 = vmatpush1.bf16.msra.mxu1 %v10278_v41 }
 0x3d2   :  { %3972 = vmatprep.subr.bf16.mxu0 %v10283_v42  ;;  %4058 = vmatprep.subr.bf16.mxu1 %v10286_v43 }
 0x3d5   :  { %3973 = vmatpush1.bf16.msra.mxu0 %v10281_v44  ;;  %4059 = vmatpush1.bf16.msra.mxu1 %v10284_v45 }
 0x3d6   :  { %3974 = vmatprep.subr.bf16.mxu0 %v10289_v46  ;;  %4060 = vmatprep.subr.bf16.mxu1 %v10292_v47 }
 0x3d9   :  { %3975 = vmatpush1.bf16.msra.mxu0 %v10287_v48  ;;  %4061 = vmatpush1.bf16.msra.mxu1 %v10290_v49 }
 0x3da   :  { %3976 = vmatprep.subr.bf16.mxu0 %v10295_v50  ;;  %4062 = vmatprep.subr.bf16.mxu1 %v10298_v51 }
 0x3dd   :  { %3977 = vmatpush1.bf16.msra.mxu0 %v10293_v31  ;;  %4063 = vmatpush1.bf16.msra.mxu1 %v10296_v52 }
 0x3de   :  { %3978 = vmatprep.subr.bf16.mxu0 %v10301_v53  ;;  %4064 = vmatprep.subr.bf16.mxu1 %v10304_v54 }
 0x3e1   :  { %3979 = vmatpush1.bf16.msra.mxu0 %v10299_v56  ;;  %4065 = vmatpush1.bf16.msra.mxu1 %v10302_v57  ;;  %v10341_v57 = vld [vmem:[#allocation7 + $0xe00] ss:$16 sps:$4 sm:$0xff]  }
 0x3e2   :  { %3980 = vmatprep.subr.bf16.mxu0 %v10307_v58  ;;  %4066 = vmatprep.subr.bf16.mxu1 %v10310_v59  ;;  %v10344_v58 = vld [vmem:[#allocation7 + $0xe08] ss:$16 sps:$4 sm:$0xff]   ;;  %v10349_v59 = vld [vmem:[#allocation7 + $0xe24] ss:$16 sps:$4 sm:$0xff]  }
 0x3e5   :  { %3981 = vmatpush1.bf16.msra.mxu0 %v10305_v60  ;;  %4067 = vmatpush1.bf16.msra.mxu1 %v10308_v61  ;;  %v10352_v60 = vld [vmem:[#allocation7 + $0xe2c] ss:$16 sps:$4 sm:$0xff]   ;;  %v10347_v61 = vld [vmem:[#allocation7 + $0xe20] ss:$16 sps:$4 sm:$0xff]  }
 0x3e6   :  { %3982 = vmatprep.subr.bf16.mxu0 %v10313_v62  ;;  %4068 = vmatprep.subr.bf16.mxu1 %v10316_v63  ;;  %v10350_v62 = vld [vmem:[#allocation7 + $0xe28] ss:$16 sps:$4 sm:$0xff]   ;;  %v10355_v63 = vld [vmem:[#allocation7 + $0xe44] ss:$16 sps:$4 sm:$0xff]  }
 0x3e9   :  { %3983 = vmatpush1.bf16.msra.mxu0 %v10311_v0  ;;  %4069 = vmatpush1.bf16.msra.mxu1 %v10314_v1  ;;  %v10358_v0 = vld [vmem:[#allocation7 + $0xe4c] ss:$16 sps:$4 sm:$0xff]   ;;  %v10353_v1 = vld [vmem:[#allocation7 + $0xe40] ss:$16 sps:$4 sm:$0xff]  }
 0x3ea   :  { %3984 = vmatprep.subr.bf16.mxu0 %v10319_v2  ;;  %4070 = vmatprep.subr.bf16.mxu1 %v10322_v3  ;;  %v10356_v2 = vld [vmem:[#allocation7 + $0xe48] ss:$16 sps:$4 sm:$0xff]   ;;  %v10361_v3 = vld [vmem:[#allocation7 + $0xe64] ss:$16 sps:$4 sm:$0xff]  }
 0x3ed   :  { %3985 = vmatpush1.bf16.msra.mxu0 %v10317_v4  ;;  %4071 = vmatpush1.bf16.msra.mxu1 %v10320_v5  ;;  %v10364_v4 = vld [vmem:[#allocation7 + $0xe6c] ss:$16 sps:$4 sm:$0xff]   ;;  %v10359_v5 = vld [vmem:[#allocation7 + $0xe60] ss:$16 sps:$4 sm:$0xff]  }
 0x3ee   :  { %3986 = vmatprep.subr.bf16.mxu0 %v10325_v6  ;;  %4072 = vmatprep.subr.bf16.mxu1 %v10328_v7  ;;  %v10362_v6 = vld [vmem:[#allocation7 + $0xe68] ss:$16 sps:$4 sm:$0xff]   ;;  %v10367_v7 = vld [vmem:[#allocation7 + $0xe84] ss:$16 sps:$4 sm:$0xff]  }
 0x3f1   :  { %3987 = vmatpush1.bf16.msra.mxu0 %v10323_v8  ;;  %4073 = vmatpush1.bf16.msra.mxu1 %v10326_v55  ;;  %v10370_v8 = vld [vmem:[#allocation7 + $0xe8c] ss:$16 sps:$4 sm:$0xff]   ;;  %v10365_v55 = vld [vmem:[#allocation7 + $0xe80] ss:$16 sps:$4 sm:$0xff]  }
 0x3f2   :  { %3988 = vmatprep.subr.bf16.mxu0 %v10331_v10  ;;  %4074 = vmatprep.subr.bf16.mxu1 %v10334_v11  ;;  %v10368_v10 = vld [vmem:[#allocation7 + $0xe88] ss:$16 sps:$4 sm:$0xff]   ;;  %v10373_v11 = vld [vmem:[#allocation7 + $0xea4] ss:$16 sps:$4 sm:$0xff]  }
 0x3f5   :  { %3989 = vmatpush1.bf16.msra.mxu0 %v10329_v12  ;;  %4075 = vmatpush1.bf16.msra.mxu1 %v10332_v13  ;;  %v10376_v12 = vld [vmem:[#allocation7 + $0xeac] ss:$16 sps:$4 sm:$0xff]   ;;  %v10371_v13 = vld [vmem:[#allocation7 + $0xea0] ss:$16 sps:$4 sm:$0xff]  }
 0x3f6   :  { %3990 = vmatprep.subr.bf16.mxu0 %v10337_v14  ;;  %4076 = vmatprep.subr.bf16.mxu1 %v10340_v15  ;;  %v10374_v14 = vld [vmem:[#allocation7 + $0xea8] ss:$16 sps:$4 sm:$0xff]   ;;  %v10379_v15 = vld [vmem:[#allocation7 + $0xec4] ss:$16 sps:$4 sm:$0xff]  }
 0x3f9   :  { %3991 = vmatpush1.bf16.msra.mxu0 %v10335_v16  ;;  %4077 = vmatpush1.bf16.msra.mxu1 %v10338_v21  ;;  %v10382_v16 = vld [vmem:[#allocation7 + $0xecc] ss:$16 sps:$4 sm:$0xff]   ;;  %v10377_v21 = vld [vmem:[#allocation7 + $0xec0] ss:$16 sps:$4 sm:$0xff]  }
 0x3fa   :  { %4003 = vmatprep.subr.bf16.mxu0 %v10343_v22  ;;  %4089 = vmatprep.subr.bf16.mxu1 %v10346_v23  ;;  %v10380_v22 = vld [vmem:[#allocation7 + $0xec8] ss:$16 sps:$4 sm:$0xff]   ;;  %v10385_v23 = vld [vmem:[#allocation7 + $0xee4] ss:$16 sps:$4 sm:$0xff]  }
 0x48f   :  { %v3061_v29 = vpop.f32.mrb[12].mxu0  ;;  %v3147_v30 = vpop.f32.mrb[12].mxu1 }
 0x490   :  { %v9540_v32 = vadd.f32 %v3061_v29, %v2327_v25  ;;  %v9544_v33 = vadd.f32 %v3147_v30, %v2335_v26  ;;  %v3063_v9 = vpop.f32.mrb[13].mxu0  ;;  %v3149_v34 = vpop.f32.mrb[13].mxu1  ;;  %v10389_v29 = vld [vmem:[#allocation7 + $0xf00] ss:$16 sps:$4 sm:$0xff]   ;;  %v10392_v30 = vld [vmem:[#allocation7 + $0xf08] ss:$16 sps:$4 sm:$0xff]  }
 0x491   :  { %v9541_v35 = vadd.f32 %v3063_v9, %v2331_v27  ;;  %v9545_v36 = vadd.f32 %v3149_v34, %v2339_v28  ;;  %v3065_v37 = vpop.f32.mrb[14].mxu0  ;;  %v3151_v38 = vpop.f32.mrb[14].mxu1  ;;  %v10395_v9 = vld [vmem:[#allocation7 + $0xf20] ss:$16 sps:$4 sm:$0xff]   ;;  %v10398_v34 = vld [vmem:[#allocation7 + $0xf28] ss:$16 sps:$4 sm:$0xff]  }
 0x492   :  { %v9542_v39 = vadd.f32 %v3065_v37, %v2327_v25  ;;  %v9546_v40 = vadd.f32 %v3151_v38, %v2335_v26  ;;  %v3067_v41 = vpop.f32.mrb[15].mxu0  ;;  %v3153_v42 = vpop.f32.mrb[15].mxu1  ;;  %v3156_v45 = vmax.f32 %v9540_v32, 0.0  ;;  %v3158_v46 = vmax.f32 %v9544_v33, 0.0  ;;  %v10383_v25 = vld [vmem:[#allocation7 + $0xee0] ss:$16 sps:$4 sm:$0xff]  }
 0x493   :  { %v9543_v43 = vadd.f32 %v3067_v41, %v2331_v27  ;;  %v9547_v44 = vadd.f32 %v3153_v42, %v2339_v28  ;;  %v3157_v49 = vmax.f32 %v9541_v35, 0.0  ;;  %v3159_v50 = vmax.f32 %v9545_v36, 0.0  ;;  %v10386_v26 = vld [vmem:[#allocation7 + $0xee8] ss:$16 sps:$4 sm:$0xff]   ;;  %v10391_v27 = vld [vmem:[#allocation7 + $0xf04] ss:$16 sps:$4 sm:$0xff]  }
 0x494   :  { %v3160_v47 = vmax.f32 %v9542_v39, 0.0  ;;  %v3162_v48 = vmax.f32 %v9546_v40, 0.0  ;;  %v10394_v28 = vld [vmem:[#allocation7 + $0xf0c] ss:$16 sps:$4 sm:$0xff]   ;;  %v10397_v32 = vld [vmem:[#allocation7 + $0xf24] ss:$16 sps:$4 sm:$0xff]  }
 0x495   :  { %v3161_v51 = vmax.f32 %v9543_v43, 0.0  ;;  %v3163_v31 = vmax.f32 %v9547_v44, 0.0  ;;  %v10400_v33 = vld [vmem:[#allocation7 + $0xf2c] ss:$16 sps:$4 sm:$0xff]   ;;  %v10403_v35 = vld [vmem:[#allocation7 + $0xf44] ss:$16 sps:$4 sm:$0xff]  }
 0x496   :  { %v3295_v52 = vpack.c.bf16 %v3160_v47, %v3156_v45  ;;  %v11550_v53 = vpack.c.bf16 %v3162_v48, %v3158_v46  ;;  %v10406_v36 = vld [vmem:[#allocation7 + $0xf4c] ss:$16 sps:$4 sm:$0xff]   ;;  %v10401_v37 = vld [vmem:[#allocation7 + $0xf40] ss:$16 sps:$4 sm:$0xff]   ;;  %v10404_v38 = vld [vmem:[#allocation7 + $0xf48] ss:$16 sps:$4 sm:$0xff]  }
 0x497   :  { %v3296_v54 = vpack.c.bf16 %v3161_v51, %v3157_v49  ;;  %v3298_v56 = vpack.c.bf16 %v3163_v31, %v3159_v50  ;;  %v10409_v39 = vld [vmem:[#allocation7 + $0xf64] ss:$16 sps:$4 sm:$0xff]   ;;  %v10412_v40 = vld [vmem:[#allocation7 + $0xf6c] ss:$16 sps:$4 sm:$0xff]   ;;  %v10407_v41 = vld [vmem:[#allocation7 + $0xf60] ss:$16 sps:$4 sm:$0xff]  }
 0x498   :  { %v10410_v42 = vld [vmem:[#allocation7 + $0xf68] ss:$16 sps:$4 sm:$0xff]   ;;  %v10415_v43 = vld [vmem:[#allocation7 + $0xf84] ss:$16 sps:$4 sm:$0xff]   ;;  %v10418_v44 = vld [vmem:[#allocation7 + $0xf8c] ss:$16 sps:$4 sm:$0xff]  }
 0x499   :  { %3992 = vmatprep.mubr.bf16.mxu0 %v3296_v54  ;;  %4078 = vmatprep.mubr.bf16.mxu1 %v3296_v54  ;;  %v10413_v45 = vld [vmem:[#allocation7 + $0xf80] ss:$16 sps:$4 sm:$0xff]   ;;  %v10416_v46 = vld [vmem:[#allocation7 + $0xf88] ss:$16 sps:$4 sm:$0xff]   ;;  %v10421_v47 = vld [vmem:[#allocation7 + $0xfa4] ss:$16 sps:$4 sm:$0xff]  }
 0x49a   :  { %3993 = vmatmul.mubr.bf16.vlgmr.msra.gmra.mrb[16].mxu0 %v3295_v52  ;;  %4079 = vmatmul.mubr.bf16.vlgmr.msra.gmra.mrb[16].mxu1 %v3295_v52  ;;  %v10424_v48 = vld [vmem:[#allocation7 + $0xfac] ss:$16 sps:$4 sm:$0xff]   ;;  %v10419_v49 = vld [vmem:[#allocation7 + $0xfa0] ss:$16 sps:$4 sm:$0xff]   ;;  %v10422_v50 = vld [vmem:[#allocation7 + $0xfa8] ss:$16 sps:$4 sm:$0xff]  }
 0x49b   :  { %4004 = vmatpush1.bf16.msra.mxu0 %v10341_v57  ;;  %4090 = vmatpush1.bf16.msra.mxu1 %v10344_v58  ;;  %v10427_v51 = vld [vmem:[#allocation7 + $0xfc4] ss:$16 sps:$4 sm:$0xff]   ;;  %v10430_v31 = vld [vmem:[#allocation7 + $0xfcc] ss:$16 sps:$4 sm:$0xff]   ;;  %v10425_v52 = vld [vmem:[#allocation7 + $0xfc0] ss:$16 sps:$4 sm:$0xff]  }
 0x49c   :  { %4035 = vmatprep.mubr.bf16.mxu0 %v3298_v56  ;;  %4121 = vmatprep.mubr.bf16.mxu1 %v3298_v56  ;;  %v10428_v54 = vld [vmem:[#allocation7 + $0xfc8] ss:$16 sps:$4 sm:$0xff]   ;;  %v10433_v56 = vld [vmem:[#allocation7 + $0xfe4] ss:$16 sps:$4 sm:$0xff]   ;;  %v10436_v57 = vld [vmem:[#allocation7 + $0xfec] ss:$16 sps:$4 sm:$0xff]  }
 0x49d   :  { %4005 = vmatprep.subr.bf16.mxu0 %v10349_v59  ;;  %4091 = vmatprep.subr.bf16.mxu1 %v10352_v60  ;;  %v10431_v58 = vld [vmem:[#allocation7 + $0xfe0] ss:$16 sps:$4 sm:$0xff]   ;;  %v10434_v59 = vld [vmem:[#allocation7 + $0xfe8] ss:$16 sps:$4 sm:$0xff]   ;;  %v10439_v60 = vld [vmem:[#allocation7 + $0x1004] ss:$16 sps:$4 sm:$0xff]  }
 0x49f   :  { %4006 = vmatpush1.bf16.msra.mxu0 %v10347_v61  ;;  %4092 = vmatpush1.bf16.msra.mxu1 %v10350_v62  ;;  %v10442_v61 = vld [vmem:[#allocation7 + $0x100c] ss:$16 sps:$4 sm:$0xff]   ;;  %v10437_v62 = vld [vmem:[#allocation7 + $0x1000] ss:$16 sps:$4 sm:$0xff]  }
 0x4a0   :  { %4007 = vmatprep.subr.bf16.mxu0 %v10355_v63  ;;  %4093 = vmatprep.subr.bf16.mxu1 %v10358_v0  ;;  %v10440_v63 = vld [vmem:[#allocation7 + $0x1008] ss:$16 sps:$4 sm:$0xff]   ;;  %v10445_v0 = vld [vmem:[#allocation7 + $0x1024] ss:$16 sps:$4 sm:$0xff]  }
 0x4a3   :  { %4008 = vmatpush1.bf16.msra.mxu0 %v10353_v1  ;;  %4094 = vmatpush1.bf16.msra.mxu1 %v10356_v2  ;;  %v10448_v1 = vld [vmem:[#allocation7 + $0x102c] ss:$16 sps:$4 sm:$0xff]   ;;  %v10443_v2 = vld [vmem:[#allocation7 + $0x1020] ss:$16 sps:$4 sm:$0xff]  }
 0x4a4   :  { %4009 = vmatprep.subr.bf16.mxu0 %v10361_v3  ;;  %4095 = vmatprep.subr.bf16.mxu1 %v10364_v4  ;;  %v10446_v3 = vld [vmem:[#allocation7 + $0x1028] ss:$16 sps:$4 sm:$0xff]   ;;  %v10451_v4 = vld [vmem:[#allocation7 + $0x1044] ss:$16 sps:$4 sm:$0xff]  }
 0x4a7   :  { %4010 = vmatpush1.bf16.msra.mxu0 %v10359_v5  ;;  %4096 = vmatpush1.bf16.msra.mxu1 %v10362_v6  ;;  %v10454_v5 = vld [vmem:[#allocation7 + $0x104c] ss:$16 sps:$4 sm:$0xff]   ;;  %v10449_v6 = vld [vmem:[#allocation7 + $0x1040] ss:$16 sps:$4 sm:$0xff]  }
 0x4a8   :  { %4011 = vmatprep.subr.bf16.mxu0 %v10367_v7  ;;  %4097 = vmatprep.subr.bf16.mxu1 %v10370_v8  ;;  %v10452_v7 = vld [vmem:[#allocation7 + $0x1048] ss:$16 sps:$4 sm:$0xff]   ;;  %v10457_v8 = vld [vmem:[#allocation7 + $0x1064] ss:$16 sps:$4 sm:$0xff]  }
 0x4ab   :  { %4012 = vmatpush1.bf16.msra.mxu0 %v10365_v55  ;;  %4098 = vmatpush1.bf16.msra.mxu1 %v10368_v10  ;;  %v10460_v55 = vld [vmem:[#allocation7 + $0x106c] ss:$16 sps:$4 sm:$0xff]   ;;  %v10455_v10 = vld [vmem:[#allocation7 + $0x1060] ss:$16 sps:$4 sm:$0xff]  }
 0x4ac   :  { %4013 = vmatprep.subr.bf16.mxu0 %v10373_v11  ;;  %4099 = vmatprep.subr.bf16.mxu1 %v10376_v12  ;;  %v10463_v11 = vld [vmem:[#allocation7 + $0x1084] ss:$16 sps:$4 sm:$0xff]   ;;  %v10466_v12 = vld [vmem:[#allocation7 + $0x108c] ss:$16 sps:$4 sm:$0xff]  }
 0x4af   :  { %4014 = vmatpush1.bf16.msra.mxu0 %v10371_v13  ;;  %4100 = vmatpush1.bf16.msra.mxu1 %v10374_v14  ;;  %v10461_v13 = vld [vmem:[#allocation7 + $0x1080] ss:$16 sps:$4 sm:$0xff]   ;;  %v10464_v14 = vld [vmem:[#allocation7 + $0x1088] ss:$16 sps:$4 sm:$0xff]  }
 0x4b0   :  { %4015 = vmatprep.subr.bf16.mxu0 %v10379_v15  ;;  %4101 = vmatprep.subr.bf16.mxu1 %v10382_v16  ;;  %v10469_v15 = vld [vmem:[#allocation7 + $0x10a4] ss:$16 sps:$4 sm:$0xff]   ;;  %v10472_v16 = vld [vmem:[#allocation7 + $0x10ac] ss:$16 sps:$4 sm:$0xff]  }
 0x4b3   :  { %4016 = vmatpush1.bf16.msra.mxu0 %v10377_v21  ;;  %4102 = vmatpush1.bf16.msra.mxu1 %v10380_v22  ;;  %v10467_v21 = vld [vmem:[#allocation7 + $0x10a0] ss:$16 sps:$4 sm:$0xff]   ;;  %v10470_v22 = vld [vmem:[#allocation7 + $0x10a8] ss:$16 sps:$4 sm:$0xff]  }
 0x4b4   :  { %4017 = vmatprep.subr.bf16.mxu0 %v10385_v23  ;;  %4103 = vmatprep.subr.bf16.mxu1 %v10388_v24  ;;  %v10475_v23 = vld [vmem:[#allocation7 + $0x10c4] ss:$16 sps:$4 sm:$0xff]   ;;  %v10478_v24 = vld [vmem:[#allocation7 + $0x10cc] ss:$16 sps:$4 sm:$0xff]  }
 0x4b7   :  { %4018 = vmatpush1.bf16.msra.mxu0 %v10383_v25  ;;  %4104 = vmatpush1.bf16.msra.mxu1 %v10386_v26  ;;  %v10473_v25 = vld [vmem:[#allocation7 + $0x10c0] ss:$16 sps:$4 sm:$0xff]   ;;  %v10476_v26 = vld [vmem:[#allocation7 + $0x10c8] ss:$16 sps:$4 sm:$0xff]  }
 0x4b8   :  { %4019 = vmatprep.subr.bf16.mxu0 %v10391_v27  ;;  %4105 = vmatprep.subr.bf16.mxu1 %v10394_v28  ;;  %v10481_v27 = vld [vmem:[#allocation7 + $0x10e4] ss:$16 sps:$4 sm:$0xff]   ;;  %v10484_v28 = vld [vmem:[#allocation7 + $0x10ec] ss:$16 sps:$4 sm:$0xff]  }
 0x4bb   :  { %4020 = vmatpush1.bf16.msra.mxu0 %v10389_v29  ;;  %4106 = vmatpush1.bf16.msra.mxu1 %v10392_v30  ;;  %v10479_v29 = vld [vmem:[#allocation7 + $0x10e0] ss:$16 sps:$4 sm:$0xff]   ;;  %v10482_v30 = vld [vmem:[#allocation7 + $0x10e8] ss:$16 sps:$4 sm:$0xff]  }
 0x4bc   :  { %4021 = vmatprep.subr.bf16.mxu0 %v10397_v32  ;;  %4107 = vmatprep.subr.bf16.mxu1 %v10400_v33  ;;  %v10487_v32 = vld [vmem:[#allocation7 + $0x1104] ss:$16 sps:$4 sm:$0xff]   ;;  %v10490_v33 = vld [vmem:[#allocation7 + $0x110c] ss:$16 sps:$4 sm:$0xff]  }
 0x4bf   :  { %4022 = vmatpush1.bf16.msra.mxu0 %v10395_v9  ;;  %4108 = vmatpush1.bf16.msra.mxu1 %v10398_v34  ;;  %v10485_v9 = vld [vmem:[#allocation7 + $0x1100] ss:$16 sps:$4 sm:$0xff]   ;;  %v10488_v34 = vld [vmem:[#allocation7 + $0x1108] ss:$16 sps:$4 sm:$0xff]  }
 0x4c0   :  { %4023 = vmatprep.subr.bf16.mxu0 %v10403_v35  ;;  %4109 = vmatprep.subr.bf16.mxu1 %v10406_v36  ;;  %v10493_v35 = vld [vmem:[#allocation7 + $0x1124] ss:$16 sps:$4 sm:$0xff]   ;;  %v10496_v36 = vld [vmem:[#allocation7 + $0x112c] ss:$16 sps:$4 sm:$0xff]  }
 0x4c3   :  { %4024 = vmatpush1.bf16.msra.mxu0 %v10401_v37  ;;  %4110 = vmatpush1.bf16.msra.mxu1 %v10404_v38  ;;  %v10491_v37 = vld [vmem:[#allocation7 + $0x1120] ss:$16 sps:$4 sm:$0xff]   ;;  %v10494_v38 = vld [vmem:[#allocation7 + $0x1128] ss:$16 sps:$4 sm:$0xff]  }
 0x4c4   :  { %4025 = vmatprep.subr.bf16.mxu0 %v10409_v39  ;;  %4111 = vmatprep.subr.bf16.mxu1 %v10412_v40  ;;  %v10499_v39 = vld [vmem:[#allocation7 + $0x1144] ss:$16 sps:$4 sm:$0xff]   ;;  %v10502_v40 = vld [vmem:[#allocation7 + $0x114c] ss:$16 sps:$4 sm:$0xff]  }
 0x4c7   :  { %4026 = vmatpush1.bf16.msra.mxu0 %v10407_v41  ;;  %4112 = vmatpush1.bf16.msra.mxu1 %v10410_v42  ;;  %v10497_v41 = vld [vmem:[#allocation7 + $0x1140] ss:$16 sps:$4 sm:$0xff]   ;;  %v10500_v42 = vld [vmem:[#allocation7 + $0x1148] ss:$16 sps:$4 sm:$0xff]  }
 0x4c8   :  { %4027 = vmatprep.subr.bf16.mxu0 %v10415_v43  ;;  %4113 = vmatprep.subr.bf16.mxu1 %v10418_v44  ;;  %v10505_v43 = vld [vmem:[#allocation7 + $0x1164] ss:$16 sps:$4 sm:$0xff]   ;;  %v10508_v44 = vld [vmem:[#allocation7 + $0x116c] ss:$16 sps:$4 sm:$0xff]  }
 0x4cb   :  { %4028 = vmatpush1.bf16.msra.mxu0 %v10413_v45  ;;  %4114 = vmatpush1.bf16.msra.mxu1 %v10416_v46  ;;  %v10503_v45 = vld [vmem:[#allocation7 + $0x1160] ss:$16 sps:$4 sm:$0xff]   ;;  %v10506_v46 = vld [vmem:[#allocation7 + $0x1168] ss:$16 sps:$4 sm:$0xff]  }
 0x4cc   :  { %4029 = vmatprep.subr.bf16.mxu0 %v10421_v47  ;;  %4115 = vmatprep.subr.bf16.mxu1 %v10424_v48  ;;  %v10511_v47 = vld [vmem:[#allocation7 + $0x1184] ss:$16 sps:$4 sm:$0xff]   ;;  %v10514_v48 = vld [vmem:[#allocation7 + $0x118c] ss:$16 sps:$4 sm:$0xff]  }
 0x4cf   :  { %4030 = vmatpush1.bf16.msra.mxu0 %v10419_v49  ;;  %4116 = vmatpush1.bf16.msra.mxu1 %v10422_v50  ;;  %v10509_v49 = vld [vmem:[#allocation7 + $0x1180] ss:$16 sps:$4 sm:$0xff]   ;;  %v10512_v50 = vld [vmem:[#allocation7 + $0x1188] ss:$16 sps:$4 sm:$0xff]  }
 0x4d0   :  { %4031 = vmatprep.subr.bf16.mxu0 %v10427_v51  ;;  %4117 = vmatprep.subr.bf16.mxu1 %v10430_v31  ;;  %v10517_v51 = vld [vmem:[#allocation7 + $0x11a4] ss:$16 sps:$4 sm:$0xff]   ;;  %v10520_v31 = vld [vmem:[#allocation7 + $0x11ac] ss:$16 sps:$4 sm:$0xff]  }
 0x4d3   :  { %4032 = vmatpush1.bf16.msra.mxu0 %v10425_v52  ;;  %4118 = vmatpush1.bf16.msra.mxu1 %v10428_v54  ;;  %v10515_v52 = vld [vmem:[#allocation7 + $0x11a0] ss:$16 sps:$4 sm:$0xff]   ;;  %v10518_v54 = vld [vmem:[#allocation7 + $0x11a8] ss:$16 sps:$4 sm:$0xff]  }
 0x4d4   :  { %4033 = vmatprep.subr.bf16.mxu0 %v10433_v56  ;;  %4119 = vmatprep.subr.bf16.mxu1 %v10436_v57  ;;  %v10523_v56 = vld [vmem:[#allocation7 + $0x11c4] ss:$16 sps:$4 sm:$0xff]   ;;  %v10526_v57 = vld [vmem:[#allocation7 + $0x11cc] ss:$16 sps:$4 sm:$0xff]  }
 0x4d7   :  { %4034 = vmatpush1.bf16.msra.mxu0 %v10431_v58  ;;  %4120 = vmatpush1.bf16.msra.mxu1 %v10434_v59  ;;  %v10521_v58 = vld [vmem:[#allocation7 + $0x11c0] ss:$16 sps:$4 sm:$0xff]   ;;  %v10524_v59 = vld [vmem:[#allocation7 + $0x11c8] ss:$16 sps:$4 sm:$0xff]  }
 0x4d8   :  { %4936 = vmatprep.subr.bf16.mxu0 %v10439_v60  ;;  %5022 = vmatprep.subr.bf16.mxu1 %v10442_v61  ;;  %v10529_v60 = vld [vmem:[#allocation7 + $0x11e4] ss:$16 sps:$4 sm:$0xff]   ;;  %v10532_v61 = vld [vmem:[#allocation7 + $0x11ec] ss:$16 sps:$4 sm:$0xff]  }
 0x4da   :  { %4036 = vmatmul.mubr.bf16.vlgmr.msra.gmra.mrb[16].mxu0 %v11550_v53  ;;  %4122 = vmatmul.mubr.bf16.vlgmr.msra.gmra.mrb[16].mxu1 %v11550_v53  ;;  %v10458_v53 = vld [vmem:[#allocation7 + $0x1068] ss:$16 sps:$4 sm:$0xff]  }
 0x4db   :  { %4937 = vmatpush1.bf16.msra.mxu0 %v10437_v62  ;;  %5023 = vmatpush1.bf16.msra.mxu1 %v10440_v63  ;;  %v10527_v62 = vld [vmem:[#allocation7 + $0x11e0] ss:$16 sps:$4 sm:$0xff]   ;;  %v10530_v63 = vld [vmem:[#allocation7 + $0x11e8] ss:$16 sps:$4 sm:$0xff]  }
 0x4dc   :  { %4938 = vmatprep.subr.bf16.mxu0 %v10445_v0  ;;  %5024 = vmatprep.subr.bf16.mxu1 %v10448_v1  ;;  %v10535_v0 = vld [vmem:[#allocation7 + $0x1204] ss:$16 sps:$4 sm:$0xff]   ;;  %v10538_v1 = vld [vmem:[#allocation7 + $0x120c] ss:$16 sps:$4 sm:$0xff]  }
 0x4df   :  { %4939 = vmatpush1.bf16.msra.mxu0 %v10443_v2  ;;  %5025 = vmatpush1.bf16.msra.mxu1 %v10446_v3  ;;  %v3294_v2 = vld [vmem:[#allocation8 + $0xc] sm:$0xf] }
 0x4e0   :  { %4940 = vmatprep.subr.bf16.mxu0 %v10451_v4  ;;  %5026 = vmatprep.subr.bf16.mxu1 %v10454_v5  ;;  %v3303_v3 = vrot.slane %v3294_v2, %v11514_v17  ;;  %v3311_v4 = vrot.slane %v3294_v2, %v11518_v19  ;;  %v3307_v5 = vrot.slane %v3294_v2, %v11516_v18 }
 0x4e3   :  { %4941 = vmatpush1.bf16.msra.mxu0 %v10449_v6  ;;  %5027 = vmatpush1.bf16.msra.mxu1 %v10452_v7  ;;  %v3315_v6 = vrot.slane %v3294_v2, %v11520_v20  ;;  %v10580_v2 = vld [vmem:[#allocation7 + $0x12ec] ss:$16 sps:$4 sm:$0xff]  }
 0x4e4   :  { %4942 = vmatprep.subr.bf16.mxu0 %v10457_v8  ;;  %5028 = vmatprep.subr.bf16.mxu1 %v10460_v55 }
 0x4e7   :  { %4943 = vmatpush1.bf16.msra.mxu0 %v10455_v10  ;;  %5029 = vmatpush1.bf16.msra.mxu1 %v10458_v53 }
 0x4e8   :  { %4944 = vmatprep.subr.bf16.mxu0 %v10463_v11  ;;  %5030 = vmatprep.subr.bf16.mxu1 %v10466_v12 }
 0x4eb   :  { %4945 = vmatpush1.bf16.msra.mxu0 %v10461_v13  ;;  %5031 = vmatpush1.bf16.msra.mxu1 %v10464_v14 }
 0x4ec   :  { %4946 = vmatprep.subr.bf16.mxu0 %v10469_v15  ;;  %5032 = vmatprep.subr.bf16.mxu1 %v10472_v16 }
 0x4ef   :  { %4947 = vmatpush1.bf16.msra.mxu0 %v10467_v21  ;;  %5033 = vmatpush1.bf16.msra.mxu1 %v10470_v22 }
 0x4f0   :  { %4948 = vmatprep.subr.bf16.mxu0 %v10475_v23  ;;  %5034 = vmatprep.subr.bf16.mxu1 %v10478_v24 }
 0x4f3   :  { %4949 = vmatpush1.bf16.msra.mxu0 %v10473_v25  ;;  %5035 = vmatpush1.bf16.msra.mxu1 %v10476_v26 }
 0x4f4   :  { %4950 = vmatprep.subr.bf16.mxu0 %v10481_v27  ;;  %5036 = vmatprep.subr.bf16.mxu1 %v10484_v28 }
 0x4f7   :  { %4951 = vmatpush1.bf16.msra.mxu0 %v10479_v29  ;;  %5037 = vmatpush1.bf16.msra.mxu1 %v10482_v30 }
 0x4f8   :  { %4952 = vmatprep.subr.bf16.mxu0 %v10487_v32  ;;  %5038 = vmatprep.subr.bf16.mxu1 %v10490_v33 }
 0x4fb   :  { %4953 = vmatpush1.bf16.msra.mxu0 %v10485_v9  ;;  %5039 = vmatpush1.bf16.msra.mxu1 %v10488_v34 }
 0x4fc   :  { %4954 = vmatprep.subr.bf16.mxu0 %v10493_v35  ;;  %5040 = vmatprep.subr.bf16.mxu1 %v10496_v36 }
 0x4ff   :  { %4955 = vmatpush1.bf16.msra.mxu0 %v10491_v37  ;;  %5041 = vmatpush1.bf16.msra.mxu1 %v10494_v38  ;;  %v10533_v38 = vld [vmem:[#allocation7 + $0x1200] ss:$16 sps:$4 sm:$0xff]  }
 0x500   :  { %4956 = vmatprep.subr.bf16.mxu0 %v10499_v39  ;;  %5042 = vmatprep.subr.bf16.mxu1 %v10502_v40  ;;  %v10536_v39 = vld [vmem:[#allocation7 + $0x1208] ss:$16 sps:$4 sm:$0xff]   ;;  %v10541_v40 = vld [vmem:[#allocation7 + $0x1224] ss:$16 sps:$4 sm:$0xff]  }
 0x503   :  { %4957 = vmatpush1.bf16.msra.mxu0 %v10497_v41  ;;  %5043 = vmatpush1.bf16.msra.mxu1 %v10500_v42  ;;  %v10544_v41 = vld [vmem:[#allocation7 + $0x122c] ss:$16 sps:$4 sm:$0xff]   ;;  %v10539_v42 = vld [vmem:[#allocation7 + $0x1220] ss:$16 sps:$4 sm:$0xff]  }
 0x504   :  { %4958 = vmatprep.subr.bf16.mxu0 %v10505_v43  ;;  %5044 = vmatprep.subr.bf16.mxu1 %v10508_v44  ;;  %v10542_v43 = vld [vmem:[#allocation7 + $0x1228] ss:$16 sps:$4 sm:$0xff]   ;;  %v10547_v44 = vld [vmem:[#allocation7 + $0x1244] ss:$16 sps:$4 sm:$0xff]  }
 0x507   :  { %4959 = vmatpush1.bf16.msra.mxu0 %v10503_v45  ;;  %5045 = vmatpush1.bf16.msra.mxu1 %v10506_v46  ;;  %v10550_v45 = vld [vmem:[#allocation7 + $0x124c] ss:$16 sps:$4 sm:$0xff]   ;;  %v10545_v46 = vld [vmem:[#allocation7 + $0x1240] ss:$16 sps:$4 sm:$0xff]  }
 0x508   :  { %4960 = vmatprep.subr.bf16.mxu0 %v10511_v47  ;;  %5046 = vmatprep.subr.bf16.mxu1 %v10514_v48  ;;  %v10548_v47 = vld [vmem:[#allocation7 + $0x1248] ss:$16 sps:$4 sm:$0xff]   ;;  %v10553_v48 = vld [vmem:[#allocation7 + $0x1264] ss:$16 sps:$4 sm:$0xff]  }
 0x50b   :  { %4961 = vmatpush1.bf16.msra.mxu0 %v10509_v49  ;;  %5047 = vmatpush1.bf16.msra.mxu1 %v10512_v50  ;;  %v10556_v49 = vld [vmem:[#allocation7 + $0x126c] ss:$16 sps:$4 sm:$0xff]   ;;  %v10551_v50 = vld [vmem:[#allocation7 + $0x1260] ss:$16 sps:$4 sm:$0xff]  }
 0x50c   :  { %4962 = vmatprep.subr.bf16.mxu0 %v10517_v51  ;;  %5048 = vmatprep.subr.bf16.mxu1 %v10520_v31  ;;  %v10554_v51 = vld [vmem:[#allocation7 + $0x1268] ss:$16 sps:$4 sm:$0xff]   ;;  %v10559_v31 = vld [vmem:[#allocation7 + $0x1284] ss:$16 sps:$4 sm:$0xff]  }
 0x50f   :  { %4963 = vmatpush1.bf16.msra.mxu0 %v10515_v52  ;;  %5049 = vmatpush1.bf16.msra.mxu1 %v10518_v54  ;;  %v10562_v52 = vld [vmem:[#allocation7 + $0x128c] ss:$16 sps:$4 sm:$0xff]   ;;  %v10557_v54 = vld [vmem:[#allocation7 + $0x1280] ss:$16 sps:$4 sm:$0xff]  }
 0x510   :  { %4964 = vmatprep.subr.bf16.mxu0 %v10523_v56  ;;  %5050 = vmatprep.subr.bf16.mxu1 %v10526_v57  ;;  %v10560_v56 = vld [vmem:[#allocation7 + $0x1288] ss:$16 sps:$4 sm:$0xff]   ;;  %v10565_v57 = vld [vmem:[#allocation7 + $0x12a4] ss:$16 sps:$4 sm:$0xff]  }
 0x513   :  { %4965 = vmatpush1.bf16.msra.mxu0 %v10521_v58  ;;  %5051 = vmatpush1.bf16.msra.mxu1 %v10524_v59  ;;  %v10568_v58 = vld [vmem:[#allocation7 + $0x12ac] ss:$16 sps:$4 sm:$0xff]   ;;  %v10563_v59 = vld [vmem:[#allocation7 + $0x12a0] ss:$16 sps:$4 sm:$0xff]  }
 0x514   :  { %4966 = vmatprep.subr.bf16.mxu0 %v10529_v60  ;;  %5052 = vmatprep.subr.bf16.mxu1 %v10532_v61  ;;  %v10566_v60 = vld [vmem:[#allocation7 + $0x12a8] ss:$16 sps:$4 sm:$0xff]   ;;  %v10571_v61 = vld [vmem:[#allocation7 + $0x12c4] ss:$16 sps:$4 sm:$0xff]  }
 0x517   :  { %4967 = vmatpush1.bf16.msra.mxu0 %v10527_v62  ;;  %5053 = vmatpush1.bf16.msra.mxu1 %v10530_v63  ;;  %v10574_v62 = vld [vmem:[#allocation7 + $0x12cc] ss:$16 sps:$4 sm:$0xff]   ;;  %v10569_v63 = vld [vmem:[#allocation7 + $0x12c0] ss:$16 sps:$4 sm:$0xff]  }
 0x518   :  { %4979 = vmatprep.subr.bf16.mxu0 %v10535_v0  ;;  %5065 = vmatprep.subr.bf16.mxu1 %v10538_v1  ;;  %v10572_v0 = vld [vmem:[#allocation7 + $0x12c8] ss:$16 sps:$4 sm:$0xff]   ;;  %v10577_v1 = vld [vmem:[#allocation7 + $0x12e4] ss:$16 sps:$4 sm:$0xff]  }
 0x5ad   :  { %v4037_v7 = vpop.f32.mrb[16].mxu0  ;;  %v4123_v8 = vpop.f32.mrb[16].mxu1 }
 0x5ae   :  { %v9548_v55 = vadd.f32 %v4037_v7, %v3303_v3  ;;  %v9552_v10 = vadd.f32 %v4123_v8, %v3311_v4  ;;  %v4039_v53 = vpop.f32.mrb[17].mxu0  ;;  %v4125_v11 = vpop.f32.mrb[17].mxu1  ;;  %v10581_v7 = vld [vmem:[#allocation7 + $0x1300] ss:$16 sps:$4 sm:$0xff]   ;;  %v10584_v8 = vld [vmem:[#allocation7 + $0x1308] ss:$16 sps:$4 sm:$0xff]  }
 0x5af   :  { %v9549_v12 = vadd.f32 %v4039_v53, %v3307_v5  ;;  %v9553_v13 = vadd.f32 %v4125_v11, %v3315_v6  ;;  %v4041_v14 = vpop.f32.mrb[18].mxu0  ;;  %v4127_v15 = vpop.f32.mrb[18].mxu1  ;;  %v10587_v53 = vld [vmem:[#allocation7 + $0x1320] ss:$16 sps:$4 sm:$0xff]   ;;  %v10590_v11 = vld [vmem:[#allocation7 + $0x1328] ss:$16 sps:$4 sm:$0xff]  }
 0x5b0   :  { %v9550_v16 = vadd.f32 %v4041_v14, %v3303_v3  ;;  %v9554_v21 = vadd.f32 %v4127_v15, %v3311_v4  ;;  %v4043_v22 = vpop.f32.mrb[19].mxu0  ;;  %v4129_v23 = vpop.f32.mrb[19].mxu1  ;;  %v4132_v26 = vmax.f32 %v9548_v55, 0.0  ;;  %v4134_v27 = vmax.f32 %v9552_v10, 0.0  ;;  %v10575_v3 = vld [vmem:[#allocation7 + $0x12e0] ss:$16 sps:$4 sm:$0xff]  }
 0x5b1   :  { %v9551_v24 = vadd.f32 %v4043_v22, %v3307_v5  ;;  %v9555_v25 = vadd.f32 %v4129_v23, %v3315_v6  ;;  %v4133_v30 = vmax.f32 %v9549_v12, 0.0  ;;  %v4135_v32 = vmax.f32 %v9553_v13, 0.0  ;;  %v10578_v4 = vld [vmem:[#allocation7 + $0x12e8] ss:$16 sps:$4 sm:$0xff]   ;;  %v10583_v5 = vld [vmem:[#allocation7 + $0x1304] ss:$16 sps:$4 sm:$0xff]  }
 0x5b2   :  { %v4136_v28 = vmax.f32 %v9550_v16, 0.0  ;;  %v4138_v29 = vmax.f32 %v9554_v21, 0.0  ;;  %v10586_v6 = vld [vmem:[#allocation7 + $0x130c] ss:$16 sps:$4 sm:$0xff]   ;;  %v10589_v55 = vld [vmem:[#allocation7 + $0x1324] ss:$16 sps:$4 sm:$0xff]  }
 0x5b3   :  { %v4137_v33 = vmax.f32 %v9551_v24, 0.0  ;;  %v4139_v9 = vmax.f32 %v9555_v25, 0.0  ;;  %v10592_v10 = vld [vmem:[#allocation7 + $0x132c] ss:$16 sps:$4 sm:$0xff]   ;;  %v10595_v12 = vld [vmem:[#allocation7 + $0x1344] ss:$16 sps:$4 sm:$0xff]  }
 0x5b4   :  { %v4271_v34 = vpack.c.bf16 %v4136_v28, %v4132_v26  ;;  %v11558_v35 = vpack.c.bf16 %v4138_v29, %v4134_v27  ;;  %v10598_v13 = vld [vmem:[#allocation7 + $0x134c] ss:$16 sps:$4 sm:$0xff]   ;;  %v10593_v14 = vld [vmem:[#allocation7 + $0x1340] ss:$16 sps:$4 sm:$0xff]   ;;  %v10596_v15 = vld [vmem:[#allocation7 + $0x1348] ss:$16 sps:$4 sm:$0xff]  }
 0x5b5   :  { %v4272_v36 = vpack.c.bf16 %v4137_v33, %v4133_v30  ;;  %v4274_v37 = vpack.c.bf16 %v4139_v9, %v4135_v32  ;;  %v10601_v16 = vld [vmem:[#allocation7 + $0x1364] ss:$16 sps:$4 sm:$0xff]   ;;  %v10604_v21 = vld [vmem:[#allocation7 + $0x136c] ss:$16 sps:$4 sm:$0xff]   ;;  %v10599_v22 = vld [vmem:[#allocation7 + $0x1360] ss:$16 sps:$4 sm:$0xff]  }
 0x5b6   :  { %v10602_v23 = vld [vmem:[#allocation7 + $0x1368] ss:$16 sps:$4 sm:$0xff]   ;;  %v10607_v24 = vld [vmem:[#allocation7 + $0x1384] ss:$16 sps:$4 sm:$0xff]   ;;  %v10610_v25 = vld [vmem:[#allocation7 + $0x138c] ss:$16 sps:$4 sm:$0xff]  }
 0x5b7   :  { %4968 = vmatprep.mubr.bf16.mxu0 %v4272_v36  ;;  %5054 = vmatprep.mubr.bf16.mxu1 %v4272_v36  ;;  %v10605_v26 = vld [vmem:[#allocation7 + $0x1380] ss:$16 sps:$4 sm:$0xff]   ;;  %v10608_v27 = vld [vmem:[#allocation7 + $0x1388] ss:$16 sps:$4 sm:$0xff]   ;;  %v10613_v28 = vld [vmem:[#allocation7 + $0x13a4] ss:$16 sps:$4 sm:$0xff]  }
 0x5b8   :  { %4969 = vmatmul.mubr.bf16.vlgmr.msra.gmra.mrb[20].mxu0 %v4271_v34  ;;  %5055 = vmatmul.mubr.bf16.vlgmr.msra.gmra.mrb[20].mxu1 %v4271_v34  ;;  %v10616_v29 = vld [vmem:[#allocation7 + $0x13ac] ss:$16 sps:$4 sm:$0xff]   ;;  %v10611_v30 = vld [vmem:[#allocation7 + $0x13a0] ss:$16 sps:$4 sm:$0xff]   ;;  %v10614_v32 = vld [vmem:[#allocation7 + $0x13a8] ss:$16 sps:$4 sm:$0xff]  }
 0x5b9   :  { %4980 = vmatpush1.bf16.msra.mxu0 %v10533_v38  ;;  %5066 = vmatpush1.bf16.msra.mxu1 %v10536_v39  ;;  %v10619_v33 = vld [vmem:[#allocation7 + $0x13c4] ss:$16 sps:$4 sm:$0xff]   ;;  %v10622_v9 = vld [vmem:[#allocation7 + $0x13cc] ss:$16 sps:$4 sm:$0xff]   ;;  %v10617_v34 = vld [vmem:[#allocation7 + $0x13c0] ss:$16 sps:$4 sm:$0xff]  }
 0x5ba   :  { %5011 = vmatprep.mubr.bf16.mxu0 %v4274_v37  ;;  %5097 = vmatprep.mubr.bf16.mxu1 %v4274_v37  ;;  %v10620_v36 = vld [vmem:[#allocation7 + $0x13c8] ss:$16 sps:$4 sm:$0xff]   ;;  %v10625_v37 = vld [vmem:[#allocation7 + $0x13e4] ss:$16 sps:$4 sm:$0xff]   ;;  %v10628_v38 = vld [vmem:[#allocation7 + $0x13ec] ss:$16 sps:$4 sm:$0xff]  }
 0x5bb   :  { %4981 = vmatprep.subr.bf16.mxu0 %v10541_v40  ;;  %5067 = vmatprep.subr.bf16.mxu1 %v10544_v41  ;;  %v10623_v39 = vld [vmem:[#allocation7 + $0x13e0] ss:$16 sps:$4 sm:$0xff]   ;;  %v10626_v40 = vld [vmem:[#allocation7 + $0x13e8] ss:$16 sps:$4 sm:$0xff]   ;;  %v10631_v41 = vld [vmem:[#allocation7 + $0x1404] ss:$16 sps:$4 sm:$0xff]  }
 0x5bd   :  { %4982 = vmatpush1.bf16.msra.mxu0 %v10539_v42  ;;  %5068 = vmatpush1.bf16.msra.mxu1 %v10542_v43  ;;  %v10634_v42 = vld [vmem:[#allocation7 + $0x140c] ss:$16 sps:$4 sm:$0xff]   ;;  %v10629_v43 = vld [vmem:[#allocation7 + $0x1400] ss:$16 sps:$4 sm:$0xff]  }
 0x5be   :  { %4983 = vmatprep.subr.bf16.mxu0 %v10547_v44  ;;  %5069 = vmatprep.subr.bf16.mxu1 %v10550_v45  ;;  %v10632_v44 = vld [vmem:[#allocation7 + $0x1408] ss:$16 sps:$4 sm:$0xff]   ;;  %v10637_v45 = vld [vmem:[#allocation7 + $0x1424] ss:$16 sps:$4 sm:$0xff]  }
 0x5c1   :  { %4984 = vmatpush1.bf16.msra.mxu0 %v10545_v46  ;;  %5070 = vmatpush1.bf16.msra.mxu1 %v10548_v47  ;;  %v10640_v46 = vld [vmem:[#allocation7 + $0x142c] ss:$16 sps:$4 sm:$0xff]   ;;  %v10635_v47 = vld [vmem:[#allocation7 + $0x1420] ss:$16 sps:$4 sm:$0xff]  }
 0x5c2   :  { %4985 = vmatprep.subr.bf16.mxu0 %v10553_v48  ;;  %5071 = vmatprep.subr.bf16.mxu1 %v10556_v49  ;;  %v10638_v48 = vld [vmem:[#allocation7 + $0x1428] ss:$16 sps:$4 sm:$0xff]   ;;  %v10643_v49 = vld [vmem:[#allocation7 + $0x1444] ss:$16 sps:$4 sm:$0xff]  }
 0x5c5   :  { %4986 = vmatpush1.bf16.msra.mxu0 %v10551_v50  ;;  %5072 = vmatpush1.bf16.msra.mxu1 %v10554_v51  ;;  %v10646_v50 = vld [vmem:[#allocation7 + $0x144c] ss:$16 sps:$4 sm:$0xff]   ;;  %v10641_v51 = vld [vmem:[#allocation7 + $0x1440] ss:$16 sps:$4 sm:$0xff]  }
 0x5c6   :  { %4987 = vmatprep.subr.bf16.mxu0 %v10559_v31  ;;  %5073 = vmatprep.subr.bf16.mxu1 %v10562_v52  ;;  %v10644_v31 = vld [vmem:[#allocation7 + $0x1448] ss:$16 sps:$4 sm:$0xff]   ;;  %v10649_v52 = vld [vmem:[#allocation7 + $0x1464] ss:$16 sps:$4 sm:$0xff]  }
 0x5c9   :  { %4988 = vmatpush1.bf16.msra.mxu0 %v10557_v54  ;;  %5074 = vmatpush1.bf16.msra.mxu1 %v10560_v56  ;;  %v10652_v54 = vld [vmem:[#allocation7 + $0x146c] ss:$16 sps:$4 sm:$0xff]   ;;  %v10647_v56 = vld [vmem:[#allocation7 + $0x1460] ss:$16 sps:$4 sm:$0xff]  }
 0x5ca   :  { %4989 = vmatprep.subr.bf16.mxu0 %v10565_v57  ;;  %5075 = vmatprep.subr.bf16.mxu1 %v10568_v58  ;;  %v10655_v57 = vld [vmem:[#allocation7 + $0x1484] ss:$16 sps:$4 sm:$0xff]   ;;  %v10658_v58 = vld [vmem:[#allocation7 + $0x148c] ss:$16 sps:$4 sm:$0xff]  }
 0x5cd   :  { %4990 = vmatpush1.bf16.msra.mxu0 %v10563_v59  ;;  %5076 = vmatpush1.bf16.msra.mxu1 %v10566_v60  ;;  %v10653_v59 = vld [vmem:[#allocation7 + $0x1480] ss:$16 sps:$4 sm:$0xff]   ;;  %v10656_v60 = vld [vmem:[#allocation7 + $0x1488] ss:$16 sps:$4 sm:$0xff]  }
 0x5ce   :  { %4991 = vmatprep.subr.bf16.mxu0 %v10571_v61  ;;  %5077 = vmatprep.subr.bf16.mxu1 %v10574_v62  ;;  %v10661_v61 = vld [vmem:[#allocation7 + $0x14a4] ss:$16 sps:$4 sm:$0xff]   ;;  %v10664_v62 = vld [vmem:[#allocation7 + $0x14ac] ss:$16 sps:$4 sm:$0xff]  }
 0x5d1   :  { %4992 = vmatpush1.bf16.msra.mxu0 %v10569_v63  ;;  %5078 = vmatpush1.bf16.msra.mxu1 %v10572_v0  ;;  %v10659_v63 = vld [vmem:[#allocation7 + $0x14a0] ss:$16 sps:$4 sm:$0xff]   ;;  %v10662_v0 = vld [vmem:[#allocation7 + $0x14a8] ss:$16 sps:$4 sm:$0xff]  }
 0x5d2   :  { %4993 = vmatprep.subr.bf16.mxu0 %v10577_v1  ;;  %5079 = vmatprep.subr.bf16.mxu1 %v10580_v2  ;;  %v10667_v1 = vld [vmem:[#allocation7 + $0x14c4] ss:$16 sps:$4 sm:$0xff]   ;;  %v10670_v2 = vld [vmem:[#allocation7 + $0x14cc] ss:$16 sps:$4 sm:$0xff]  }
 0x5d5   :  { %4994 = vmatpush1.bf16.msra.mxu0 %v10575_v3  ;;  %5080 = vmatpush1.bf16.msra.mxu1 %v10578_v4  ;;  %v10665_v3 = vld [vmem:[#allocation7 + $0x14c0] ss:$16 sps:$4 sm:$0xff]   ;;  %v10668_v4 = vld [vmem:[#allocation7 + $0x14c8] ss:$16 sps:$4 sm:$0xff]  }
 0x5d6   :  { %4995 = vmatprep.subr.bf16.mxu0 %v10583_v5  ;;  %5081 = vmatprep.subr.bf16.mxu1 %v10586_v6  ;;  %v10673_v5 = vld [vmem:[#allocation7 + $0x14e4] ss:$16 sps:$4 sm:$0xff]   ;;  %v10676_v6 = vld [vmem:[#allocation7 + $0x14ec] ss:$16 sps:$4 sm:$0xff]  }
 0x5d9   :  { %4996 = vmatpush1.bf16.msra.mxu0 %v10581_v7  ;;  %5082 = vmatpush1.bf16.msra.mxu1 %v10584_v8  ;;  %v10671_v7 = vld [vmem:[#allocation7 + $0x14e0] ss:$16 sps:$4 sm:$0xff]   ;;  %v10674_v8 = vld [vmem:[#allocation7 + $0x14e8] ss:$16 sps:$4 sm:$0xff]  }
 0x5da   :  { %4997 = vmatprep.subr.bf16.mxu0 %v10589_v55  ;;  %5083 = vmatprep.subr.bf16.mxu1 %v10592_v10  ;;  %v10679_v55 = vld [vmem:[#allocation7 + $0x1504] ss:$16 sps:$4 sm:$0xff]   ;;  %v10682_v10 = vld [vmem:[#allocation7 + $0x150c] ss:$16 sps:$4 sm:$0xff]  }
 0x5dd   :  { %4998 = vmatpush1.bf16.msra.mxu0 %v10587_v53  ;;  %5084 = vmatpush1.bf16.msra.mxu1 %v10590_v11  ;;  %v10677_v53 = vld [vmem:[#allocation7 + $0x1500] ss:$16 sps:$4 sm:$0xff]   ;;  %v10680_v11 = vld [vmem:[#allocation7 + $0x1508] ss:$16 sps:$4 sm:$0xff]  }
 0x5de   :  { %4999 = vmatprep.subr.bf16.mxu0 %v10595_v12  ;;  %5085 = vmatprep.subr.bf16.mxu1 %v10598_v13  ;;  %v10685_v12 = vld [vmem:[#allocation7 + $0x1524] ss:$16 sps:$4 sm:$0xff]   ;;  %v10688_v13 = vld [vmem:[#allocation7 + $0x152c] ss:$16 sps:$4 sm:$0xff]  }
 0x5e1   :  { %5000 = vmatpush1.bf16.msra.mxu0 %v10593_v14  ;;  %5086 = vmatpush1.bf16.msra.mxu1 %v10596_v15  ;;  %v10683_v14 = vld [vmem:[#allocation7 + $0x1520] ss:$16 sps:$4 sm:$0xff]   ;;  %v10686_v15 = vld [vmem:[#allocation7 + $0x1528] ss:$16 sps:$4 sm:$0xff]  }
 0x5e2   :  { %5001 = vmatprep.subr.bf16.mxu0 %v10601_v16  ;;  %5087 = vmatprep.subr.bf16.mxu1 %v10604_v21  ;;  %v10691_v16 = vld [vmem:[#allocation7 + $0x1544] ss:$16 sps:$4 sm:$0xff]   ;;  %v10694_v21 = vld [vmem:[#allocation7 + $0x154c] ss:$16 sps:$4 sm:$0xff]  }
 0x5e5   :  { %5002 = vmatpush1.bf16.msra.mxu0 %v10599_v22  ;;  %5088 = vmatpush1.bf16.msra.mxu1 %v10602_v23  ;;  %v10689_v22 = vld [vmem:[#allocation7 + $0x1540] ss:$16 sps:$4 sm:$0xff]   ;;  %v10692_v23 = vld [vmem:[#allocation7 + $0x1548] ss:$16 sps:$4 sm:$0xff]  }
 0x5e6   :  { %5003 = vmatprep.subr.bf16.mxu0 %v10607_v24  ;;  %5089 = vmatprep.subr.bf16.mxu1 %v10610_v25  ;;  %v10697_v24 = vld [vmem:[#allocation7 + $0x1564] ss:$16 sps:$4 sm:$0xff]   ;;  %v10700_v25 = vld [vmem:[#allocation7 + $0x156c] ss:$16 sps:$4 sm:$0xff]  }
 0x5e9   :  { %5004 = vmatpush1.bf16.msra.mxu0 %v10605_v26  ;;  %5090 = vmatpush1.bf16.msra.mxu1 %v10608_v27  ;;  %v10695_v26 = vld [vmem:[#allocation7 + $0x1560] ss:$16 sps:$4 sm:$0xff]   ;;  %v10698_v27 = vld [vmem:[#allocation7 + $0x1568] ss:$16 sps:$4 sm:$0xff]  }
 0x5ea   :  { %5005 = vmatprep.subr.bf16.mxu0 %v10613_v28  ;;  %5091 = vmatprep.subr.bf16.mxu1 %v10616_v29  ;;  %v10703_v28 = vld [vmem:[#allocation7 + $0x1584] ss:$16 sps:$4 sm:$0xff]   ;;  %v10706_v29 = vld [vmem:[#allocation7 + $0x158c] ss:$16 sps:$4 sm:$0xff]  }
 0x5ed   :  { %5006 = vmatpush1.bf16.msra.mxu0 %v10611_v30  ;;  %5092 = vmatpush1.bf16.msra.mxu1 %v10614_v32  ;;  %v10701_v30 = vld [vmem:[#allocation7 + $0x1580] ss:$16 sps:$4 sm:$0xff]   ;;  %v10704_v32 = vld [vmem:[#allocation7 + $0x1588] ss:$16 sps:$4 sm:$0xff]  }
 0x5ee   :  { %5007 = vmatprep.subr.bf16.mxu0 %v10619_v33  ;;  %5093 = vmatprep.subr.bf16.mxu1 %v10622_v9  ;;  %v10709_v33 = vld [vmem:[#allocation7 + $0x15a4] ss:$16 sps:$4 sm:$0xff]   ;;  %v10712_v9 = vld [vmem:[#allocation7 + $0x15ac] ss:$16 sps:$4 sm:$0xff]  }
 0x5f1   :  { %5008 = vmatpush1.bf16.msra.mxu0 %v10617_v34  ;;  %5094 = vmatpush1.bf16.msra.mxu1 %v10620_v36  ;;  %v10707_v34 = vld [vmem:[#allocation7 + $0x15a0] ss:$16 sps:$4 sm:$0xff]   ;;  %v10710_v36 = vld [vmem:[#allocation7 + $0x15a8] ss:$16 sps:$4 sm:$0xff]  }
 0x5f2   :  { %5009 = vmatprep.subr.bf16.mxu0 %v10625_v37  ;;  %5095 = vmatprep.subr.bf16.mxu1 %v10628_v38  ;;  %v10715_v37 = vld [vmem:[#allocation7 + $0x15c4] ss:$16 sps:$4 sm:$0xff]   ;;  %v10718_v38 = vld [vmem:[#allocation7 + $0x15cc] ss:$16 sps:$4 sm:$0xff]  }
 0x5f5   :  { %5010 = vmatpush1.bf16.msra.mxu0 %v10623_v39  ;;  %5096 = vmatpush1.bf16.msra.mxu1 %v10626_v40  ;;  %v10713_v39 = vld [vmem:[#allocation7 + $0x15c0] ss:$16 sps:$4 sm:$0xff]   ;;  %v10716_v40 = vld [vmem:[#allocation7 + $0x15c8] ss:$16 sps:$4 sm:$0xff]  }
 0x5f6   :  { %5912 = vmatprep.subr.bf16.mxu0 %v10631_v41  ;;  %5998 = vmatprep.subr.bf16.mxu1 %v10634_v42  ;;  %v10721_v41 = vld [vmem:[#allocation7 + $0x15e4] ss:$16 sps:$4 sm:$0xff]   ;;  %v10724_v42 = vld [vmem:[#allocation7 + $0x15ec] ss:$16 sps:$4 sm:$0xff]  }
 0x5f8   :  { %5012 = vmatmul.mubr.bf16.vlgmr.msra.gmra.mrb[20].mxu0 %v11558_v35  ;;  %5098 = vmatmul.mubr.bf16.vlgmr.msra.gmra.mrb[20].mxu1 %v11558_v35  ;;  %v10650_v35 = vld [vmem:[#allocation7 + $0x1468] ss:$16 sps:$4 sm:$0xff]  }
 0x5f9   :  { %5913 = vmatpush1.bf16.msra.mxu0 %v10629_v43  ;;  %5999 = vmatpush1.bf16.msra.mxu1 %v10632_v44  ;;  %v10719_v43 = vld [vmem:[#allocation7 + $0x15e0] ss:$16 sps:$4 sm:$0xff]   ;;  %v10722_v44 = vld [vmem:[#allocation7 + $0x15e8] ss:$16 sps:$4 sm:$0xff]  }
 0x5fa   :  { %5914 = vmatprep.subr.bf16.mxu0 %v10637_v45  ;;  %6000 = vmatprep.subr.bf16.mxu1 %v10640_v46  ;;  %v10727_v45 = vld [vmem:[#allocation7 + $0x1604] ss:$16 sps:$4 sm:$0xff]   ;;  %v10730_v46 = vld [vmem:[#allocation7 + $0x160c] ss:$16 sps:$4 sm:$0xff]  }
 0x5fd   :  { %5915 = vmatpush1.bf16.msra.mxu0 %v10635_v47  ;;  %6001 = vmatpush1.bf16.msra.mxu1 %v10638_v48  ;;  %v4270_v47 = vld [vmem:[#allocation8 + $0x10] sm:$0xf] }
 0x5fe   :  { %5916 = vmatprep.subr.bf16.mxu0 %v10643_v49  ;;  %6002 = vmatprep.subr.bf16.mxu1 %v10646_v50  ;;  %v4279_v48 = vrot.slane %v4270_v47, %v11514_v17  ;;  %v4287_v49 = vrot.slane %v4270_v47, %v11518_v19  ;;  %v4283_v50 = vrot.slane %v4270_v47, %v11516_v18 }
 0x601   :  { %5917 = vmatpush1.bf16.msra.mxu0 %v10641_v51  ;;  %6003 = vmatpush1.bf16.msra.mxu1 %v10644_v31  ;;  %v4291_v51 = vrot.slane %v4270_v47, %v11520_v20  ;;  %v10772_v47 = vld [vmem:[#allocation7 + $0x16ec] ss:$16 sps:$4 sm:$0xff]  }
 0x602   :  { %5918 = vmatprep.subr.bf16.mxu0 %v10649_v52  ;;  %6004 = vmatprep.subr.bf16.mxu1 %v10652_v54 }
 0x605   :  { %5919 = vmatpush1.bf16.msra.mxu0 %v10647_v56  ;;  %6005 = vmatpush1.bf16.msra.mxu1 %v10650_v35 }
 0x606   :  { %5920 = vmatprep.subr.bf16.mxu0 %v10655_v57  ;;  %6006 = vmatprep.subr.bf16.mxu1 %v10658_v58 }
 0x609   :  { %5921 = vmatpush1.bf16.msra.mxu0 %v10653_v59  ;;  %6007 = vmatpush1.bf16.msra.mxu1 %v10656_v60 }
 0x60a   :  { %5922 = vmatprep.subr.bf16.mxu0 %v10661_v61  ;;  %6008 = vmatprep.subr.bf16.mxu1 %v10664_v62 }
 0x60d   :  { %5923 = vmatpush1.bf16.msra.mxu0 %v10659_v63  ;;  %6009 = vmatpush1.bf16.msra.mxu1 %v10662_v0 }
 0x60e   :  { %5924 = vmatprep.subr.bf16.mxu0 %v10667_v1  ;;  %6010 = vmatprep.subr.bf16.mxu1 %v10670_v2 }
 0x611   :  { %5925 = vmatpush1.bf16.msra.mxu0 %v10665_v3  ;;  %6011 = vmatpush1.bf16.msra.mxu1 %v10668_v4 }
 0x612   :  { %5926 = vmatprep.subr.bf16.mxu0 %v10673_v5  ;;  %6012 = vmatprep.subr.bf16.mxu1 %v10676_v6 }
 0x615   :  { %5927 = vmatpush1.bf16.msra.mxu0 %v10671_v7  ;;  %6013 = vmatpush1.bf16.msra.mxu1 %v10674_v8 }
 0x616   :  { %5928 = vmatprep.subr.bf16.mxu0 %v10679_v55  ;;  %6014 = vmatprep.subr.bf16.mxu1 %v10682_v10 }
 0x619   :  { %5929 = vmatpush1.bf16.msra.mxu0 %v10677_v53  ;;  %6015 = vmatpush1.bf16.msra.mxu1 %v10680_v11 }
 0x61a   :  { %5930 = vmatprep.subr.bf16.mxu0 %v10685_v12  ;;  %6016 = vmatprep.subr.bf16.mxu1 %v10688_v13 }
 0x61d   :  { %5931 = vmatpush1.bf16.msra.mxu0 %v10683_v14  ;;  %6017 = vmatpush1.bf16.msra.mxu1 %v10686_v15  ;;  %v10725_v15 = vld [vmem:[#allocation7 + $0x1600] ss:$16 sps:$4 sm:$0xff]  }
 0x61e   :  { %5932 = vmatprep.subr.bf16.mxu0 %v10691_v16  ;;  %6018 = vmatprep.subr.bf16.mxu1 %v10694_v21  ;;  %v10728_v16 = vld [vmem:[#allocation7 + $0x1608] ss:$16 sps:$4 sm:$0xff]   ;;  %v10733_v21 = vld [vmem:[#allocation7 + $0x1624] ss:$16 sps:$4 sm:$0xff]  }
 0x621   :  { %5933 = vmatpush1.bf16.msra.mxu0 %v10689_v22  ;;  %6019 = vmatpush1.bf16.msra.mxu1 %v10692_v23  ;;  %v10736_v22 = vld [vmem:[#allocation7 + $0x162c] ss:$16 sps:$4 sm:$0xff]   ;;  %v10731_v23 = vld [vmem:[#allocation7 + $0x1620] ss:$16 sps:$4 sm:$0xff]  }
 0x622   :  { %5934 = vmatprep.subr.bf16.mxu0 %v10697_v24  ;;  %6020 = vmatprep.subr.bf16.mxu1 %v10700_v25  ;;  %v10734_v24 = vld [vmem:[#allocation7 + $0x1628] ss:$16 sps:$4 sm:$0xff]   ;;  %v10739_v25 = vld [vmem:[#allocation7 + $0x1644] ss:$16 sps:$4 sm:$0xff]  }
 0x625   :  { %5935 = vmatpush1.bf16.msra.mxu0 %v10695_v26  ;;  %6021 = vmatpush1.bf16.msra.mxu1 %v10698_v27  ;;  %v10742_v26 = vld [vmem:[#allocation7 + $0x164c] ss:$16 sps:$4 sm:$0xff]   ;;  %v10737_v27 = vld [vmem:[#allocation7 + $0x1640] ss:$16 sps:$4 sm:$0xff]  }
 0x626   :  { %5936 = vmatprep.subr.bf16.mxu0 %v10703_v28  ;;  %6022 = vmatprep.subr.bf16.mxu1 %v10706_v29  ;;  %v10740_v28 = vld [vmem:[#allocation7 + $0x1648] ss:$16 sps:$4 sm:$0xff]   ;;  %v10745_v29 = vld [vmem:[#allocation7 + $0x1664] ss:$16 sps:$4 sm:$0xff]  }
 0x629   :  { %5937 = vmatpush1.bf16.msra.mxu0 %v10701_v30  ;;  %6023 = vmatpush1.bf16.msra.mxu1 %v10704_v32  ;;  %v10748_v30 = vld [vmem:[#allocation7 + $0x166c] ss:$16 sps:$4 sm:$0xff]   ;;  %v10743_v32 = vld [vmem:[#allocation7 + $0x1660] ss:$16 sps:$4 sm:$0xff]  }
 0x62a   :  { %5938 = vmatprep.subr.bf16.mxu0 %v10709_v33  ;;  %6024 = vmatprep.subr.bf16.mxu1 %v10712_v9  ;;  %v10746_v33 = vld [vmem:[#allocation7 + $0x1668] ss:$16 sps:$4 sm:$0xff]   ;;  %v10751_v9 = vld [vmem:[#allocation7 + $0x1684] ss:$16 sps:$4 sm:$0xff]  }
 0x62d   :  { %5939 = vmatpush1.bf16.msra.mxu0 %v10707_v34  ;;  %6025 = vmatpush1.bf16.msra.mxu1 %v10710_v36  ;;  %v10754_v34 = vld [vmem:[#allocation7 + $0x168c] ss:$16 sps:$4 sm:$0xff]   ;;  %v10749_v36 = vld [vmem:[#allocation7 + $0x1680] ss:$16 sps:$4 sm:$0xff]  }
 0x62e   :  { %5940 = vmatprep.subr.bf16.mxu0 %v10715_v37  ;;  %6026 = vmatprep.subr.bf16.mxu1 %v10718_v38  ;;  %v10752_v37 = vld [vmem:[#allocation7 + $0x1688] ss:$16 sps:$4 sm:$0xff]   ;;  %v10757_v38 = vld [vmem:[#allocation7 + $0x16a4] ss:$16 sps:$4 sm:$0xff]  }
 0x631   :  { %5941 = vmatpush1.bf16.msra.mxu0 %v10713_v39  ;;  %6027 = vmatpush1.bf16.msra.mxu1 %v10716_v40  ;;  %v10760_v39 = vld [vmem:[#allocation7 + $0x16ac] ss:$16 sps:$4 sm:$0xff]   ;;  %v10755_v40 = vld [vmem:[#allocation7 + $0x16a0] ss:$16 sps:$4 sm:$0xff]  }
 0x632   :  { %5942 = vmatprep.subr.bf16.mxu0 %v10721_v41  ;;  %6028 = vmatprep.subr.bf16.mxu1 %v10724_v42  ;;  %v10758_v41 = vld [vmem:[#allocation7 + $0x16a8] ss:$16 sps:$4 sm:$0xff]   ;;  %v10763_v42 = vld [vmem:[#allocation7 + $0x16c4] ss:$16 sps:$4 sm:$0xff]  }
 0x635   :  { %5943 = vmatpush1.bf16.msra.mxu0 %v10719_v43  ;;  %6029 = vmatpush1.bf16.msra.mxu1 %v10722_v44  ;;  %v10766_v43 = vld [vmem:[#allocation7 + $0x16cc] ss:$16 sps:$4 sm:$0xff]   ;;  %v10761_v44 = vld [vmem:[#allocation7 + $0x16c0] ss:$16 sps:$4 sm:$0xff]  }
 0x636   :  { %5955 = vmatprep.subr.bf16.mxu0 %v10727_v45  ;;  %6041 = vmatprep.subr.bf16.mxu1 %v10730_v46  ;;  %v10764_v45 = vld [vmem:[#allocation7 + $0x16c8] ss:$16 sps:$4 sm:$0xff]   ;;  %v10769_v46 = vld [vmem:[#allocation7 + $0x16e4] ss:$16 sps:$4 sm:$0xff]  }
 0x6cb   :  { %v5013_v31 = vpop.f32.mrb[20].mxu0  ;;  %v5099_v52 = vpop.f32.mrb[20].mxu1 }
 0x6cc   :  { %v9556_v54 = vadd.f32 %v5013_v31, %v4279_v48  ;;  %v9560_v56 = vadd.f32 %v5099_v52, %v4287_v49  ;;  %v5015_v35 = vpop.f32.mrb[21].mxu0  ;;  %v5101_v57 = vpop.f32.mrb[21].mxu1  ;;  %v10773_v31 = vld [vmem:[#allocation7 + $0x1700] ss:$16 sps:$4 sm:$0xff]   ;;  %v10776_v52 = vld [vmem:[#allocation7 + $0x1708] ss:$16 sps:$4 sm:$0xff]  }
 0x6cd   :  { %v9557_v58 = vadd.f32 %v5015_v35, %v4283_v50  ;;  %v9561_v59 = vadd.f32 %v5101_v57, %v4291_v51  ;;  %v5017_v60 = vpop.f32.mrb[22].mxu0  ;;  %v5103_v61 = vpop.f32.mrb[22].mxu1  ;;  %v10779_v35 = vld [vmem:[#allocation7 + $0x1720] ss:$16 sps:$4 sm:$0xff]   ;;  %v10782_v57 = vld [vmem:[#allocation7 + $0x1728] ss:$16 sps:$4 sm:$0xff]  }
 0x6ce   :  { %v9558_v62 = vadd.f32 %v5017_v60, %v4279_v48  ;;  %v9562_v63 = vadd.f32 %v5103_v61, %v4287_v49  ;;  %v5019_v0 = vpop.f32.mrb[23].mxu0  ;;  %v5105_v1 = vpop.f32.mrb[23].mxu1  ;;  %v5108_v4 = vmax.f32 %v9556_v54, 0.0  ;;  %v5110_v5 = vmax.f32 %v9560_v56, 0.0  ;;  %v10767_v48 = vld [vmem:[#allocation7 + $0x16e0] ss:$16 sps:$4 sm:$0xff]  }
 0x6cf   :  { %v9559_v2 = vadd.f32 %v5019_v0, %v4283_v50  ;;  %v9563_v3 = vadd.f32 %v5105_v1, %v4291_v51  ;;  %v5109_v8 = vmax.f32 %v9557_v58, 0.0  ;;  %v5111_v55 = vmax.f32 %v9561_v59, 0.0  ;;  %v10770_v49 = vld [vmem:[#allocation7 + $0x16e8] ss:$16 sps:$4 sm:$0xff]   ;;  %v10775_v50 = vld [vmem:[#allocation7 + $0x1704] ss:$16 sps:$4 sm:$0xff]  }
 0x6d0   :  { %v5112_v6 = vmax.f32 %v9558_v62, 0.0  ;;  %v5114_v7 = vmax.f32 %v9562_v63, 0.0  ;;  %v10778_v51 = vld [vmem:[#allocation7 + $0x170c] ss:$16 sps:$4 sm:$0xff]   ;;  %v10781_v54 = vld [vmem:[#allocation7 + $0x1724] ss:$16 sps:$4 sm:$0xff]  }
 0x6d1   :  { %v5113_v10 = vmax.f32 %v9559_v2, 0.0  ;;  %v5115_v53 = vmax.f32 %v9563_v3, 0.0  ;;  %v10784_v56 = vld [vmem:[#allocation7 + $0x172c] ss:$16 sps:$4 sm:$0xff]   ;;  %v10787_v58 = vld [vmem:[#allocation7 + $0x1744] ss:$16 sps:$4 sm:$0xff]  }
 0x6d2   :  { %v5247_v11 = vpack.c.bf16 %v5112_v6, %v5108_v4  ;;  %v11566_v12 = vpack.c.bf16 %v5114_v7, %v5110_v5  ;;  %v10790_v59 = vld [vmem:[#allocation7 + $0x174c] ss:$16 sps:$4 sm:$0xff]   ;;  %v10785_v60 = vld [vmem:[#allocation7 + $0x1740] ss:$16 sps:$4 sm:$0xff]   ;;  %v10788_v61 = vld [vmem:[#allocation7 + $0x1748] ss:$16 sps:$4 sm:$0xff]  }
 0x6d3   :  { %v5248_v13 = vpack.c.bf16 %v5113_v10, %v5109_v8  ;;  %v5250_v14 = vpack.c.bf16 %v5115_v53, %v5111_v55  ;;  %v10793_v62 = vld [vmem:[#allocation7 + $0x1764] ss:$16 sps:$4 sm:$0xff]   ;;  %v10796_v63 = vld [vmem:[#allocation7 + $0x176c] ss:$16 sps:$4 sm:$0xff]   ;;  %v10791_v0 = vld [vmem:[#allocation7 + $0x1760] ss:$16 sps:$4 sm:$0xff]  }
 0x6d4   :  { %v10794_v1 = vld [vmem:[#allocation7 + $0x1768] ss:$16 sps:$4 sm:$0xff]   ;;  %v10799_v2 = vld [vmem:[#allocation7 + $0x1784] ss:$16 sps:$4 sm:$0xff]   ;;  %v10802_v3 = vld [vmem:[#allocation7 + $0x178c] ss:$16 sps:$4 sm:$0xff]  }
 0x6d5   :  { %5944 = vmatprep.mubr.bf16.mxu0 %v5248_v13  ;;  %6030 = vmatprep.mubr.bf16.mxu1 %v5248_v13  ;;  %v10797_v4 = vld [vmem:[#allocation7 + $0x1780] ss:$16 sps:$4 sm:$0xff]   ;;  %v10800_v5 = vld [vmem:[#allocation7 + $0x1788] ss:$16 sps:$4 sm:$0xff]   ;;  %v10805_v6 = vld [vmem:[#allocation7 + $0x17a4] ss:$16 sps:$4 sm:$0xff]  }
 0x6d6   :  { %5945 = vmatmul.mubr.bf16.vlgmr.msra.gmra.mrb[24].mxu0 %v5247_v11  ;;  %6031 = vmatmul.mubr.bf16.vlgmr.msra.gmra.mrb[24].mxu1 %v5247_v11  ;;  %v10808_v7 = vld [vmem:[#allocation7 + $0x17ac] ss:$16 sps:$4 sm:$0xff]   ;;  %v10803_v8 = vld [vmem:[#allocation7 + $0x17a0] ss:$16 sps:$4 sm:$0xff]   ;;  %v10806_v55 = vld [vmem:[#allocation7 + $0x17a8] ss:$16 sps:$4 sm:$0xff]  }
 0x6d7   :  { %5956 = vmatpush1.bf16.msra.mxu0 %v10725_v15  ;;  %6042 = vmatpush1.bf16.msra.mxu1 %v10728_v16  ;;  %v10811_v10 = vld [vmem:[#allocation7 + $0x17c4] ss:$16 sps:$4 sm:$0xff]   ;;  %v10814_v53 = vld [vmem:[#allocation7 + $0x17cc] ss:$16 sps:$4 sm:$0xff]   ;;  %v10809_v11 = vld [vmem:[#allocation7 + $0x17c0] ss:$16 sps:$4 sm:$0xff]  }
 0x6d8   :  { %5987 = vmatprep.mubr.bf16.mxu0 %v5250_v14  ;;  %6073 = vmatprep.mubr.bf16.mxu1 %v5250_v14  ;;  %v10812_v13 = vld [vmem:[#allocation7 + $0x17c8] ss:$16 sps:$4 sm:$0xff]   ;;  %v10817_v14 = vld [vmem:[#allocation7 + $0x17e4] ss:$16 sps:$4 sm:$0xff]   ;;  %v10820_v15 = vld [vmem:[#allocation7 + $0x17ec] ss:$16 sps:$4 sm:$0xff]  }
 0x6d9   :  { %5957 = vmatprep.subr.bf16.mxu0 %v10733_v21  ;;  %6043 = vmatprep.subr.bf16.mxu1 %v10736_v22  ;;  %v10815_v16 = vld [vmem:[#allocation7 + $0x17e0] ss:$16 sps:$4 sm:$0xff]   ;;  %v10818_v21 = vld [vmem:[#allocation7 + $0x17e8] ss:$16 sps:$4 sm:$0xff]   ;;  %v10823_v22 = vld [vmem:[#allocation7 + $0x1804] ss:$16 sps:$4 sm:$0xff]  }
 0x6db   :  { %5958 = vmatpush1.bf16.msra.mxu0 %v10731_v23  ;;  %6044 = vmatpush1.bf16.msra.mxu1 %v10734_v24  ;;  %v10826_v23 = vld [vmem:[#allocation7 + $0x180c] ss:$16 sps:$4 sm:$0xff]   ;;  %v10821_v24 = vld [vmem:[#allocation7 + $0x1800] ss:$16 sps:$4 sm:$0xff]  }
 0x6dc   :  { %5959 = vmatprep.subr.bf16.mxu0 %v10739_v25  ;;  %6045 = vmatprep.subr.bf16.mxu1 %v10742_v26  ;;  %v10824_v25 = vld [vmem:[#allocation7 + $0x1808] ss:$16 sps:$4 sm:$0xff]   ;;  %v10829_v26 = vld [vmem:[#allocation7 + $0x1824] ss:$16 sps:$4 sm:$0xff]  }
 0x6df   :  { %5960 = vmatpush1.bf16.msra.mxu0 %v10737_v27  ;;  %6046 = vmatpush1.bf16.msra.mxu1 %v10740_v28  ;;  %v10832_v27 = vld [vmem:[#allocation7 + $0x182c] ss:$16 sps:$4 sm:$0xff]   ;;  %v10827_v28 = vld [vmem:[#allocation7 + $0x1820] ss:$16 sps:$4 sm:$0xff]  }
 0x6e0   :  { %5961 = vmatprep.subr.bf16.mxu0 %v10745_v29  ;;  %6047 = vmatprep.subr.bf16.mxu1 %v10748_v30  ;;  %v10830_v29 = vld [vmem:[#allocation7 + $0x1828] ss:$16 sps:$4 sm:$0xff]   ;;  %v10835_v30 = vld [vmem:[#allocation7 + $0x1844] ss:$16 sps:$4 sm:$0xff]  }
 0x6e3   :  { %5962 = vmatpush1.bf16.msra.mxu0 %v10743_v32  ;;  %6048 = vmatpush1.bf16.msra.mxu1 %v10746_v33  ;;  %v10838_v32 = vld [vmem:[#allocation7 + $0x184c] ss:$16 sps:$4 sm:$0xff]   ;;  %v10833_v33 = vld [vmem:[#allocation7 + $0x1840] ss:$16 sps:$4 sm:$0xff]  }
 0x6e4   :  { %5963 = vmatprep.subr.bf16.mxu0 %v10751_v9  ;;  %6049 = vmatprep.subr.bf16.mxu1 %v10754_v34  ;;  %v10836_v9 = vld [vmem:[#allocation7 + $0x1848] ss:$16 sps:$4 sm:$0xff]   ;;  %v10841_v34 = vld [vmem:[#allocation7 + $0x1864] ss:$16 sps:$4 sm:$0xff]  }
 0x6e7   :  { %5964 = vmatpush1.bf16.msra.mxu0 %v10749_v36  ;;  %6050 = vmatpush1.bf16.msra.mxu1 %v10752_v37  ;;  %v10844_v36 = vld [vmem:[#allocation7 + $0x186c] ss:$16 sps:$4 sm:$0xff]   ;;  %v10839_v37 = vld [vmem:[#allocation7 + $0x1860] ss:$16 sps:$4 sm:$0xff]  }
 0x6e8   :  { %5965 = vmatprep.subr.bf16.mxu0 %v10757_v38  ;;  %6051 = vmatprep.subr.bf16.mxu1 %v10760_v39  ;;  %v10847_v38 = vld [vmem:[#allocation7 + $0x1884] ss:$16 sps:$4 sm:$0xff]   ;;  %v10850_v39 = vld [vmem:[#allocation7 + $0x188c] ss:$16 sps:$4 sm:$0xff]  }
 0x6eb   :  { %5966 = vmatpush1.bf16.msra.mxu0 %v10755_v40  ;;  %6052 = vmatpush1.bf16.msra.mxu1 %v10758_v41  ;;  %v10845_v40 = vld [vmem:[#allocation7 + $0x1880] ss:$16 sps:$4 sm:$0xff]   ;;  %v10848_v41 = vld [vmem:[#allocation7 + $0x1888] ss:$16 sps:$4 sm:$0xff]  }
 0x6ec   :  { %5967 = vmatprep.subr.bf16.mxu0 %v10763_v42  ;;  %6053 = vmatprep.subr.bf16.mxu1 %v10766_v43  ;;  %v10853_v42 = vld [vmem:[#allocation7 + $0x18a4] ss:$16 sps:$4 sm:$0xff]   ;;  %v10856_v43 = vld [vmem:[#allocation7 + $0x18ac] ss:$16 sps:$4 sm:$0xff]  }
 0x6ef   :  { %5968 = vmatpush1.bf16.msra.mxu0 %v10761_v44  ;;  %6054 = vmatpush1.bf16.msra.mxu1 %v10764_v45  ;;  %v10851_v44 = vld [vmem:[#allocation7 + $0x18a0] ss:$16 sps:$4 sm:$0xff]   ;;  %v10854_v45 = vld [vmem:[#allocation7 + $0x18a8] ss:$16 sps:$4 sm:$0xff]  }
 0x6f0   :  { %5969 = vmatprep.subr.bf16.mxu0 %v10769_v46  ;;  %6055 = vmatprep.subr.bf16.mxu1 %v10772_v47  ;;  %v10859_v46 = vld [vmem:[#allocation7 + $0x18c4] ss:$16 sps:$4 sm:$0xff]   ;;  %v10862_v47 = vld [vmem:[#allocation7 + $0x18cc] ss:$16 sps:$4 sm:$0xff]  }
 0x6f3   :  { %5970 = vmatpush1.bf16.msra.mxu0 %v10767_v48  ;;  %6056 = vmatpush1.bf16.msra.mxu1 %v10770_v49  ;;  %v10857_v48 = vld [vmem:[#allocation7 + $0x18c0] ss:$16 sps:$4 sm:$0xff]   ;;  %v10860_v49 = vld [vmem:[#allocation7 + $0x18c8] ss:$16 sps:$4 sm:$0xff]  }
 0x6f4   :  { %5971 = vmatprep.subr.bf16.mxu0 %v10775_v50  ;;  %6057 = vmatprep.subr.bf16.mxu1 %v10778_v51  ;;  %v10865_v50 = vld [vmem:[#allocation7 + $0x18e4] ss:$16 sps:$4 sm:$0xff]   ;;  %v10868_v51 = vld [vmem:[#allocation7 + $0x18ec] ss:$16 sps:$4 sm:$0xff]  }
 0x6f7   :  { %5972 = vmatpush1.bf16.msra.mxu0 %v10773_v31  ;;  %6058 = vmatpush1.bf16.msra.mxu1 %v10776_v52  ;;  %v10863_v31 = vld [vmem:[#allocation7 + $0x18e0] ss:$16 sps:$4 sm:$0xff]   ;;  %v10866_v52 = vld [vmem:[#allocation7 + $0x18e8] ss:$16 sps:$4 sm:$0xff]  }
 0x6f8   :  { %5973 = vmatprep.subr.bf16.mxu0 %v10781_v54  ;;  %6059 = vmatprep.subr.bf16.mxu1 %v10784_v56  ;;  %v10871_v54 = vld [vmem:[#allocation7 + $0x1904] ss:$16 sps:$4 sm:$0xff]   ;;  %v10874_v56 = vld [vmem:[#allocation7 + $0x190c] ss:$16 sps:$4 sm:$0xff]  }
 0x6fb   :  { %5974 = vmatpush1.bf16.msra.mxu0 %v10779_v35  ;;  %6060 = vmatpush1.bf16.msra.mxu1 %v10782_v57  ;;  %v10869_v35 = vld [vmem:[#allocation7 + $0x1900] ss:$16 sps:$4 sm:$0xff]   ;;  %v10872_v57 = vld [vmem:[#allocation7 + $0x1908] ss:$16 sps:$4 sm:$0xff]  }
 0x6fc   :  { %5975 = vmatprep.subr.bf16.mxu0 %v10787_v58  ;;  %6061 = vmatprep.subr.bf16.mxu1 %v10790_v59  ;;  %v10877_v58 = vld [vmem:[#allocation7 + $0x1924] ss:$16 sps:$4 sm:$0xff]   ;;  %v10880_v59 = vld [vmem:[#allocation7 + $0x192c] ss:$16 sps:$4 sm:$0xff]  }
 0x6ff   :  { %5976 = vmatpush1.bf16.msra.mxu0 %v10785_v60  ;;  %6062 = vmatpush1.bf16.msra.mxu1 %v10788_v61  ;;  %v10875_v60 = vld [vmem:[#allocation7 + $0x1920] ss:$16 sps:$4 sm:$0xff]   ;;  %v10878_v61 = vld [vmem:[#allocation7 + $0x1928] ss:$16 sps:$4 sm:$0xff]  }
 0x700   :  { %5977 = vmatprep.subr.bf16.mxu0 %v10793_v62  ;;  %6063 = vmatprep.subr.bf16.mxu1 %v10796_v63  ;;  %v10883_v62 = vld [vmem:[#allocation7 + $0x1944] ss:$16 sps:$4 sm:$0xff]   ;;  %v10886_v63 = vld [vmem:[#allocation7 + $0x194c] ss:$16 sps:$4 sm:$0xff]  }
 0x703   :  { %5978 = vmatpush1.bf16.msra.mxu0 %v10791_v0  ;;  %6064 = vmatpush1.bf16.msra.mxu1 %v10794_v1  ;;  %v10881_v0 = vld [vmem:[#allocation7 + $0x1940] ss:$16 sps:$4 sm:$0xff]   ;;  %v10884_v1 = vld [vmem:[#allocation7 + $0x1948] ss:$16 sps:$4 sm:$0xff]  }
 0x704   :  { %5979 = vmatprep.subr.bf16.mxu0 %v10799_v2  ;;  %6065 = vmatprep.subr.bf16.mxu1 %v10802_v3  ;;  %v10889_v2 = vld [vmem:[#allocation7 + $0x1964] ss:$16 sps:$4 sm:$0xff]   ;;  %v10892_v3 = vld [vmem:[#allocation7 + $0x196c] ss:$16 sps:$4 sm:$0xff]  }
 0x707   :  { %5980 = vmatpush1.bf16.msra.mxu0 %v10797_v4  ;;  %6066 = vmatpush1.bf16.msra.mxu1 %v10800_v5  ;;  %v10887_v4 = vld [vmem:[#allocation7 + $0x1960] ss:$16 sps:$4 sm:$0xff]   ;;  %v10890_v5 = vld [vmem:[#allocation7 + $0x1968] ss:$16 sps:$4 sm:$0xff]  }
 0x708   :  { %5981 = vmatprep.subr.bf16.mxu0 %v10805_v6  ;;  %6067 = vmatprep.subr.bf16.mxu1 %v10808_v7  ;;  %v10895_v6 = vld [vmem:[#allocation7 + $0x1984] ss:$16 sps:$4 sm:$0xff]   ;;  %v10898_v7 = vld [vmem:[#allocation7 + $0x198c] ss:$16 sps:$4 sm:$0xff]  }
 0x70b   :  { %5982 = vmatpush1.bf16.msra.mxu0 %v10803_v8  ;;  %6068 = vmatpush1.bf16.msra.mxu1 %v10806_v55  ;;  %v10893_v8 = vld [vmem:[#allocation7 + $0x1980] ss:$16 sps:$4 sm:$0xff]   ;;  %v10896_v55 = vld [vmem:[#allocation7 + $0x1988] ss:$16 sps:$4 sm:$0xff]  }
 0x70c   :  { %5983 = vmatprep.subr.bf16.mxu0 %v10811_v10  ;;  %6069 = vmatprep.subr.bf16.mxu1 %v10814_v53  ;;  %v10901_v10 = vld [vmem:[#allocation7 + $0x19a4] ss:$16 sps:$4 sm:$0xff]   ;;  %v10904_v53 = vld [vmem:[#allocation7 + $0x19ac] ss:$16 sps:$4 sm:$0xff]  }
 0x70f   :  { %5984 = vmatpush1.bf16.msra.mxu0 %v10809_v11  ;;  %6070 = vmatpush1.bf16.msra.mxu1 %v10812_v13  ;;  %v10899_v11 = vld [vmem:[#allocation7 + $0x19a0] ss:$16 sps:$4 sm:$0xff]   ;;  %v10902_v13 = vld [vmem:[#allocation7 + $0x19a8] ss:$16 sps:$4 sm:$0xff]  }
 0x710   :  { %5985 = vmatprep.subr.bf16.mxu0 %v10817_v14  ;;  %6071 = vmatprep.subr.bf16.mxu1 %v10820_v15  ;;  %v10907_v14 = vld [vmem:[#allocation7 + $0x19c4] ss:$16 sps:$4 sm:$0xff]   ;;  %v10910_v15 = vld [vmem:[#allocation7 + $0x19cc] ss:$16 sps:$4 sm:$0xff]  }
 0x713   :  { %5986 = vmatpush1.bf16.msra.mxu0 %v10815_v16  ;;  %6072 = vmatpush1.bf16.msra.mxu1 %v10818_v21  ;;  %v10905_v16 = vld [vmem:[#allocation7 + $0x19c0] ss:$16 sps:$4 sm:$0xff]   ;;  %v10908_v21 = vld [vmem:[#allocation7 + $0x19c8] ss:$16 sps:$4 sm:$0xff]  }
 0x714   :  { %6888 = vmatprep.subr.bf16.mxu0 %v10823_v22  ;;  %6974 = vmatprep.subr.bf16.mxu1 %v10826_v23  ;;  %v10913_v22 = vld [vmem:[#allocation7 + $0x19e4] ss:$16 sps:$4 sm:$0xff]   ;;  %v10916_v23 = vld [vmem:[#allocation7 + $0x19ec] ss:$16 sps:$4 sm:$0xff]  }
 0x716   :  { %5988 = vmatmul.mubr.bf16.vlgmr.msra.gmra.mrb[24].mxu0 %v11566_v12  ;;  %6074 = vmatmul.mubr.bf16.vlgmr.msra.gmra.mrb[24].mxu1 %v11566_v12  ;;  %v10842_v12 = vld [vmem:[#allocation7 + $0x1868] ss:$16 sps:$4 sm:$0xff]  }
 0x717   :  { %6889 = vmatpush1.bf16.msra.mxu0 %v10821_v24  ;;  %6975 = vmatpush1.bf16.msra.mxu1 %v10824_v25  ;;  %v10911_v24 = vld [vmem:[#allocation7 + $0x19e0] ss:$16 sps:$4 sm:$0xff]   ;;  %v10914_v25 = vld [vmem:[#allocation7 + $0x19e8] ss:$16 sps:$4 sm:$0xff]  }
 0x718   :  { %6890 = vmatprep.subr.bf16.mxu0 %v10829_v26  ;;  %6976 = vmatprep.subr.bf16.mxu1 %v10832_v27  ;;  %v10919_v26 = vld [vmem:[#allocation7 + $0x1a04] ss:$16 sps:$4 sm:$0xff]   ;;  %v10922_v27 = vld [vmem:[#allocation7 + $0x1a0c] ss:$16 sps:$4 sm:$0xff]  }
 0x71b   :  { %6891 = vmatpush1.bf16.msra.mxu0 %v10827_v28  ;;  %6977 = vmatpush1.bf16.msra.mxu1 %v10830_v29  ;;  %v5246_v28 = vld [vmem:[#allocation8 + $0x14] sm:$0xf] }
 0x71c   :  { %6892 = vmatprep.subr.bf16.mxu0 %v10835_v30  ;;  %6978 = vmatprep.subr.bf16.mxu1 %v10838_v32  ;;  %v5255_v29 = vrot.slane %v5246_v28, %v11514_v17  ;;  %v5263_v30 = vrot.slane %v5246_v28, %v11518_v19  ;;  %v5259_v32 = vrot.slane %v5246_v28, %v11516_v18 }
 0x71f   :  { %6893 = vmatpush1.bf16.msra.mxu0 %v10833_v33  ;;  %6979 = vmatpush1.bf16.msra.mxu1 %v10836_v9  ;;  %v5267_v33 = vrot.slane %v5246_v28, %v11520_v20  ;;  %v10964_v28 = vld [vmem:[#allocation7 + $0x1aec] ss:$16 sps:$4 sm:$0xff]  }
 0x720   :  { %6894 = vmatprep.subr.bf16.mxu0 %v10841_v34  ;;  %6980 = vmatprep.subr.bf16.mxu1 %v10844_v36 }
 0x723   :  { %6895 = vmatpush1.bf16.msra.mxu0 %v10839_v37  ;;  %6981 = vmatpush1.bf16.msra.mxu1 %v10842_v12 }
 0x724   :  { %6896 = vmatprep.subr.bf16.mxu0 %v10847_v38  ;;  %6982 = vmatprep.subr.bf16.mxu1 %v10850_v39 }
 0x727   :  { %6897 = vmatpush1.bf16.msra.mxu0 %v10845_v40  ;;  %6983 = vmatpush1.bf16.msra.mxu1 %v10848_v41 }
 0x728   :  { %6898 = vmatprep.subr.bf16.mxu0 %v10853_v42  ;;  %6984 = vmatprep.subr.bf16.mxu1 %v10856_v43 }
 0x72b   :  { %6899 = vmatpush1.bf16.msra.mxu0 %v10851_v44  ;;  %6985 = vmatpush1.bf16.msra.mxu1 %v10854_v45 }
 0x72c   :  { %6900 = vmatprep.subr.bf16.mxu0 %v10859_v46  ;;  %6986 = vmatprep.subr.bf16.mxu1 %v10862_v47 }
 0x72f   :  { %6901 = vmatpush1.bf16.msra.mxu0 %v10857_v48  ;;  %6987 = vmatpush1.bf16.msra.mxu1 %v10860_v49 }
 0x730   :  { %6902 = vmatprep.subr.bf16.mxu0 %v10865_v50  ;;  %6988 = vmatprep.subr.bf16.mxu1 %v10868_v51 }
 0x733   :  { %6903 = vmatpush1.bf16.msra.mxu0 %v10863_v31  ;;  %6989 = vmatpush1.bf16.msra.mxu1 %v10866_v52 }
 0x734   :  { %6904 = vmatprep.subr.bf16.mxu0 %v10871_v54  ;;  %6990 = vmatprep.subr.bf16.mxu1 %v10874_v56 }
 0x737   :  { %6905 = vmatpush1.bf16.msra.mxu0 %v10869_v35  ;;  %6991 = vmatpush1.bf16.msra.mxu1 %v10872_v57 }
 0x738   :  { %6906 = vmatprep.subr.bf16.mxu0 %v10877_v58  ;;  %6992 = vmatprep.subr.bf16.mxu1 %v10880_v59 }
 0x73b   :  { %6907 = vmatpush1.bf16.msra.mxu0 %v10875_v60  ;;  %6993 = vmatpush1.bf16.msra.mxu1 %v10878_v61  ;;  %v10917_v61 = vld [vmem:[#allocation7 + $0x1a00] ss:$16 sps:$4 sm:$0xff]  }
 0x73c   :  { %6908 = vmatprep.subr.bf16.mxu0 %v10883_v62  ;;  %6994 = vmatprep.subr.bf16.mxu1 %v10886_v63  ;;  %v10920_v62 = vld [vmem:[#allocation7 + $0x1a08] ss:$16 sps:$4 sm:$0xff]   ;;  %v10925_v63 = vld [vmem:[#allocation7 + $0x1a24] ss:$16 sps:$4 sm:$0xff]  }
 0x73f   :  { %6909 = vmatpush1.bf16.msra.mxu0 %v10881_v0  ;;  %6995 = vmatpush1.bf16.msra.mxu1 %v10884_v1  ;;  %v10928_v0 = vld [vmem:[#allocation7 + $0x1a2c] ss:$16 sps:$4 sm:$0xff]   ;;  %v10923_v1 = vld [vmem:[#allocation7 + $0x1a20] ss:$16 sps:$4 sm:$0xff]  }
 0x740   :  { %6910 = vmatprep.subr.bf16.mxu0 %v10889_v2  ;;  %6996 = vmatprep.subr.bf16.mxu1 %v10892_v3  ;;  %v10926_v2 = vld [vmem:[#allocation7 + $0x1a28] ss:$16 sps:$4 sm:$0xff]   ;;  %v10931_v3 = vld [vmem:[#allocation7 + $0x1a44] ss:$16 sps:$4 sm:$0xff]  }
 0x743   :  { %6911 = vmatpush1.bf16.msra.mxu0 %v10887_v4  ;;  %6997 = vmatpush1.bf16.msra.mxu1 %v10890_v5  ;;  %v10934_v4 = vld [vmem:[#allocation7 + $0x1a4c] ss:$16 sps:$4 sm:$0xff]   ;;  %v10929_v5 = vld [vmem:[#allocation7 + $0x1a40] ss:$16 sps:$4 sm:$0xff]  }
 0x744   :  { %6912 = vmatprep.subr.bf16.mxu0 %v10895_v6  ;;  %6998 = vmatprep.subr.bf16.mxu1 %v10898_v7  ;;  %v10932_v6 = vld [vmem:[#allocation7 + $0x1a48] ss:$16 sps:$4 sm:$0xff]   ;;  %v10937_v7 = vld [vmem:[#allocation7 + $0x1a64] ss:$16 sps:$4 sm:$0xff]  }
 0x747   :  { %6913 = vmatpush1.bf16.msra.mxu0 %v10893_v8  ;;  %6999 = vmatpush1.bf16.msra.mxu1 %v10896_v55  ;;  %v10940_v8 = vld [vmem:[#allocation7 + $0x1a6c] ss:$16 sps:$4 sm:$0xff]   ;;  %v10935_v55 = vld [vmem:[#allocation7 + $0x1a60] ss:$16 sps:$4 sm:$0xff]  }
 0x748   :  { %6914 = vmatprep.subr.bf16.mxu0 %v10901_v10  ;;  %7000 = vmatprep.subr.bf16.mxu1 %v10904_v53  ;;  %v10938_v10 = vld [vmem:[#allocation7 + $0x1a68] ss:$16 sps:$4 sm:$0xff]   ;;  %v10943_v53 = vld [vmem:[#allocation7 + $0x1a84] ss:$16 sps:$4 sm:$0xff]  }
 0x74b   :  { %6915 = vmatpush1.bf16.msra.mxu0 %v10899_v11  ;;  %7001 = vmatpush1.bf16.msra.mxu1 %v10902_v13  ;;  %v10946_v11 = vld [vmem:[#allocation7 + $0x1a8c] ss:$16 sps:$4 sm:$0xff]   ;;  %v10941_v13 = vld [vmem:[#allocation7 + $0x1a80] ss:$16 sps:$4 sm:$0xff]  }
 0x74c   :  { %6916 = vmatprep.subr.bf16.mxu0 %v10907_v14  ;;  %7002 = vmatprep.subr.bf16.mxu1 %v10910_v15  ;;  %v10944_v14 = vld [vmem:[#allocation7 + $0x1a88] ss:$16 sps:$4 sm:$0xff]   ;;  %v10949_v15 = vld [vmem:[#allocation7 + $0x1aa4] ss:$16 sps:$4 sm:$0xff]  }
 0x74f   :  { %6917 = vmatpush1.bf16.msra.mxu0 %v10905_v16  ;;  %7003 = vmatpush1.bf16.msra.mxu1 %v10908_v21  ;;  %v10952_v16 = vld [vmem:[#allocation7 + $0x1aac] ss:$16 sps:$4 sm:$0xff]   ;;  %v10947_v21 = vld [vmem:[#allocation7 + $0x1aa0] ss:$16 sps:$4 sm:$0xff]  }
 0x750   :  { %6918 = vmatprep.subr.bf16.mxu0 %v10913_v22  ;;  %7004 = vmatprep.subr.bf16.mxu1 %v10916_v23  ;;  %v10950_v22 = vld [vmem:[#allocation7 + $0x1aa8] ss:$16 sps:$4 sm:$0xff]   ;;  %v10955_v23 = vld [vmem:[#allocation7 + $0x1ac4] ss:$16 sps:$4 sm:$0xff]  }
 0x753   :  { %6919 = vmatpush1.bf16.msra.mxu0 %v10911_v24  ;;  %7005 = vmatpush1.bf16.msra.mxu1 %v10914_v25  ;;  %v10958_v24 = vld [vmem:[#allocation7 + $0x1acc] ss:$16 sps:$4 sm:$0xff]   ;;  %v10953_v25 = vld [vmem:[#allocation7 + $0x1ac0] ss:$16 sps:$4 sm:$0xff]  }
 0x754   :  { %6931 = vmatprep.subr.bf16.mxu0 %v10919_v26  ;;  %7017 = vmatprep.subr.bf16.mxu1 %v10922_v27  ;;  %v10956_v26 = vld [vmem:[#allocation7 + $0x1ac8] ss:$16 sps:$4 sm:$0xff]   ;;  %v10961_v27 = vld [vmem:[#allocation7 + $0x1ae4] ss:$16 sps:$4 sm:$0xff]  }
 0x7e9   :  { %v5989_v9 = vpop.f32.mrb[24].mxu0  ;;  %v6075_v34 = vpop.f32.mrb[24].mxu1 }
 0x7ea   :  { %v9564_v36 = vadd.f32 %v5989_v9, %v5255_v29  ;;  %v9568_v37 = vadd.f32 %v6075_v34, %v5263_v30  ;;  %v5991_v12 = vpop.f32.mrb[25].mxu0  ;;  %v6077_v38 = vpop.f32.mrb[25].mxu1  ;;  %v10965_v9 = vld [vmem:[#allocation7 + $0x1b00] ss:$16 sps:$4 sm:$0xff]   ;;  %v10968_v34 = vld [vmem:[#allocation7 + $0x1b08] ss:$16 sps:$4 sm:$0xff]  }
 0x7eb   :  { %v9565_v39 = vadd.f32 %v5991_v12, %v5259_v32  ;;  %v9569_v40 = vadd.f32 %v6077_v38, %v5267_v33  ;;  %v5993_v41 = vpop.f32.mrb[26].mxu0  ;;  %v6079_v42 = vpop.f32.mrb[26].mxu1  ;;  %v10971_v12 = vld [vmem:[#allocation7 + $0x1b20] ss:$16 sps:$4 sm:$0xff]   ;;  %v10974_v38 = vld [vmem:[#allocation7 + $0x1b28] ss:$16 sps:$4 sm:$0xff]  }
 0x7ec   :  { %v9566_v43 = vadd.f32 %v5993_v41, %v5255_v29  ;;  %v9570_v44 = vadd.f32 %v6079_v42, %v5263_v30  ;;  %v5995_v45 = vpop.f32.mrb[27].mxu0  ;;  %v6081_v46 = vpop.f32.mrb[27].mxu1  ;;  %v6084_v49 = vmax.f32 %v9564_v36, 0.0  ;;  %v6086_v50 = vmax.f32 %v9568_v37, 0.0  ;;  %v10959_v29 = vld [vmem:[#allocation7 + $0x1ae0] ss:$16 sps:$4 sm:$0xff]  }
 0x7ed   :  { %v9567_v47 = vadd.f32 %v5995_v45, %v5259_v32  ;;  %v9571_v48 = vadd.f32 %v6081_v46, %v5267_v33  ;;  %v6085_v52 = vmax.f32 %v9565_v39, 0.0  ;;  %v6087_v54 = vmax.f32 %v9569_v40, 0.0  ;;  %v10962_v30 = vld [vmem:[#allocation7 + $0x1ae8] ss:$16 sps:$4 sm:$0xff]   ;;  %v10967_v32 = vld [vmem:[#allocation7 + $0x1b04] ss:$16 sps:$4 sm:$0xff]  }
 0x7ee   :  { %v6088_v51 = vmax.f32 %v9566_v43, 0.0  ;;  %v6090_v31 = vmax.f32 %v9570_v44, 0.0  ;;  %v10970_v33 = vld [vmem:[#allocation7 + $0x1b0c] ss:$16 sps:$4 sm:$0xff]   ;;  %v10973_v36 = vld [vmem:[#allocation7 + $0x1b24] ss:$16 sps:$4 sm:$0xff]  }
 0x7ef   :  { %v6089_v56 = vmax.f32 %v9567_v47, 0.0  ;;  %v6091_v35 = vmax.f32 %v9571_v48, 0.0  ;;  %v10976_v37 = vld [vmem:[#allocation7 + $0x1b2c] ss:$16 sps:$4 sm:$0xff]   ;;  %v10979_v39 = vld [vmem:[#allocation7 + $0x1b44] ss:$16 sps:$4 sm:$0xff]  }
 0x7f0   :  { %v6223_v57 = vpack.c.bf16 %v6088_v51, %v6084_v49  ;;  %v11574_v58 = vpack.c.bf16 %v6090_v31, %v6086_v50  ;;  %v10982_v40 = vld [vmem:[#allocation7 + $0x1b4c] ss:$16 sps:$4 sm:$0xff]   ;;  %v10977_v41 = vld [vmem:[#allocation7 + $0x1b40] ss:$16 sps:$4 sm:$0xff]   ;;  %v10980_v42 = vld [vmem:[#allocation7 + $0x1b48] ss:$16 sps:$4 sm:$0xff]  }
 0x7f1   :  { %v6224_v59 = vpack.c.bf16 %v6089_v56, %v6085_v52  ;;  %v6226_v60 = vpack.c.bf16 %v6091_v35, %v6087_v54  ;;  %v10985_v43 = vld [vmem:[#allocation7 + $0x1b64] ss:$16 sps:$4 sm:$0xff]   ;;  %v10988_v44 = vld [vmem:[#allocation7 + $0x1b6c] ss:$16 sps:$4 sm:$0xff]   ;;  %v10983_v45 = vld [vmem:[#allocation7 + $0x1b60] ss:$16 sps:$4 sm:$0xff]  }
 0x7f2   :  { %v10986_v46 = vld [vmem:[#allocation7 + $0x1b68] ss:$16 sps:$4 sm:$0xff]   ;;  %v10991_v47 = vld [vmem:[#allocation7 + $0x1b84] ss:$16 sps:$4 sm:$0xff]   ;;  %v10994_v48 = vld [vmem:[#allocation7 + $0x1b8c] ss:$16 sps:$4 sm:$0xff]  }
 0x7f3   :  { %6920 = vmatprep.mubr.bf16.mxu0 %v6224_v59  ;;  %7006 = vmatprep.mubr.bf16.mxu1 %v6224_v59  ;;  %v10989_v49 = vld [vmem:[#allocation7 + $0x1b80] ss:$16 sps:$4 sm:$0xff]   ;;  %v10992_v50 = vld [vmem:[#allocation7 + $0x1b88] ss:$16 sps:$4 sm:$0xff]   ;;  %v10997_v51 = vld [vmem:[#allocation7 + $0x1ba4] ss:$16 sps:$4 sm:$0xff]  }
 0x7f4   :  { %6921 = vmatmul.mubr.bf16.vlgmr.msra.gmra.mrb[28].mxu0 %v6223_v57  ;;  %7007 = vmatmul.mubr.bf16.vlgmr.msra.gmra.mrb[28].mxu1 %v6223_v57  ;;  %v11000_v31 = vld [vmem:[#allocation7 + $0x1bac] ss:$16 sps:$4 sm:$0xff]   ;;  %v10995_v52 = vld [vmem:[#allocation7 + $0x1ba0] ss:$16 sps:$4 sm:$0xff]   ;;  %v10998_v54 = vld [vmem:[#allocation7 + $0x1ba8] ss:$16 sps:$4 sm:$0xff]  }
 0x7f5   :  { %6932 = vmatpush1.bf16.msra.mxu0 %v10917_v61  ;;  %7018 = vmatpush1.bf16.msra.mxu1 %v10920_v62  ;;  %v11003_v56 = vld [vmem:[#allocation7 + $0x1bc4] ss:$16 sps:$4 sm:$0xff]   ;;  %v11006_v35 = vld [vmem:[#allocation7 + $0x1bcc] ss:$16 sps:$4 sm:$0xff]   ;;  %v11001_v57 = vld [vmem:[#allocation7 + $0x1bc0] ss:$16 sps:$4 sm:$0xff]  }
 0x7f6   :  { %6963 = vmatprep.mubr.bf16.mxu0 %v6226_v60  ;;  %7049 = vmatprep.mubr.bf16.mxu1 %v6226_v60  ;;  %v11004_v59 = vld [vmem:[#allocation7 + $0x1bc8] ss:$16 sps:$4 sm:$0xff]   ;;  %v11009_v60 = vld [vmem:[#allocation7 + $0x1be4] ss:$16 sps:$4 sm:$0xff]   ;;  %v11012_v61 = vld [vmem:[#allocation7 + $0x1bec] ss:$16 sps:$4 sm:$0xff]  }
 0x7f7   :  { %6933 = vmatprep.subr.bf16.mxu0 %v10925_v63  ;;  %7019 = vmatprep.subr.bf16.mxu1 %v10928_v0  ;;  %v11007_v62 = vld [vmem:[#allocation7 + $0x1be0] ss:$16 sps:$4 sm:$0xff]   ;;  %v11010_v63 = vld [vmem:[#allocation7 + $0x1be8] ss:$16 sps:$4 sm:$0xff]   ;;  %v11015_v0 = vld [vmem:[#allocation7 + $0x1c04] ss:$16 sps:$4 sm:$0xff]  }
 0x7f9   :  { %6934 = vmatpush1.bf16.msra.mxu0 %v10923_v1  ;;  %7020 = vmatpush1.bf16.msra.mxu1 %v10926_v2  ;;  %v11018_v1 = vld [vmem:[#allocation7 + $0x1c0c] ss:$16 sps:$4 sm:$0xff]   ;;  %v11013_v2 = vld [vmem:[#allocation7 + $0x1c00] ss:$16 sps:$4 sm:$0xff]  }
 0x7fa   :  { %6935 = vmatprep.subr.bf16.mxu0 %v10931_v3  ;;  %7021 = vmatprep.subr.bf16.mxu1 %v10934_v4  ;;  %v11016_v3 = vld [vmem:[#allocation7 + $0x1c08] ss:$16 sps:$4 sm:$0xff]   ;;  %v11021_v4 = vld [vmem:[#allocation7 + $0x1c24] ss:$16 sps:$4 sm:$0xff]  }
 0x7fd   :  { %6936 = vmatpush1.bf16.msra.mxu0 %v10929_v5  ;;  %7022 = vmatpush1.bf16.msra.mxu1 %v10932_v6  ;;  %v11024_v5 = vld [vmem:[#allocation7 + $0x1c2c] ss:$16 sps:$4 sm:$0xff]   ;;  %v11019_v6 = vld [vmem:[#allocation7 + $0x1c20] ss:$16 sps:$4 sm:$0xff]  }
 0x7fe   :  { %6937 = vmatprep.subr.bf16.mxu0 %v10937_v7  ;;  %7023 = vmatprep.subr.bf16.mxu1 %v10940_v8  ;;  %v11022_v7 = vld [vmem:[#allocation7 + $0x1c28] ss:$16 sps:$4 sm:$0xff]   ;;  %v11027_v8 = vld [vmem:[#allocation7 + $0x1c44] ss:$16 sps:$4 sm:$0xff]  }
 0x801   :  { %6938 = vmatpush1.bf16.msra.mxu0 %v10935_v55  ;;  %7024 = vmatpush1.bf16.msra.mxu1 %v10938_v10  ;;  %v11030_v55 = vld [vmem:[#allocation7 + $0x1c4c] ss:$16 sps:$4 sm:$0xff]   ;;  %v11025_v10 = vld [vmem:[#allocation7 + $0x1c40] ss:$16 sps:$4 sm:$0xff]  }
 0x802   :  { %6939 = vmatprep.subr.bf16.mxu0 %v10943_v53  ;;  %7025 = vmatprep.subr.bf16.mxu1 %v10946_v11  ;;  %v11028_v53 = vld [vmem:[#allocation7 + $0x1c48] ss:$16 sps:$4 sm:$0xff]   ;;  %v11033_v11 = vld [vmem:[#allocation7 + $0x1c64] ss:$16 sps:$4 sm:$0xff]  }
 0x805   :  { %6940 = vmatpush1.bf16.msra.mxu0 %v10941_v13  ;;  %7026 = vmatpush1.bf16.msra.mxu1 %v10944_v14  ;;  %v11036_v13 = vld [vmem:[#allocation7 + $0x1c6c] ss:$16 sps:$4 sm:$0xff]   ;;  %v11031_v14 = vld [vmem:[#allocation7 + $0x1c60] ss:$16 sps:$4 sm:$0xff]  }
 0x806   :  { %6941 = vmatprep.subr.bf16.mxu0 %v10949_v15  ;;  %7027 = vmatprep.subr.bf16.mxu1 %v10952_v16  ;;  %v11039_v15 = vld [vmem:[#allocation7 + $0x1c84] ss:$16 sps:$4 sm:$0xff]   ;;  %v11042_v16 = vld [vmem:[#allocation7 + $0x1c8c] ss:$16 sps:$4 sm:$0xff]  }
 0x809   :  { %6942 = vmatpush1.bf16.msra.mxu0 %v10947_v21  ;;  %7028 = vmatpush1.bf16.msra.mxu1 %v10950_v22  ;;  %v11037_v21 = vld [vmem:[#allocation7 + $0x1c80] ss:$16 sps:$4 sm:$0xff]   ;;  %v11040_v22 = vld [vmem:[#allocation7 + $0x1c88] ss:$16 sps:$4 sm:$0xff]  }
 0x80a   :  { %6943 = vmatprep.subr.bf16.mxu0 %v10955_v23  ;;  %7029 = vmatprep.subr.bf16.mxu1 %v10958_v24  ;;  %v11045_v23 = vld [vmem:[#allocation7 + $0x1ca4] ss:$16 sps:$4 sm:$0xff]   ;;  %v11048_v24 = vld [vmem:[#allocation7 + $0x1cac] ss:$16 sps:$4 sm:$0xff]  }
 0x80d   :  { %6944 = vmatpush1.bf16.msra.mxu0 %v10953_v25  ;;  %7030 = vmatpush1.bf16.msra.mxu1 %v10956_v26  ;;  %v11043_v25 = vld [vmem:[#allocation7 + $0x1ca0] ss:$16 sps:$4 sm:$0xff]   ;;  %v11046_v26 = vld [vmem:[#allocation7 + $0x1ca8] ss:$16 sps:$4 sm:$0xff]  }
 0x80e   :  { %6945 = vmatprep.subr.bf16.mxu0 %v10961_v27  ;;  %7031 = vmatprep.subr.bf16.mxu1 %v10964_v28  ;;  %v11051_v27 = vld [vmem:[#allocation7 + $0x1cc4] ss:$16 sps:$4 sm:$0xff]   ;;  %v11054_v28 = vld [vmem:[#allocation7 + $0x1ccc] ss:$16 sps:$4 sm:$0xff]  }
 0x811   :  { %6946 = vmatpush1.bf16.msra.mxu0 %v10959_v29  ;;  %7032 = vmatpush1.bf16.msra.mxu1 %v10962_v30  ;;  %v11049_v29 = vld [vmem:[#allocation7 + $0x1cc0] ss:$16 sps:$4 sm:$0xff]   ;;  %v11052_v30 = vld [vmem:[#allocation7 + $0x1cc8] ss:$16 sps:$4 sm:$0xff]  }
 0x812   :  { %6947 = vmatprep.subr.bf16.mxu0 %v10967_v32  ;;  %7033 = vmatprep.subr.bf16.mxu1 %v10970_v33  ;;  %v11057_v32 = vld [vmem:[#allocation7 + $0x1ce4] ss:$16 sps:$4 sm:$0xff]   ;;  %v11060_v33 = vld [vmem:[#allocation7 + $0x1cec] ss:$16 sps:$4 sm:$0xff]  }
 0x815   :  { %6948 = vmatpush1.bf16.msra.mxu0 %v10965_v9  ;;  %7034 = vmatpush1.bf16.msra.mxu1 %v10968_v34  ;;  %v11055_v9 = vld [vmem:[#allocation7 + $0x1ce0] ss:$16 sps:$4 sm:$0xff]   ;;  %v11058_v34 = vld [vmem:[#allocation7 + $0x1ce8] ss:$16 sps:$4 sm:$0xff]  }
 0x816   :  { %6949 = vmatprep.subr.bf16.mxu0 %v10973_v36  ;;  %7035 = vmatprep.subr.bf16.mxu1 %v10976_v37  ;;  %v11063_v36 = vld [vmem:[#allocation7 + $0x1d04] ss:$16 sps:$4 sm:$0xff]   ;;  %v11066_v37 = vld [vmem:[#allocation7 + $0x1d0c] ss:$16 sps:$4 sm:$0xff]  }
 0x819   :  { %6950 = vmatpush1.bf16.msra.mxu0 %v10971_v12  ;;  %7036 = vmatpush1.bf16.msra.mxu1 %v10974_v38  ;;  %v11061_v12 = vld [vmem:[#allocation7 + $0x1d00] ss:$16 sps:$4 sm:$0xff]   ;;  %v11064_v38 = vld [vmem:[#allocation7 + $0x1d08] ss:$16 sps:$4 sm:$0xff]  }
 0x81a   :  { %6951 = vmatprep.subr.bf16.mxu0 %v10979_v39  ;;  %7037 = vmatprep.subr.bf16.mxu1 %v10982_v40  ;;  %v11069_v39 = vld [vmem:[#allocation7 + $0x1d24] ss:$16 sps:$4 sm:$0xff]   ;;  %v11072_v40 = vld [vmem:[#allocation7 + $0x1d2c] ss:$16 sps:$4 sm:$0xff]  }
 0x81d   :  { %6952 = vmatpush1.bf16.msra.mxu0 %v10977_v41  ;;  %7038 = vmatpush1.bf16.msra.mxu1 %v10980_v42  ;;  %v11067_v41 = vld [vmem:[#allocation7 + $0x1d20] ss:$16 sps:$4 sm:$0xff]   ;;  %v11070_v42 = vld [vmem:[#allocation7 + $0x1d28] ss:$16 sps:$4 sm:$0xff]  }
 0x81e   :  { %6953 = vmatprep.subr.bf16.mxu0 %v10985_v43  ;;  %7039 = vmatprep.subr.bf16.mxu1 %v10988_v44  ;;  %v11075_v43 = vld [vmem:[#allocation7 + $0x1d44] ss:$16 sps:$4 sm:$0xff]   ;;  %v11078_v44 = vld [vmem:[#allocation7 + $0x1d4c] ss:$16 sps:$4 sm:$0xff]  }
 0x821   :  { %6954 = vmatpush1.bf16.msra.mxu0 %v10983_v45  ;;  %7040 = vmatpush1.bf16.msra.mxu1 %v10986_v46  ;;  %v11073_v45 = vld [vmem:[#allocation7 + $0x1d40] ss:$16 sps:$4 sm:$0xff]   ;;  %v11076_v46 = vld [vmem:[#allocation7 + $0x1d48] ss:$16 sps:$4 sm:$0xff]  }
 0x822   :  { %6955 = vmatprep.subr.bf16.mxu0 %v10991_v47  ;;  %7041 = vmatprep.subr.bf16.mxu1 %v10994_v48  ;;  %v11081_v47 = vld [vmem:[#allocation7 + $0x1d64] ss:$16 sps:$4 sm:$0xff]   ;;  %v11084_v48 = vld [vmem:[#allocation7 + $0x1d6c] ss:$16 sps:$4 sm:$0xff]  }
 0x825   :  { %6956 = vmatpush1.bf16.msra.mxu0 %v10989_v49  ;;  %7042 = vmatpush1.bf16.msra.mxu1 %v10992_v50  ;;  %v11079_v49 = vld [vmem:[#allocation7 + $0x1d60] ss:$16 sps:$4 sm:$0xff]   ;;  %v11082_v50 = vld [vmem:[#allocation7 + $0x1d68] ss:$16 sps:$4 sm:$0xff]  }
 0x826   :  { %6957 = vmatprep.subr.bf16.mxu0 %v10997_v51  ;;  %7043 = vmatprep.subr.bf16.mxu1 %v11000_v31  ;;  %v11087_v51 = vld [vmem:[#allocation7 + $0x1d84] ss:$16 sps:$4 sm:$0xff]   ;;  %v11090_v31 = vld [vmem:[#allocation7 + $0x1d8c] ss:$16 sps:$4 sm:$0xff]  }
 0x829   :  { %6958 = vmatpush1.bf16.msra.mxu0 %v10995_v52  ;;  %7044 = vmatpush1.bf16.msra.mxu1 %v10998_v54  ;;  %v11085_v52 = vld [vmem:[#allocation7 + $0x1d80] ss:$16 sps:$4 sm:$0xff]   ;;  %v11088_v54 = vld [vmem:[#allocation7 + $0x1d88] ss:$16 sps:$4 sm:$0xff]  }
 0x82a   :  { %6959 = vmatprep.subr.bf16.mxu0 %v11003_v56  ;;  %7045 = vmatprep.subr.bf16.mxu1 %v11006_v35  ;;  %v11093_v56 = vld [vmem:[#allocation7 + $0x1da4] ss:$16 sps:$4 sm:$0xff]   ;;  %v11096_v35 = vld [vmem:[#allocation7 + $0x1dac] ss:$16 sps:$4 sm:$0xff]  }
 0x82d   :  { %6960 = vmatpush1.bf16.msra.mxu0 %v11001_v57  ;;  %7046 = vmatpush1.bf16.msra.mxu1 %v11004_v59  ;;  %v11091_v57 = vld [vmem:[#allocation7 + $0x1da0] ss:$16 sps:$4 sm:$0xff]   ;;  %v11094_v59 = vld [vmem:[#allocation7 + $0x1da8] ss:$16 sps:$4 sm:$0xff]  }
 0x82e   :  { %6961 = vmatprep.subr.bf16.mxu0 %v11009_v60  ;;  %7047 = vmatprep.subr.bf16.mxu1 %v11012_v61  ;;  %v11099_v60 = vld [vmem:[#allocation7 + $0x1dc4] ss:$16 sps:$4 sm:$0xff]   ;;  %v11102_v61 = vld [vmem:[#allocation7 + $0x1dcc] ss:$16 sps:$4 sm:$0xff]  }
 0x831   :  { %6962 = vmatpush1.bf16.msra.mxu0 %v11007_v62  ;;  %7048 = vmatpush1.bf16.msra.mxu1 %v11010_v63  ;;  %v11097_v62 = vld [vmem:[#allocation7 + $0x1dc0] ss:$16 sps:$4 sm:$0xff]   ;;  %v11100_v63 = vld [vmem:[#allocation7 + $0x1dc8] ss:$16 sps:$4 sm:$0xff]  }
 0x832   :  { %7864 = vmatprep.subr.bf16.mxu0 %v11015_v0  ;;  %7950 = vmatprep.subr.bf16.mxu1 %v11018_v1  ;;  %v11105_v0 = vld [vmem:[#allocation7 + $0x1de4] ss:$16 sps:$4 sm:$0xff]   ;;  %v11108_v1 = vld [vmem:[#allocation7 + $0x1dec] ss:$16 sps:$4 sm:$0xff]  }
 0x834   :  { %6964 = vmatmul.mubr.bf16.vlgmr.msra.gmra.mrb[28].mxu0 %v11574_v58  ;;  %7050 = vmatmul.mubr.bf16.vlgmr.msra.gmra.mrb[28].mxu1 %v11574_v58  ;;  %v11034_v58 = vld [vmem:[#allocation7 + $0x1c68] ss:$16 sps:$4 sm:$0xff]  }
 0x835   :  { %7865 = vmatpush1.bf16.msra.mxu0 %v11013_v2  ;;  %7951 = vmatpush1.bf16.msra.mxu1 %v11016_v3  ;;  %v11103_v2 = vld [vmem:[#allocation7 + $0x1de0] ss:$16 sps:$4 sm:$0xff]   ;;  %v11106_v3 = vld [vmem:[#allocation7 + $0x1de8] ss:$16 sps:$4 sm:$0xff]  }
 0x836   :  { %7866 = vmatprep.subr.bf16.mxu0 %v11021_v4  ;;  %7952 = vmatprep.subr.bf16.mxu1 %v11024_v5  ;;  %v11111_v4 = vld [vmem:[#allocation7 + $0x1e04] ss:$16 sps:$4 sm:$0xff]   ;;  %v11114_v5 = vld [vmem:[#allocation7 + $0x1e0c] ss:$16 sps:$4 sm:$0xff]  }
 0x839   :  { %7867 = vmatpush1.bf16.msra.mxu0 %v11019_v6  ;;  %7953 = vmatpush1.bf16.msra.mxu1 %v11022_v7  ;;  %v6222_v6 = vld [vmem:[#allocation8 + $0x18] sm:$0xf] }
 0x83a   :  { %7868 = vmatprep.subr.bf16.mxu0 %v11027_v8  ;;  %7954 = vmatprep.subr.bf16.mxu1 %v11030_v55  ;;  %v6231_v7 = vrot.slane %v6222_v6, %v11514_v17  ;;  %v6239_v8 = vrot.slane %v6222_v6, %v11518_v19  ;;  %v6235_v55 = vrot.slane %v6222_v6, %v11516_v18 }
 0x83d   :  { %7869 = vmatpush1.bf16.msra.mxu0 %v11025_v10  ;;  %7955 = vmatpush1.bf16.msra.mxu1 %v11028_v53  ;;  %v6243_v10 = vrot.slane %v6222_v6, %v11520_v20  ;;  %v11156_v6 = vld [vmem:[#allocation7 + $0x1eec] ss:$16 sps:$4 sm:$0xff]  }
 0x83e   :  { %7870 = vmatprep.subr.bf16.mxu0 %v11033_v11  ;;  %7956 = vmatprep.subr.bf16.mxu1 %v11036_v13 }
 0x841   :  { %7871 = vmatpush1.bf16.msra.mxu0 %v11031_v14  ;;  %7957 = vmatpush1.bf16.msra.mxu1 %v11034_v58 }
 0x842   :  { %7872 = vmatprep.subr.bf16.mxu0 %v11039_v15  ;;  %7958 = vmatprep.subr.bf16.mxu1 %v11042_v16 }
 0x845   :  { %7873 = vmatpush1.bf16.msra.mxu0 %v11037_v21  ;;  %7959 = vmatpush1.bf16.msra.mxu1 %v11040_v22 }
 0x846   :  { %7874 = vmatprep.subr.bf16.mxu0 %v11045_v23  ;;  %7960 = vmatprep.subr.bf16.mxu1 %v11048_v24 }
 0x849   :  { %7875 = vmatpush1.bf16.msra.mxu0 %v11043_v25  ;;  %7961 = vmatpush1.bf16.msra.mxu1 %v11046_v26 }
 0x84a   :  { %7876 = vmatprep.subr.bf16.mxu0 %v11051_v27  ;;  %7962 = vmatprep.subr.bf16.mxu1 %v11054_v28 }
 0x84d   :  { %7877 = vmatpush1.bf16.msra.mxu0 %v11049_v29  ;;  %7963 = vmatpush1.bf16.msra.mxu1 %v11052_v30 }
 0x84e   :  { %7878 = vmatprep.subr.bf16.mxu0 %v11057_v32  ;;  %7964 = vmatprep.subr.bf16.mxu1 %v11060_v33 }
 0x851   :  { %7879 = vmatpush1.bf16.msra.mxu0 %v11055_v9  ;;  %7965 = vmatpush1.bf16.msra.mxu1 %v11058_v34 }
 0x852   :  { %7880 = vmatprep.subr.bf16.mxu0 %v11063_v36  ;;  %7966 = vmatprep.subr.bf16.mxu1 %v11066_v37 }
 0x855   :  { %7881 = vmatpush1.bf16.msra.mxu0 %v11061_v12  ;;  %7967 = vmatpush1.bf16.msra.mxu1 %v11064_v38 }
 0x856   :  { %7882 = vmatprep.subr.bf16.mxu0 %v11069_v39  ;;  %7968 = vmatprep.subr.bf16.mxu1 %v11072_v40 }
 0x859   :  { %7883 = vmatpush1.bf16.msra.mxu0 %v11067_v41  ;;  %7969 = vmatpush1.bf16.msra.mxu1 %v11070_v42  ;;  %v11109_v42 = vld [vmem:[#allocation7 + $0x1e00] ss:$16 sps:$4 sm:$0xff]  }
 0x85a   :  { %7884 = vmatprep.subr.bf16.mxu0 %v11075_v43  ;;  %7970 = vmatprep.subr.bf16.mxu1 %v11078_v44  ;;  %v11112_v43 = vld [vmem:[#allocation7 + $0x1e08] ss:$16 sps:$4 sm:$0xff]   ;;  %v11117_v44 = vld [vmem:[#allocation7 + $0x1e24] ss:$16 sps:$4 sm:$0xff]  }
 0x85d   :  { %7885 = vmatpush1.bf16.msra.mxu0 %v11073_v45  ;;  %7971 = vmatpush1.bf16.msra.mxu1 %v11076_v46  ;;  %v11120_v45 = vld [vmem:[#allocation7 + $0x1e2c] ss:$16 sps:$4 sm:$0xff]   ;;  %v11115_v46 = vld [vmem:[#allocation7 + $0x1e20] ss:$16 sps:$4 sm:$0xff]  }
 0x85e   :  { %7886 = vmatprep.subr.bf16.mxu0 %v11081_v47  ;;  %7972 = vmatprep.subr.bf16.mxu1 %v11084_v48  ;;  %v11118_v47 = vld [vmem:[#allocation7 + $0x1e28] ss:$16 sps:$4 sm:$0xff]   ;;  %v11123_v48 = vld [vmem:[#allocation7 + $0x1e44] ss:$16 sps:$4 sm:$0xff]  }
 0x861   :  { %7887 = vmatpush1.bf16.msra.mxu0 %v11079_v49  ;;  %7973 = vmatpush1.bf16.msra.mxu1 %v11082_v50  ;;  %v11126_v49 = vld [vmem:[#allocation7 + $0x1e4c] ss:$16 sps:$4 sm:$0xff]   ;;  %v11121_v50 = vld [vmem:[#allocation7 + $0x1e40] ss:$16 sps:$4 sm:$0xff]  }
 0x862   :  { %7888 = vmatprep.subr.bf16.mxu0 %v11087_v51  ;;  %7974 = vmatprep.subr.bf16.mxu1 %v11090_v31  ;;  %v11124_v51 = vld [vmem:[#allocation7 + $0x1e48] ss:$16 sps:$4 sm:$0xff]   ;;  %v11129_v31 = vld [vmem:[#allocation7 + $0x1e64] ss:$16 sps:$4 sm:$0xff]  }
 0x865   :  { %7889 = vmatpush1.bf16.msra.mxu0 %v11085_v52  ;;  %7975 = vmatpush1.bf16.msra.mxu1 %v11088_v54  ;;  %v11132_v52 = vld [vmem:[#allocation7 + $0x1e6c] ss:$16 sps:$4 sm:$0xff]   ;;  %v11127_v54 = vld [vmem:[#allocation7 + $0x1e60] ss:$16 sps:$4 sm:$0xff]  }
 0x866   :  { %7890 = vmatprep.subr.bf16.mxu0 %v11093_v56  ;;  %7976 = vmatprep.subr.bf16.mxu1 %v11096_v35  ;;  %v11130_v56 = vld [vmem:[#allocation7 + $0x1e68] ss:$16 sps:$4 sm:$0xff]   ;;  %v11135_v35 = vld [vmem:[#allocation7 + $0x1e84] ss:$16 sps:$4 sm:$0xff]  }
 0x869   :  { %7891 = vmatpush1.bf16.msra.mxu0 %v11091_v57  ;;  %7977 = vmatpush1.bf16.msra.mxu1 %v11094_v59  ;;  %v11138_v57 = vld [vmem:[#allocation7 + $0x1e8c] ss:$16 sps:$4 sm:$0xff]   ;;  %v11133_v59 = vld [vmem:[#allocation7 + $0x1e80] ss:$16 sps:$4 sm:$0xff]  }
 0x86a   :  { %7892 = vmatprep.subr.bf16.mxu0 %v11099_v60  ;;  %7978 = vmatprep.subr.bf16.mxu1 %v11102_v61  ;;  %v11136_v60 = vld [vmem:[#allocation7 + $0x1e88] ss:$16 sps:$4 sm:$0xff]   ;;  %v11141_v61 = vld [vmem:[#allocation7 + $0x1ea4] ss:$16 sps:$4 sm:$0xff]  }
 0x86d   :  { %7893 = vmatpush1.bf16.msra.mxu0 %v11097_v62  ;;  %7979 = vmatpush1.bf16.msra.mxu1 %v11100_v63  ;;  %v11144_v62 = vld [vmem:[#allocation7 + $0x1eac] ss:$16 sps:$4 sm:$0xff]   ;;  %v11139_v63 = vld [vmem:[#allocation7 + $0x1ea0] ss:$16 sps:$4 sm:$0xff]  }
 0x86e   :  { %7894 = vmatprep.subr.bf16.mxu0 %v11105_v0  ;;  %7980 = vmatprep.subr.bf16.mxu1 %v11108_v1  ;;  %v11142_v0 = vld [vmem:[#allocation7 + $0x1ea8] ss:$16 sps:$4 sm:$0xff]   ;;  %v11147_v1 = vld [vmem:[#allocation7 + $0x1ec4] ss:$16 sps:$4 sm:$0xff]  }
 0x871   :  { %7895 = vmatpush1.bf16.msra.mxu0 %v11103_v2  ;;  %7981 = vmatpush1.bf16.msra.mxu1 %v11106_v3  ;;  %v11150_v2 = vld [vmem:[#allocation7 + $0x1ecc] ss:$16 sps:$4 sm:$0xff]   ;;  %v11145_v3 = vld [vmem:[#allocation7 + $0x1ec0] ss:$16 sps:$4 sm:$0xff]  }
 0x872   :  { %7907 = vmatprep.subr.bf16.mxu0 %v11111_v4  ;;  %7993 = vmatprep.subr.bf16.mxu1 %v11114_v5  ;;  %v11148_v4 = vld [vmem:[#allocation7 + $0x1ec8] ss:$16 sps:$4 sm:$0xff]   ;;  %v11153_v5 = vld [vmem:[#allocation7 + $0x1ee4] ss:$16 sps:$4 sm:$0xff]  }
 0x907   :  { %v6965_v53 = vpop.f32.mrb[28].mxu0  ;;  %v7051_v11 = vpop.f32.mrb[28].mxu1 }
 0x908   :  { %v9572_v13 = vadd.f32 %v6965_v53, %v6231_v7  ;;  %v9576_v14 = vadd.f32 %v7051_v11, %v6239_v8  ;;  %v6967_v58 = vpop.f32.mrb[29].mxu0  ;;  %v7053_v15 = vpop.f32.mrb[29].mxu1  ;;  %v11157_v53 = vld [vmem:[#allocation7 + $0x1f00] ss:$16 sps:$4 sm:$0xff]   ;;  %v11160_v11 = vld [vmem:[#allocation7 + $0x1f08] ss:$16 sps:$4 sm:$0xff]  }
 0x909   :  { %v9573_v16 = vadd.f32 %v6967_v58, %v6235_v55  ;;  %v9577_v21 = vadd.f32 %v7053_v15, %v6243_v10  ;;  %v6969_v22 = vpop.f32.mrb[30].mxu0  ;;  %v7055_v23 = vpop.f32.mrb[30].mxu1  ;;  %v11163_v58 = vld [vmem:[#allocation7 + $0x1f20] ss:$16 sps:$4 sm:$0xff]   ;;  %v11166_v15 = vld [vmem:[#allocation7 + $0x1f28] ss:$16 sps:$4 sm:$0xff]  }
 0x90a   :  { %v9574_v24 = vadd.f32 %v6969_v22, %v6231_v7  ;;  %v9578_v25 = vadd.f32 %v7055_v23, %v6239_v8  ;;  %v6971_v26 = vpop.f32.mrb[31].mxu0  ;;  %v7057_v27 = vpop.f32.mrb[31].mxu1  ;;  %v7060_v30 = vmax.f32 %v9572_v13, 0.0  ;;  %v7062_v32 = vmax.f32 %v9576_v14, 0.0  ;;  %v11151_v7 = vld [vmem:[#allocation7 + $0x1ee0] ss:$16 sps:$4 sm:$0xff]  }
 0x90b   :  { %v9575_v28 = vadd.f32 %v6971_v26, %v6235_v55  ;;  %v9579_v29 = vadd.f32 %v7057_v27, %v6243_v10  ;;  %v7061_v34 = vmax.f32 %v9573_v16, 0.0  ;;  %v7063_v36 = vmax.f32 %v9577_v21, 0.0  ;;  %v11154_v8 = vld [vmem:[#allocation7 + $0x1ee8] ss:$16 sps:$4 sm:$0xff]   ;;  %v11159_v55 = vld [vmem:[#allocation7 + $0x1f04] ss:$16 sps:$4 sm:$0xff]  }
 0x90c   :  { %v7064_v33 = vmax.f32 %v9574_v24, 0.0  ;;  %v7066_v9 = vmax.f32 %v9578_v25, 0.0  ;;  %v11162_v10 = vld [vmem:[#allocation7 + $0x1f0c] ss:$16 sps:$4 sm:$0xff]   ;;  %v11165_v13 = vld [vmem:[#allocation7 + $0x1f24] ss:$16 sps:$4 sm:$0xff]  }
 0x90d   :  { %v7065_v37 = vmax.f32 %v9575_v28, 0.0  ;;  %v7067_v12 = vmax.f32 %v9579_v29, 0.0  ;;  %v11168_v14 = vld [vmem:[#allocation7 + $0x1f2c] ss:$16 sps:$4 sm:$0xff]   ;;  %v11171_v16 = vld [vmem:[#allocation7 + $0x1f44] ss:$16 sps:$4 sm:$0xff]  }
 0x90e   :  { %v7199_v38 = vpack.c.bf16 %v7064_v33, %v7060_v30  ;;  %v11582_v39 = vpack.c.bf16 %v7066_v9, %v7062_v32  ;;  %v11174_v21 = vld [vmem:[#allocation7 + $0x1f4c] ss:$16 sps:$4 sm:$0xff]   ;;  %v11169_v22 = vld [vmem:[#allocation7 + $0x1f40] ss:$16 sps:$4 sm:$0xff]   ;;  %v11172_v23 = vld [vmem:[#allocation7 + $0x1f48] ss:$16 sps:$4 sm:$0xff]  }
 0x90f   :  { %v7200_v40 = vpack.c.bf16 %v7065_v37, %v7061_v34  ;;  %v7202_v41 = vpack.c.bf16 %v7067_v12, %v7063_v36  ;;  %v11177_v24 = vld [vmem:[#allocation7 + $0x1f64] ss:$16 sps:$4 sm:$0xff]   ;;  %v11180_v25 = vld [vmem:[#allocation7 + $0x1f6c] ss:$16 sps:$4 sm:$0xff]   ;;  %v11175_v26 = vld [vmem:[#allocation7 + $0x1f60] ss:$16 sps:$4 sm:$0xff]  }
 0x910   :  { %v11178_v27 = vld [vmem:[#allocation7 + $0x1f68] ss:$16 sps:$4 sm:$0xff]   ;;  %v11183_v28 = vld [vmem:[#allocation7 + $0x1f84] ss:$16 sps:$4 sm:$0xff]   ;;  %v11186_v29 = vld [vmem:[#allocation7 + $0x1f8c] ss:$16 sps:$4 sm:$0xff]  }
 0x911   :  { %7896 = vmatprep.mubr.bf16.mxu0 %v7200_v40  ;;  %7982 = vmatprep.mubr.bf16.mxu1 %v7200_v40  ;;  %v11181_v30 = vld [vmem:[#allocation7 + $0x1f80] ss:$16 sps:$4 sm:$0xff]   ;;  %v11184_v32 = vld [vmem:[#allocation7 + $0x1f88] ss:$16 sps:$4 sm:$0xff]   ;;  %v11189_v33 = vld [vmem:[#allocation7 + $0x1fa4] ss:$16 sps:$4 sm:$0xff]  }
 0x912   :  { %7897 = vmatmul.mubr.bf16.vlgmr.msra.gmra.mrb[32].mxu0 %v7199_v38  ;;  %7983 = vmatmul.mubr.bf16.vlgmr.msra.gmra.mrb[32].mxu1 %v7199_v38  ;;  %v11192_v9 = vld [vmem:[#allocation7 + $0x1fac] ss:$16 sps:$4 sm:$0xff]   ;;  %v11187_v34 = vld [vmem:[#allocation7 + $0x1fa0] ss:$16 sps:$4 sm:$0xff]   ;;  %v11190_v36 = vld [vmem:[#allocation7 + $0x1fa8] ss:$16 sps:$4 sm:$0xff]  }
 0x913   :  { %7908 = vmatpush1.bf16.msra.mxu0 %v11109_v42  ;;  %7994 = vmatpush1.bf16.msra.mxu1 %v11112_v43  ;;  %v11195_v37 = vld [vmem:[#allocation7 + $0x1fc4] ss:$16 sps:$4 sm:$0xff]   ;;  %v11198_v12 = vld [vmem:[#allocation7 + $0x1fcc] ss:$16 sps:$4 sm:$0xff]   ;;  %v11193_v38 = vld [vmem:[#allocation7 + $0x1fc0] ss:$16 sps:$4 sm:$0xff]  }
 0x914   :  { %7939 = vmatprep.mubr.bf16.mxu0 %v7202_v41  ;;  %8025 = vmatprep.mubr.bf16.mxu1 %v7202_v41  ;;  %v11196_v40 = vld [vmem:[#allocation7 + $0x1fc8] ss:$16 sps:$4 sm:$0xff]   ;;  %v11201_v41 = vld [vmem:[#allocation7 + $0x1fe4] ss:$16 sps:$4 sm:$0xff]   ;;  %v11204_v42 = vld [vmem:[#allocation7 + $0x1fec] ss:$16 sps:$4 sm:$0xff]  }
 0x915   :  { %7909 = vmatprep.subr.bf16.mxu0 %v11117_v44  ;;  %7995 = vmatprep.subr.bf16.mxu1 %v11120_v45  ;;  %v11199_v43 = vld [vmem:[#allocation7 + $0x1fe0] ss:$16 sps:$4 sm:$0xff]   ;;  %v11202_v44 = vld [vmem:[#allocation7 + $0x1fe8] ss:$16 sps:$4 sm:$0xff]  }
 0x916   :  { %v11205_v45 = vld [vmem:[%s11703_s5 + $0x40] sm:$0xff]  }
 0x917   :  { %7910 = vmatpush1.bf16.msra.mxu0 %v11115_v46  ;;  %7996 = vmatpush1.bf16.msra.mxu1 %v11118_v47  ;;  %v11206_v46 = vld [vmem:[%s11703_s5 + $0xc0] sm:$0xff]  }
 0x918   :  { %7911 = vmatprep.subr.bf16.mxu0 %v11123_v48  ;;  %7997 = vmatprep.subr.bf16.mxu1 %v11126_v49  ;;  %v11207_v47 = vld [vmem:[%s11703_s5] sm:$0xff]   ;;  %v11209_v49 = vld [vmem:[%s11703_s5 + $0x48] sm:$0xff]  }
 0x919   :  { %v11208_v48 = vld [vmem:[%s11703_s5 + $0x80] sm:$0xff]  }
 0x91b   :  { %7912 = vmatpush1.bf16.msra.mxu0 %v11121_v50  ;;  %7998 = vmatpush1.bf16.msra.mxu1 %v11124_v51  ;;  %v11210_v50 = vld [vmem:[%s11703_s5 + $0xc8] sm:$0xff]  }
 0x91c   :  { %7913 = vmatprep.subr.bf16.mxu0 %v11129_v31  ;;  %7999 = vmatprep.subr.bf16.mxu1 %v11132_v52  ;;  %v11211_v51 = vld [vmem:[%s11703_s5 + $0x8] sm:$0xff]   ;;  %v11213_v52 = vld [vmem:[%s11703_s5 + $0x50] sm:$0xff]  }
 0x91d   :  { %v11212_v31 = vld [vmem:[%s11703_s5 + $0x88] sm:$0xff]  }
 0x91f   :  { %7914 = vmatpush1.bf16.msra.mxu0 %v11127_v54  ;;  %8000 = vmatpush1.bf16.msra.mxu1 %v11130_v56  ;;  %v11215_v54 = vld [vmem:[%s11703_s5 + $0x10] sm:$0xff]  }
 0x920   :  { %7915 = vmatprep.subr.bf16.mxu0 %v11135_v35  ;;  %8001 = vmatprep.subr.bf16.mxu1 %v11138_v57  ;;  %v11216_v56 = vld [vmem:[%s11703_s5 + $0x90] sm:$0xff]   ;;  %v11217_v35 = vld [vmem:[%s11703_s5 + $0x58] sm:$0xff]  }
 0x921   :  { %v11218_v57 = vld [vmem:[%s11703_s5 + $0xd8] sm:$0xff]  }
 0x923   :  { %7916 = vmatpush1.bf16.msra.mxu0 %v11133_v59  ;;  %8002 = vmatpush1.bf16.msra.mxu1 %v11136_v60  ;;  %v11219_v59 = vld [vmem:[%s11703_s5 + $0x18] sm:$0xff]  }
 0x924   :  { %7917 = vmatprep.subr.bf16.mxu0 %v11141_v61  ;;  %8003 = vmatprep.subr.bf16.mxu1 %v11144_v62  ;;  %v11220_v60 = vld [vmem:[%s11703_s5 + $0x98] sm:$0xff]   ;;  %v11221_v61 = vld [vmem:[%s11703_s5 + $0x60] sm:$0xff]  }
 0x925   :  { %v11222_v62 = vld [vmem:[%s11703_s5 + $0xe0] sm:$0xff]  }
 0x927   :  { %7918 = vmatpush1.bf16.msra.mxu0 %v11139_v63  ;;  %8004 = vmatpush1.bf16.msra.mxu1 %v11142_v0  ;;  %v11223_v63 = vld [vmem:[%s11703_s5 + $0x20] sm:$0xff]  }
 0x928   :  { %7919 = vmatprep.subr.bf16.mxu0 %v11147_v1  ;;  %8005 = vmatprep.subr.bf16.mxu1 %v11150_v2  ;;  %v11224_v0 = vld [vmem:[%s11703_s5 + $0xa0] sm:$0xff]   ;;  %v11225_v1 = vld [vmem:[%s11703_s5 + $0x68] sm:$0xff]  }
 0x929   :  { %v11226_v2 = vld [vmem:[%s11703_s5 + $0xe8] sm:$0xff]  }
 0x92b   :  { %7920 = vmatpush1.bf16.msra.mxu0 %v11145_v3  ;;  %8006 = vmatpush1.bf16.msra.mxu1 %v11148_v4  ;;  %v11227_v3 = vld [vmem:[%s11703_s5 + $0x28] sm:$0xff]  }
 0x92c   :  { %7921 = vmatprep.subr.bf16.mxu0 %v11153_v5  ;;  %8007 = vmatprep.subr.bf16.mxu1 %v11156_v6  ;;  %v11228_v4 = vld [vmem:[%s11703_s5 + $0xa8] sm:$0xff]   ;;  %v11229_v5 = vld [vmem:[%s11703_s5 + $0x70] sm:$0xff]  }
 0x92d   :  { %v11230_v6 = vld [vmem:[%s11703_s5 + $0xf0] sm:$0xff]  }
 0x92f   :  { %7922 = vmatpush1.bf16.msra.mxu0 %v11151_v7  ;;  %8008 = vmatpush1.bf16.msra.mxu1 %v11154_v8  ;;  %v11231_v7 = vld [vmem:[%s11703_s5 + $0x30] sm:$0xff]  }
 0x930   :  { %7923 = vmatprep.subr.bf16.mxu0 %v11159_v55  ;;  %8009 = vmatprep.subr.bf16.mxu1 %v11162_v10  ;;  %v11232_v8 = vld [vmem:[%s11703_s5 + $0xb0] sm:$0xff]   ;;  %v11233_v55 = vld [vmem:[%s11703_s5 + $0x78] sm:$0xff]  }
 0x931   :  { %v11234_v10 = vld [vmem:[%s11703_s5 + $0xf8] sm:$0xff]  }
 0x933   :  { %7924 = vmatpush1.bf16.msra.mxu0 %v11157_v53  ;;  %8010 = vmatpush1.bf16.msra.mxu1 %v11160_v11  ;;  %v11235_v53 = vld [vmem:[%s11703_s5 + $0x38] sm:$0xff]  }
 0x934   :  { %7925 = vmatprep.subr.bf16.mxu0 %v11165_v13  ;;  %8011 = vmatprep.subr.bf16.mxu1 %v11168_v14  ;;  %v11236_v11 = vld [vmem:[%s11703_s5 + $0xb8] sm:$0xff]   ;;  %v7198_v13 = vld [vmem:[#allocation8 + $0x1c] sm:$0xf] }
 0x935   :  { %v7207_v14 = vrot.slane %v7198_v13, %v11514_v17 }
 0x937   :  { %7926 = vmatpush1.bf16.msra.mxu0 %v11163_v58  ;;  %8012 = vmatpush1.bf16.msra.mxu1 %v11166_v15  ;;  %v7215_v58 = vrot.slane %v7198_v13, %v11518_v19  ;;  %v7211_v15 = vrot.slane %v7198_v13, %v11516_v18 }
 0x938   :  { %7927 = vmatprep.subr.bf16.mxu0 %v11171_v16  ;;  %8013 = vmatprep.subr.bf16.mxu1 %v11174_v21  ;;  %v7219_v16 = vrot.slane %v7198_v13, %v11520_v20 }
 0x93b   :  { %7928 = vmatpush1.bf16.msra.mxu0 %v11169_v22  ;;  %8014 = vmatpush1.bf16.msra.mxu1 %v11172_v23 }
 0x93c   :  { %7929 = vmatprep.subr.bf16.mxu0 %v11177_v24  ;;  %8015 = vmatprep.subr.bf16.mxu1 %v11180_v25 }
 0x93f   :  { %7930 = vmatpush1.bf16.msra.mxu0 %v11175_v26  ;;  %8016 = vmatpush1.bf16.msra.mxu1 %v11178_v27 }
 0x940   :  { %7931 = vmatprep.subr.bf16.mxu0 %v11183_v28  ;;  %8017 = vmatprep.subr.bf16.mxu1 %v11186_v29 }
 0x943   :  { %7932 = vmatpush1.bf16.msra.mxu0 %v11181_v30  ;;  %8018 = vmatpush1.bf16.msra.mxu1 %v11184_v32 }
 0x944   :  { %7933 = vmatprep.subr.bf16.mxu0 %v11189_v33  ;;  %8019 = vmatprep.subr.bf16.mxu1 %v11192_v9 }
 0x947   :  { %7934 = vmatpush1.bf16.msra.mxu0 %v11187_v34  ;;  %8020 = vmatpush1.bf16.msra.mxu1 %v11190_v36 }
 0x948   :  { %7935 = vmatprep.subr.bf16.mxu0 %v11195_v37  ;;  %8021 = vmatprep.subr.bf16.mxu1 %v11198_v12 }
 0x94b   :  { %7936 = vmatpush1.bf16.msra.mxu0 %v11193_v38  ;;  %8022 = vmatpush1.bf16.msra.mxu1 %v11196_v40 }
 0x94c   :  { %7937 = vmatprep.subr.bf16.mxu0 %v11201_v41  ;;  %8023 = vmatprep.subr.bf16.mxu1 %v11204_v42 }
 0x94f   :  { %7938 = vmatpush1.bf16.msra.mxu0 %v11199_v43  ;;  %8024 = vmatpush1.bf16.msra.mxu1 %v11202_v44 }
 0x950   :  { %9480 = vmatprep.subr.bf16.mxu0 %v11205_v45  ;;  %9502 = vmatprep.subr.bf16.mxu1 %v11206_v46 }
 0x952   :  { %7940 = vmatmul.mubr.bf16.vlgmr.msra.gmra.mrb[32].mxu0 %v11582_v39  ;;  %8026 = vmatmul.mubr.bf16.vlgmr.msra.gmra.mrb[32].mxu1 %v11582_v39  ;;  %v11214_v39 = vld [vmem:[%s11703_s5 + $0xd0] sm:$0xff]   ;;  %s11387_s5 = smov [#allocation11]  }
 0x953   :  { %9481 = vmatpush3.bf16.msra.mxu0 %v11207_v47  ;;  %9503 = vmatpush3.bf16.msra.mxu1 %v11208_v48  ;;  %v9447_v48 = vld [vmem:[#allocation10] ss:$0 sm:$0xff]  ;;  %s8401_s22 = sshll.u32 %s11387_s5, 4  ;;  %s8402_s22 = int_to_ptr.vmem [resolvable:$true] %s8401_s22 }
 0x954   :  { %9482 = vmatprep.subr.bf16.mxu0 %v11209_v49  ;;  %9504 = vmatprep.subr.bf16.mxu1 %v11210_v50  ;;  %s11347_s2 = scalar_lea.vmem %s8402_s22, 256  ;;  %p11352_p13 = scmp.lt.s32.totalorder %s8402_s22, %s8402_s22 }
 0x955   :  { %p11348_p12 = scmp.ne.s32.totalorder %s8402_s22, %s11347_s2  ;;  %p11353_p0 = scmp.lt.s32.totalorder %s11347_s2, %s11347_s2 }
 0x957   :  { %9483 = vmatpush3.bf16.msra.mxu0 %v11211_v51  ;;  %9505 = vmatpush3.bf16.msra.mxu1 %v11212_v31  ;;  %p11354_p1 = por %p11353_p0, %p11352_p13 }
 0x958   :  { %9484 = vmatprep.subr.bf16.mxu0 %v11213_v52  ;;  %9506 = vmatprep.subr.bf16.mxu1 %v11214_v39 }
 0x959   :  { %p11355_p2 = pnand %p11354_p1, %p11348_p12 }
 0x95b   :  { %9485 = vmatpush3.bf16.msra.mxu0 %v11215_v54  ;;  %9507 = vmatpush3.bf16.msra.mxu1 %v11216_v56 }
 0x95c   :  { %9486 = vmatprep.subr.bf16.mxu0 %v11217_v35  ;;  %9508 = vmatprep.subr.bf16.mxu1 %v11218_v57 }
 0x95f   :  { %9487 = vmatpush3.bf16.msra.mxu0 %v11219_v59  ;;  %9509 = vmatpush3.bf16.msra.mxu1 %v11220_v60 }
 0x960   :  { %9488 = vmatprep.subr.bf16.mxu0 %v11221_v61  ;;  %9510 = vmatprep.subr.bf16.mxu1 %v11222_v62 }
 0x963   :  { %9489 = vmatpush3.bf16.msra.mxu0 %v11223_v63  ;;  %9511 = vmatpush3.bf16.msra.mxu1 %v11224_v0 }
 0x964   :  { %9490 = vmatprep.subr.bf16.mxu0 %v11225_v1  ;;  %9512 = vmatprep.subr.bf16.mxu1 %v11226_v2 }
 0x967   :  { %9491 = vmatpush3.bf16.msra.mxu0 %v11227_v3  ;;  %9513 = vmatpush3.bf16.msra.mxu1 %v11228_v4 }
 0x968   :  { %9492 = vmatprep.subr.bf16.mxu0 %v11229_v5  ;;  %9514 = vmatprep.subr.bf16.mxu1 %v11230_v6 }
 0x96b   :  { %9493 = vmatpush3.bf16.msra.mxu0 %v11231_v7  ;;  %9515 = vmatpush3.bf16.msra.mxu1 %v11232_v8 }
 0x96c   :  { %9494 = vmatprep.subr.bf16.mxu0 %v11233_v55  ;;  %9516 = vmatprep.subr.bf16.mxu1 %v11234_v10 }
 0x96f   :  { %9495 = vmatpush3.bf16.msra.mxu0 %v11235_v53  ;;  %9517 = vmatpush3.bf16.msra.mxu1 %v11236_v11 }
 0xa25   :  { %v7941_v21 = vpop.f32.mrb[32].mxu0  ;;  %v8027_v22 = vpop.f32.mrb[32].mxu1 }
 0xa26   :  { %v9580_v23 = vadd.f32 %v7941_v21, %v7207_v14  ;;  %v9584_v24 = vadd.f32 %v8027_v22, %v7215_v58  ;;  %v7943_v25 = vpop.f32.mrb[33].mxu0  ;;  %v8029_v26 = vpop.f32.mrb[33].mxu1 }
 0xa27   :  { %v9581_v27 = vadd.f32 %v7943_v25, %v7211_v15  ;;  %v9585_v28 = vadd.f32 %v8029_v26, %v7219_v16  ;;  %v7945_v29 = vpop.f32.mrb[34].mxu0  ;;  %v8031_v30 = vpop.f32.mrb[34].mxu1 }
 0xa28   :  { %v9582_v32 = vadd.f32 %v7945_v29, %v7207_v14  ;;  %v9586_v33 = vadd.f32 %v8031_v30, %v7215_v58  ;;  %v7947_v9 = vpop.f32.mrb[35].mxu0  ;;  %v8033_v17 = vpop.f32.mrb[35].mxu1  ;;  %v8036_v36 = vmax.f32 %v9580_v23, 0.0  ;;  %v8038_v18 = vmax.f32 %v9584_v24, 0.0 }
 0xa29   :  { %v9583_v34 = vadd.f32 %v7947_v9, %v7211_v15  ;;  %v9587_v19 = vadd.f32 %v8033_v17, %v7219_v16  ;;  %v8037_v12 = vmax.f32 %v9581_v27, 0.0  ;;  %v8039_v38 = vmax.f32 %v9585_v28, 0.0 }
 0xa2a   :  { %v8040_v37 = vmax.f32 %v9582_v32, 0.0  ;;  %v8042_v20 = vmax.f32 %v9586_v33, 0.0 }
 0xa2b   :  { %v8041_v40 = vmax.f32 %v9583_v34, 0.0  ;;  %v8043_v41 = vmax.f32 %v9587_v19, 0.0 }
 0xa2c   :  { %v8109_v42 = vpack.c.bf16 %v8040_v37, %v8036_v36  ;;  %v8111_v43 = vpack.c.bf16 %v8042_v20, %v8038_v18 }
 0xa2d   :  { %v8110_v44 = vpack.c.bf16 %v8041_v40, %v8037_v12  ;;  %v8112_v45 = vpack.c.bf16 %v8043_v41, %v8039_v38 }
 0xa2f   :  { %8343 = vmatprep.mubr.bf16.mxu0 %v8110_v44  ;;  %8384 = vmatprep.mubr.bf16.mxu1 %v8112_v45 }
 0xa30   :  { %8344 = vmatmul.mubr.bf16.vlgmr.msra.gmra.mrb[36].mxu0 %v8109_v42  ;;  %8385 = vmatmul.mubr.bf16.vlgmr.msra.gmra.mrb[36].mxu1 %v8111_v43 }
 0xb03   :  { %v9496_v46 = vpop.f32.mrb[36].mxu0  ;;  %v9518_v47 = vpop.f32.mrb[36].mxu1 }
 0xb04   :  { %v9497_v49 = vpop.f32.mrb[37].mxu0  ;;  %v9519_v50 = vpop.f32.mrb[37].mxu1 }
 0xb05   :  { %v9498_v51 = vadd.f32 %v9497_v49, %v9496_v46  ;;  %v9520_v31 = vadd.f32 %v9519_v50, %v9518_v47  ;;  %v9499_v52 = vpop.f32.mrb[38].mxu0  ;;  %v9521_v39 = vpop.f32.mrb[38].mxu1 }
 0xb06   :  { %v9500_v54 = vpop.f32.mrb[39].mxu0  ;;  %v9522_v56 = vpop.f32.mrb[39].mxu1 }
 0xb07   :  { %v8346_v35 = vadd.f32 %v9498_v51, %v9447_v48  ;;  %v9501_v57 = vadd.f32 %v9500_v54, %v9499_v52  ;;  %v9523_v59 = vadd.f32 %v9522_v56, %v9521_v39 }
 0xb09   :  { %v8387_v60 = vadd.f32 %v9520_v31, %v8346_v35  ;;  %v8349_v61 = vadd.f32 %v9501_v57, %v9447_v48 }
 0xb0b   :  { %8394 = vst.msk [vmem:[#allocation11] sm:$0xff] %vm8393_vm2, %v8387_v60  ;;  %v8390_v62 = vadd.f32 %v9523_v59, %v8349_v61 }
 0xb0d   :  { %8395 = vst.msk [vmem:[#allocation11 + $0x8] sm:$0xff] %vm8393_vm2, %v8390_v62 }
 0xb0e   :  { %11358 = shalt.err (!%p11355_p2)
}
 0xb0f   :  { %s11359_s24 = scalar_lea.hbm %s11705_s7, 256 }
 0xb10   :  { %p11360_p3 = scmp.ne.s32.totalorder %s11705_s7, %s11359_s24  ;;  %p11363_p4 = scmp.lt.u32.totalorder %s11359_s24, %s11705_s7 }
 0xb12   :  { %p11365_p5 = pnand %p11363_p4, %p11360_p3 }
 0xb14   :  { %11368 = shalt.err (!%p11365_p5)
}
 0xb15   :  { %s11388_s8 = smov 128   ;;  %s11389_s9 = smov 8  }
 0xb16   :  { %8407 = dma.vmem_to_hbm [thread:$0]  %s8402_s22, 256, %s11705_s7, [#allocation4], %s11388_s8, %s11388_s8, %s11389_s9  }
 0xb17   :  { %11375 = dma.done.wait [#allocation4], 256  }
 0xb18   :  { %11376 = vsyncadd [#allocation4], 4294967040 }
 0xb19   :  { %8411 = vsyncpa [#allocation3], 1 }
 0xb1a   :  { %8412 = vsyncpa [#allocation6], 1 }
 0xb1b   :  { %8413 = vsyncpa [#allocation9], 1 }
 0xb1c   :  { %8414 = vsyncpa [#allocation4], 1 }

</bundles_post_ra>
